<compile_context>
chip_gen: v7x
topology: tpu7x:2x2x1
jax: 0.10.0
libtpu: 0.0.40
codegen_flags: <defaults>
</compile_context>

<pallas_src>
import functools
import math

import numpy as np

import jax
import jax.numpy as jnp
from jax import lax
from jax.experimental import pallas as pl
from jax.experimental.pallas import tpu as pltpu


_BIG = 1e30       # sentinel for "unbounded" clip parameter
_EPS = 1e-5       # absolute slack (boxes are metric); absorbs f32 rounding
_PAR_TOL = 1e-3   # near-parallel threshold, relative to edge length


def _clip_edge(px, py, ex, ey, hx, hy, exclude_coincident):
    """Liang-Barsky clip of segment (px,py) + t*(ex,ey), t in [0,1], against
    the axis-aligned box |x| <= hx, |y| <= hy (hx, hy already EPS-inflated).

    exclude_coincident: drop pieces that run (near-)parallel to and within the
    EPS band of a clip boundary when the segment's polygon interior matches
    the clip-box interior (shared boundary pieces already counted by pass 1).
    Returns (t_lo, t_hi, valid)."""
    ex_zero = ex == 0.0
    ey_zero = ey == 0.0
    ex_pos = ex > 0.0
    ex_neg = ex < 0.0
    ey_pos = ey > 0.0
    ey_neg = ey < 0.0
    inv_ex = 1.0 / jnp.where(ex_zero, 1.0, ex)
    inv_ey = 1.0 / jnp.where(ey_zero, 1.0, ey)

    if exclude_coincident:
        abs_ex = jnp.abs(ex)
        abs_ey = jnp.abs(ey)
        par = _PAR_TOL * (abs_ex + abs_ey)
        q_tol = 2.0 * _EPS
    else:
        abs_ex = abs_ey = par = q_tol = None

    # Constraints p*t <= q with p in {-ex, ex, -ey, ey}.  The reciprocal,
    # sign tests and |p| are shared across the 4 constraints.
    constraints = (
        # (q,        q/p,     p<0,    p>0,    p==0,    same,   |p|)
        (px + hx, -inv_ex, ex_pos, ex_neg, ex_zero, ey_neg, abs_ex),
        (hx - px,  inv_ex, ex_neg, ex_pos, ex_zero, ey_pos, abs_ex),
        (py + hy, -inv_ey, ey_pos, ey_neg, ey_zero, ex_pos, abs_ey),
        (hy - py,  inv_ey, ey_neg, ey_pos, ey_zero, ex_neg, abs_ey),
    )
    t_lo = jnp.zeros_like(px)
    t_hi = jnp.ones_like(px)
    ok = None
    for q, inv_p, p_neg, p_pos, p_zero, same, abs_p in constraints:
        r = q * inv_p                                   # only used where p != 0
        t_lo = jnp.maximum(t_lo, jnp.where(p_neg, r, -_BIG))
        t_hi = jnp.minimum(t_hi, jnp.where(p_pos, r, _BIG))
        feas = (~p_zero) | (q >= 0.0)
        if exclude_coincident:
            feas = feas & ~((abs_p <= par) & (q <= q_tol) & same)
        ok = feas if ok is None else ok & feas
    return t_lo, t_hi, ok & (t_lo <= t_hi)


def _chunk_loss(pa, pb):
    """1 - rotated 3D IoU for one 1024-box chunk.

    pa, pb: lists of eight (8, 128) f32 slabs [x, y, z, dx, dy, dz, cos, sin].
    """
    xa, ya, za, dxa, dya, dza, ca, sa = pa
    xb, yb, zb, dxb, dyb, dzb, cb, sb = pb

    # Pose of B in A's local frame.
    tx = xb - xa
    ty = yb - ya
    cx = ca * tx + sa * ty
    cy = ca * ty - sa * tx
    cr = ca * cb + sa * sb          # cos(rb - ra)
    sr = ca * sb - sa * cb          # sin(rb - ra)

    area_a = dxa * dya
    area_b = dxb * dyb

    # ---- pass 1: pieces of A's boundary inside B ---------------------------
    # A is axis-aligned & centered in its own frame, so each clipped piece
    # contributes (t1 - t0) * 0.5 * area_a to the Green's-theorem sum.
    cr_dxa = cr * dxa; sr_dxa = sr * dxa
    cr_dya = cr * dya; sr_dya = sr * dya
    cr_hax = 0.5 * cr_dxa; sr_hax = 0.5 * sr_dxa
    cr_hay = 0.5 * cr_dya; sr_hay = 0.5 * sr_dya
    hbx_e = 0.5 * dxb + _EPS
    hby_e = 0.5 * dyb + _EPS

    base_x = cr * cx + sr * cy
    base_y = sr * cx - cr * cy
    u_pos = cr_hax - base_x
    u_neg = -cr_hax - base_x
    v_pos = cr_hay + base_y
    v_neg = -cr_hay + base_y
    # A's CCW corners (1,1), (-1,1), (-1,-1), (1,-1) expressed in B's frame.
    pxb = (u_pos + sr_hay, u_neg + sr_hay, u_neg - sr_hay, u_pos - sr_hay)
    pyb = (v_pos - sr_hax, v_pos + sr_hax, v_neg + sr_hax, v_neg - sr_hax)
    # A's edge vectors rotated into B's frame.
    exb = (-cr_dxa, -sr_dya, cr_dxa, sr_dya)
    eyb = (sr_dxa, -cr_dya, -sr_dxa, cr_dya)

    sum_t = None
    for i in range(4):
        t0, t1, ok = _clip_edge(pxb[i], pyb[i], exb[i], eyb[i],
                                hbx_e, hby_e, False)
        dt = jnp.where(ok, t1 - t0, 0.0)
        sum_t = dt if sum_t is None else sum_t + dt
    twice_area = (0.5 * area_a) * sum_t

    # ---- pass 2: pieces of B's boundary inside A (A's frame) ---------------
    # Shared coincident edges were counted in pass 1, so they are excluded.
    cr_dxb = cr * dxb; sr_dxb = sr * dxb
    cr_dyb = cr * dyb; sr_dyb = sr * dyb
    cr_hbx = 0.5 * cr_dxb; sr_hbx = 0.5 * sr_dxb
    cr_hby = 0.5 * cr_dyb; sr_hby = 0.5 * sr_dyb
    hax_e = 0.5 * dxa + _EPS
    hay_e = 0.5 * dya + _EPS

    vx_pos = cx + cr_hbx
    vx_neg = cx - cr_hbx
    wy_pos = cy + sr_hbx
    wy_neg = cy - sr_hbx
    bcx = (vx_pos - sr_hby, vx_neg - sr_hby, vx_neg + sr_hby, vx_pos + sr_hby)
    bcy = (wy_pos + cr_hby, wy_neg + cr_hby, wy_neg - cr_hby, wy_pos - cr_hby)
    bex = (-cr_dxb, sr_dyb, cr_dxb, -sr_dyb)
    bey = (-sr_dxb, -cr_dyb, sr_dxb, cr_dyb)

    for i in range(4):
        t0, t1, ok = _clip_edge(bcx[i], bcy[i], bex[i], bey[i],
                                hax_e, hay_e, True)
        cross = bcx[i] * bey[i] - bcy[i] * bex[i]     # q1 x q2 = (t1-t0)*(p x e)
        twice_area = twice_area + jnp.where(ok, (t1 - t0) * cross, 0.0)

    bev_inter = jnp.minimum(jnp.maximum(0.5 * twice_area, 0.0),
                            jnp.minimum(area_a, area_b))

    # ---- height overlap & 3D IoU --------------------------------------------
    top = jnp.minimum(za + 0.5 * dza, zb + 0.5 * dzb)
    bot = jnp.maximum(za - 0.5 * dza, zb - 0.5 * dzb)
    h_inter = jnp.maximum(top - bot, 0.0)

    vol_a = area_a * dza
    vol_b = area_b * dzb
    vol_inter = bev_inter * h_inter
    iou3d = vol_inter / jnp.maximum(vol_a + vol_b - vol_inter, 1e-6)
    return 1.0 - iou3d


def _iou3d_loss_kernel(*refs, num_chunks, has_weights):
    """a/b refs: (8, C, 8, 128); weights/out refs: (C, 8, 128)."""
    if has_weights:
        a_ref, b_ref, w_ref, o_ref = refs
    else:
        a_ref, b_ref, o_ref = refs
        w_ref = None

    def process(c):
        pa = [a_ref[i, c] for i in range(8)]                 # eight (8,128) slabs
        pb = [b_ref[i, c] for i in range(8)]
        # torch.where(torch.isnan(target), input, target)
        pb = [jnp.where(jnp.isnan(t), p, t) for p, t in zip(pa, pb)]
        loss = _chunk_loss(pa, pb)
        if has_weights:
            loss = loss * w_ref[c]
        o_ref[c] = loss.astype(o_ref.dtype)

    if num_chunks == 1:
        process(0)
    else:
        def body(c, carry):
            process(c)
            return carry
        lax.fori_loop(0, num_chunks, body, 0)


def _round_up(x, m):
    return (x + m - 1) // m * m


def _pack_boxes(boxes, n_pad):
    """(N, 7) [x,y,z,dx,dy,dz,heading] -> (8, n_pad/1024, 8, 128) float32 with
    heading replaced by (cos, sin) so the kernel needs no transcendentals."""
    b = boxes.astype(jnp.float32)
    feats = jnp.concatenate(
        [b[:, :6], jnp.cos(b[:, 6:7]), jnp.sin(b[:, 6:7])], axis=1)   # (N, 8)
    n = b.shape[0]
    if n_pad != n:
        feats = jnp.pad(feats, ((0, n_pad - n), (0, 0)))
    # (n_pad, 8) -> (param, chunk, sublane, lane); box = chunk*1024 + sub*128 + lane
    return feats.reshape(n_pad // 1024, 8, 128, 8).transpose(3, 0, 1, 2)


@functools.partial(jax.jit, static_argnames=("tile_boxes",))
def _iou3d_loss_impl(boxes_pred, boxes_target, weights, *, tile_boxes):
    n = boxes_pred.shape[0]
    # Work in 1024-box chunks (one (8,128) vreg slab per box parameter).
    n_ch = -(-n // 1024)
    tile_ch = max(1, tile_boxes // 1024)
    if n_ch >= 2:
        # Keep >= 2 parallel grid steps so v7x's dual TensorCores both work.
        chunks_per_step = min(tile_ch, (n_ch + 1) // 2)
    else:
        chunks_per_step = 1
    n_ch_pad = _round_up(n_ch, chunks_per_step)
    n_pad = n_ch_pad * 1024
    grid = (n_ch_pad // chunks_per_step,)

    a = _pack_boxes(boxes_pred, n_pad)       # (8, n_ch_pad, 8, 128)
    b = _pack_boxes(boxes_target, n_pad)

    has_weights = weights is not None
    in_specs = [
        pl.BlockSpec((8, chunks_per_step, 8, 128), lambda i: (0, i, 0, 0)),
        pl.BlockSpec((8, chunks_per_step, 8, 128), lambda i: (0, i, 0, 0)),
    ]
    args = [a, b]
    if has_weights:
        w = weights.astype(jnp.float32)
        if n_pad != n:
            w = jnp.pad(w, (0, n_pad - n))
        args.append(w.reshape(n_ch_pad, 8, 128))
        in_specs.append(
            pl.BlockSpec((chunks_per_step, 8, 128), lambda i: (i, 0, 0)))

    kernel = functools.partial(_iou3d_loss_kernel,
                               num_chunks=chunks_per_step,
                               has_weights=has_weights)
    out = pl.pallas_call(
        kernel,
        out_shape=jax.ShapeDtypeStruct((n_ch_pad, 8, 128), jnp.float32),
        grid_spec=pltpu.PrefetchScalarGridSpec(
            num_scalar_prefetch=0,
            grid=grid,
            in_specs=in_specs,
            out_specs=pl.BlockSpec((chunks_per_step, 8, 128),
                                   lambda i: (i, 0, 0)),
        ),
        compiler_params=pltpu.CompilerParams(
            dimension_semantics=("parallel",),
        ),
    )(*args)
    return out.reshape(n_pad)[:n]


def iou3d_loss(boxes_pred, boxes_target, weights=None, *, tile_boxes=8192):
    """Pallas TPU implementation of IOU3dLoss.forward.

    boxes_pred, boxes_target: (N, 7) [x, y, z, dx, dy, dz, heading]
    weights: optional (N,)
    Returns (N,) float32: (1 - IoU3d(pred, target)) [* weights].
    """
    assert boxes_pred.shape == boxes_target.shape
    assert boxes_pred.ndim == 2 and boxes_pred.shape[1] == 7
    n = boxes_pred.shape[0]
    if n == 0:  # empty-input branch of the torch module
        loss = (boxes_pred - boxes_target).sum(axis=1) * 0.0
        return loss if weights is None else loss * weights
    if weights is not None:
        assert weights.shape == (n,)
    return _iou3d_loss_impl(boxes_pred, boxes_target, weights,
                            tile_boxes=tile_boxes)


def _iou3d_reference(boxes_a, boxes_b, weights):
    """Independent NumPy/float64 reference (Sutherland-Hodgman BEV clipping)."""
    a = np.asarray(boxes_a, dtype=np.float64)
    b = np.asarray(boxes_b, dtype=np.float64)
    b = np.where(np.isnan(b), a, b)

    def corners(box):
        x, y, dx, dy, r = box[0], box[1], box[3], box[4], box[6]
        c, s = math.cos(r), math.sin(r)
        pts = []
        for sx, sy in ((1, 1), (-1, 1), (-1, -1), (1, -1)):
            ux, uy = sx * dx / 2.0, sy * dy / 2.0
            pts.append((x + c * ux - s * uy, y + s * ux + c * uy))
        return pts

    def clip_poly(subject, clipper):
        out = list(subject)
        for i in range(len(clipper)):
            if not out:
                break
            A = clipper[i]
            B = clipper[(i + 1) % len(clipper)]
            inp, out = out, []

            def inside(P):
                return (B[0] - A[0]) * (P[1] - A[1]) - (B[1] - A[1]) * (P[0] - A[0]) >= 0.0

            def intersect(P, Q):
                a1, b1 = B[1] - A[1], A[0] - B[0]
                c1 = a1 * A[0] + b1 * A[1]
                a2, b2 = Q[1] - P[1], P[0] - Q[0]
                c2 = a2 * P[0] + b2 * P[1]
                det = a1 * b2 - a2 * b1
                if det == 0.0:
                    return P
                return ((b2 * c1 - b1 * c2) / det, (a1 * c2 - a2 * c1) / det)

            S = inp[-1]
            for E in inp:
                if inside(E):
                    if not inside(S):
                        out.append(intersect(S, E))
                    out.append(E)
                elif inside(S):
                    out.append(intersect(S, E))
                S = E
        return out

    def shoelace(pts):
        if len(pts) < 3:
            return 0.0
        s = 0.0
        for i in range(len(pts)):
            x1, y1 = pts[i]
            x2, y2 = pts[(i + 1) % len(pts)]
            s += x1 * y2 - x2 * y1
        return abs(s) * 0.5

    n = a.shape[0]
    loss = np.zeros(n)
    for i in range(n):
        bev = shoelace(clip_poly(corners(a[i]), corners(b[i])))
        top = min(a[i, 2] + a[i, 5] / 2, b[i, 2] + b[i, 5] / 2)
        bot = max(a[i, 2] - a[i, 5] / 2, b[i, 2] - b[i, 5] / 2)
        h = max(top - bot, 0.0)
        vol_i = bev * h
        vol_a = a[i, 3] * a[i, 4] * a[i, 5]
        vol_b = b[i, 3] * b[i, 4] * b[i, 5]
        loss[i] = 1.0 - vol_i / max(vol_a + vol_b - vol_i, 1e-6)
    if weights is not None:
        loss = loss * np.asarray(weights, dtype=np.float64)
    return loss


if __name__ == "__main__":
    key = jax.random.PRNGKey(0)
    (kc, kd, kh, k1, k2, k3, kw,
     k4, k5, k6, k7, k8) = jax.random.split(key, 12)

    # ---- case 1: weighted, 1000 boxes incl. degenerate specials ------------
    n = 1000
    centers = jax.random.uniform(kc, (n, 3), minval=-10.0, maxval=10.0)
    dims = jax.random.uniform(kd, (n, 3), minval=0.8, maxval=4.0)
    heads = jax.random.uniform(kh, (n, 1), minval=-math.pi, maxval=math.pi)
    pred = jnp.concatenate([centers, dims, heads], axis=1).astype(jnp.float32)

    d_center = jax.random.normal(k1, (n, 3)) * 0.5
    d_dims = jax.random.normal(k2, (n, 3)) * 0.3
    d_head = jax.random.uniform(k3, (n, 1), minval=0.2, maxval=1.2)
    tgt = jnp.concatenate(
        [centers + d_center, jnp.maximum(dims + d_dims, 0.3), heads + d_head],
        axis=1).astype(jnp.float32)

    # Hand-made special / degenerate cases.
    tgt = tgt.at[0].set(pred[0])                                          # identical boxes
    pred = pred.at[1].set(jnp.array([0., 0., 0., 2., 2., 2., 0.]))        # disjoint pair
    tgt = tgt.at[1].set(jnp.array([10., 10., 0., 2., 2., 2., 0.]))
    pred = pred.at[2].set(jnp.array([0., 0., 0., 2., 4., 2., 0.]))        # 90-deg rotated overlap
    tgt = tgt.at[2].set(jnp.array([1., 0., 0., 2., 4., 2., math.pi / 2]))
    tgt = tgt.at[3].set(jnp.full((7,), jnp.nan))                          # NaN target -> uses pred
    pred = pred.at[4].set(jnp.array([0., 0., 0., 2., 2., 2., 0.]))        # exactly touching
    tgt = tgt.at[4].set(jnp.array([2., 0., 0., 2., 2., 2., 0.]))
    pred = pred.at[5].set(jnp.array([0., 0., 0., 2., 2., 2., 0.]))        # shared top/bottom edges
    tgt = tgt.at[5].set(jnp.array([1., 0., 0., 2., 2., 2., 0.]))
    pred = pred.at[6].set(jnp.array([0., 0., 0., 4., 4., 4., 0.3]))       # target inside pred
    tgt = tgt.at[6].set(jnp.array([0.2, 0., 0., 1., 1., 1., 1.0]))

    weights = jax.random.uniform(kw, (n,), dtype=jnp.float32)

    loss = jax.block_until_ready(iou3d_loss(pred, tgt, weights))
    assert loss.shape == (n,)
    loss_np = np.asarray(loss)
    ref = _iou3d_reference(np.asarray(pred), np.asarray(tgt), np.asarray(weights))
    assert np.all(np.isfinite(loss_np)), "non-finite loss values"
    err1 = float(np.max(np.abs(loss_np - ref)))
    assert err1 < 2e-3, f"weighted mismatch vs reference, max abs err = {err1}"

    # ---- case 2: no weights, multi-chunk / multi-grid-step path -------------
    n2 = 2560
    centers2 = jax.random.uniform(k4, (n2, 3), minval=-10.0, maxval=10.0)
    dims2 = jax.random.uniform(k5, (n2, 3), minval=0.8, maxval=4.0)
    heads2 = jax.random.uniform(k6, (n2, 1), minval=-math.pi, maxval=math.pi)
    pred2 = jnp.concatenate([centers2, dims2, heads2], axis=1).astype(jnp.float32)
    d_c2 = jax.random.normal(k7, (n2, 3)) * 0.5
    d_h2 = jax.random.uniform(k8, (n2, 1), minval=0.2, maxval=1.2)
    tgt2 = jnp.concatenate([centers2 + d_c2, dims2, heads2 + d_h2],
                           axis=1).astype(jnp.float32)

    loss2 = jax.block_until_ready(iou3d_loss(pred2, tgt2))
    loss2_np = np.asarray(loss2)
    ref2 = _iou3d_reference(np.asarray(pred2), np.asarray(tgt2), None)
    assert loss2.shape == (n2,)
    assert np.all(np.isfinite(loss2_np)), "non-finite loss values (no weights)"
    err2 = float(np.max(np.abs(loss2_np - ref2)))
    assert err2 < 2e-3, f"unweighted mismatch vs reference, max abs err = {err2}"

    print("KERNEL_OK")
</pallas_src>

<mosaic_0001>
module attributes {stable_mosaic.version = 11 : i64} {
  func.func @_iou3d_loss_kernel(%arg0: i32, %arg1: memref<8x1x8x128xf32, #tpu.memory_space<vmem>>, %arg2: memref<8x1x8x128xf32, #tpu.memory_space<vmem>>, %arg3: memref<1x8x128xf32, #tpu.memory_space<vmem>>, %arg4: memref<1x8x128xf32, #tpu.memory_space<vmem>>) attributes {dimension_semantics = [#tpu.dimension_semantics<parallel>], iteration_bounds = array<i64: 1>, scalar_prefetch = 0 : i64, scratch_operands = 0 : i64, tpu.core_type = #tpu.core_type<tc>, window_params = [{transform_indices = @transform_0, window_bounds = array<i64: 8, 1, 8, 128>}, {transform_indices = @transform_1, window_bounds = array<i64: 8, 1, 8, 128>}, {transform_indices = @transform_2, window_bounds = array<i64: 1, 8, 128>}, {transform_indices = @transform_3, window_bounds = array<i64: 1, 8, 128>}]} {
    %c0 = arith.constant 0 : index
    %c0_0 = arith.constant 0 : index
    %c0_1 = arith.constant 0 : index
    %c0_2 = arith.constant 0 : index
    %0 = vector.load %arg1[%c0, %c0_0, %c0_1, %c0_2] : memref<8x1x8x128xf32, #tpu.memory_space<vmem>>, vector<1x1x8x128xf32>
    %1 = vector.shape_cast %0 : vector<1x1x8x128xf32> to vector<8x128xf32>
    %c1 = arith.constant 1 : index
    %c0_3 = arith.constant 0 : index
    %c0_4 = arith.constant 0 : index
    %c0_5 = arith.constant 0 : index
    %2 = vector.load %arg1[%c1, %c0_3, %c0_4, %c0_5] : memref<8x1x8x128xf32, #tpu.memory_space<vmem>>, vector<1x1x8x128xf32>
    %3 = vector.shape_cast %2 : vector<1x1x8x128xf32> to vector<8x128xf32>
    %c2 = arith.constant 2 : index
    %c0_6 = arith.constant 0 : index
    %c0_7 = arith.constant 0 : index
    %c0_8 = arith.constant 0 : index
    %4 = vector.load %arg1[%c2, %c0_6, %c0_7, %c0_8] : memref<8x1x8x128xf32, #tpu.memory_space<vmem>>, vector<1x1x8x128xf32>
    %5 = vector.shape_cast %4 : vector<1x1x8x128xf32> to vector<8x128xf32>
    %c3 = arith.constant 3 : index
    %c0_9 = arith.constant 0 : index
    %c0_10 = arith.constant 0 : index
    %c0_11 = arith.constant 0 : index
    %6 = vector.load %arg1[%c3, %c0_9, %c0_10, %c0_11] : memref<8x1x8x128xf32, #tpu.memory_space<vmem>>, vector<1x1x8x128xf32>
    %7 = vector.shape_cast %6 : vector<1x1x8x128xf32> to vector<8x128xf32>
    %c4 = arith.constant 4 : index
    %c0_12 = arith.constant 0 : index
    %c0_13 = arith.constant 0 : index
    %c0_14 = arith.constant 0 : index
    %8 = vector.load %arg1[%c4, %c0_12, %c0_13, %c0_14] : memref<8x1x8x128xf32, #tpu.memory_space<vmem>>, vector<1x1x8x128xf32>
    %9 = vector.shape_cast %8 : vector<1x1x8x128xf32> to vector<8x128xf32>
    %c5 = arith.constant 5 : index
    %c0_15 = arith.constant 0 : index
    %c0_16 = arith.constant 0 : index
    %c0_17 = arith.constant 0 : index
    %10 = vector.load %arg1[%c5, %c0_15, %c0_16, %c0_17] : memref<8x1x8x128xf32, #tpu.memory_space<vmem>>, vector<1x1x8x128xf32>
    %11 = vector.shape_cast %10 : vector<1x1x8x128xf32> to vector<8x128xf32>
    %c6 = arith.constant 6 : index
    %c0_18 = arith.constant 0 : index
    %c0_19 = arith.constant 0 : index
    %c0_20 = arith.constant 0 : index
    %12 = vector.load %arg1[%c6, %c0_18, %c0_19, %c0_20] : memref<8x1x8x128xf32, #tpu.memory_space<vmem>>, vector<1x1x8x128xf32>
    %13 = vector.shape_cast %12 : vector<1x1x8x128xf32> to vector<8x128xf32>
    %c7 = arith.constant 7 : index
    %c0_21 = arith.constant 0 : index
    %c0_22 = arith.constant 0 : index
    %c0_23 = arith.constant 0 : index
    %14 = vector.load %arg1[%c7, %c0_21, %c0_22, %c0_23] : memref<8x1x8x128xf32, #tpu.memory_space<vmem>>, vector<1x1x8x128xf32>
    %15 = vector.shape_cast %14 : vector<1x1x8x128xf32> to vector<8x128xf32>
    %c0_24 = arith.constant 0 : index
    %c0_25 = arith.constant 0 : index
    %c0_26 = arith.constant 0 : index
    %c0_27 = arith.constant 0 : index
    %16 = vector.load %arg2[%c0_24, %c0_25, %c0_26, %c0_27] : memref<8x1x8x128xf32, #tpu.memory_space<vmem>>, vector<1x1x8x128xf32>
    %17 = vector.shape_cast %16 : vector<1x1x8x128xf32> to vector<8x128xf32>
    %c1_28 = arith.constant 1 : index
    %c0_29 = arith.constant 0 : index
    %c0_30 = arith.constant 0 : index
    %c0_31 = arith.constant 0 : index
    %18 = vector.load %arg2[%c1_28, %c0_29, %c0_30, %c0_31] : memref<8x1x8x128xf32, #tpu.memory_space<vmem>>, vector<1x1x8x128xf32>
    %19 = vector.shape_cast %18 : vector<1x1x8x128xf32> to vector<8x128xf32>
    %c2_32 = arith.constant 2 : index
    %c0_33 = arith.constant 0 : index
    %c0_34 = arith.constant 0 : index
    %c0_35 = arith.constant 0 : index
    %20 = vector.load %arg2[%c2_32, %c0_33, %c0_34, %c0_35] : memref<8x1x8x128xf32, #tpu.memory_space<vmem>>, vector<1x1x8x128xf32>
    %21 = vector.shape_cast %20 : vector<1x1x8x128xf32> to vector<8x128xf32>
    %c3_36 = arith.constant 3 : index
    %c0_37 = arith.constant 0 : index
    %c0_38 = arith.constant 0 : index
    %c0_39 = arith.constant 0 : index
    %22 = vector.load %arg2[%c3_36, %c0_37, %c0_38, %c0_39] : memref<8x1x8x128xf32, #tpu.memory_space<vmem>>, vector<1x1x8x128xf32>
    %23 = vector.shape_cast %22 : vector<1x1x8x128xf32> to vector<8x128xf32>
    %c4_40 = arith.constant 4 : index
    %c0_41 = arith.constant 0 : index
    %c0_42 = arith.constant 0 : index
    %c0_43 = arith.constant 0 : index
    %24 = vector.load %arg2[%c4_40, %c0_41, %c0_42, %c0_43] : memref<8x1x8x128xf32, #tpu.memory_space<vmem>>, vector<1x1x8x128xf32>
    %25 = vector.shape_cast %24 : vector<1x1x8x128xf32> to vector<8x128xf32>
    %c5_44 = arith.constant 5 : index
    %c0_45 = arith.constant 0 : index
    %c0_46 = arith.constant 0 : index
    %c0_47 = arith.constant 0 : index
    %26 = vector.load %arg2[%c5_44, %c0_45, %c0_46, %c0_47] : memref<8x1x8x128xf32, #tpu.memory_space<vmem>>, vector<1x1x8x128xf32>
    %27 = vector.shape_cast %26 : vector<1x1x8x128xf32> to vector<8x128xf32>
    %c6_48 = arith.constant 6 : index
    %c0_49 = arith.constant 0 : index
    %c0_50 = arith.constant 0 : index
    %c0_51 = arith.constant 0 : index
    %28 = vector.load %arg2[%c6_48, %c0_49, %c0_50, %c0_51] : memref<8x1x8x128xf32, #tpu.memory_space<vmem>>, vector<1x1x8x128xf32>
    %29 = vector.shape_cast %28 : vector<1x1x8x128xf32> to vector<8x128xf32>
    %c7_52 = arith.constant 7 : index
    %c0_53 = arith.constant 0 : index
    %c0_54 = arith.constant 0 : index
    %c0_55 = arith.constant 0 : index
    %30 = vector.load %arg2[%c7_52, %c0_53, %c0_54, %c0_55] : memref<8x1x8x128xf32, #tpu.memory_space<vmem>>, vector<1x1x8x128xf32>
    %31 = vector.shape_cast %30 : vector<1x1x8x128xf32> to vector<8x128xf32>
    %32 = arith.cmpf one, %17, %17 : vector<8x128xf32>
    %33 = arith.select %32, %1, %17 : vector<8x128xi1>, vector<8x128xf32>
    %34 = arith.cmpf one, %19, %19 : vector<8x128xf32>
    %35 = arith.select %34, %3, %19 : vector<8x128xi1>, vector<8x128xf32>
    %36 = arith.cmpf one, %21, %21 : vector<8x128xf32>
    %37 = arith.select %36, %5, %21 : vector<8x128xi1>, vector<8x128xf32>
    %38 = arith.cmpf one, %23, %23 : vector<8x128xf32>
    %39 = arith.select %38, %7, %23 : vector<8x128xi1>, vector<8x128xf32>
    %40 = arith.cmpf one, %25, %25 : vector<8x128xf32>
    %41 = arith.select %40, %9, %25 : vector<8x128xi1>, vector<8x128xf32>
    %42 = arith.cmpf one, %27, %27 : vector<8x128xf32>
    %43 = arith.select %42, %11, %27 : vector<8x128xi1>, vector<8x128xf32>
    %44 = arith.cmpf one, %29, %29 : vector<8x128xf32>
    %45 = arith.select %44, %13, %29 : vector<8x128xi1>, vector<8x128xf32>
    %46 = arith.cmpf one, %31, %31 : vector<8x128xf32>
    %47 = arith.select %46, %15, %31 : vector<8x128xi1>, vector<8x128xf32>
    %48 = arith.subf %33, %1 : vector<8x128xf32>
    %49 = arith.subf %35, %3 : vector<8x128xf32>
    %50 = arith.mulf %13, %48 : vector<8x128xf32>
    %51 = arith.mulf %15, %49 : vector<8x128xf32>
    %52 = arith.addf %50, %51 : vector<8x128xf32>
    %53 = arith.mulf %13, %49 : vector<8x128xf32>
    %54 = arith.mulf %15, %48 : vector<8x128xf32>
    %55 = arith.subf %53, %54 : vector<8x128xf32>
    %56 = arith.mulf %13, %45 : vector<8x128xf32>
    %57 = arith.mulf %15, %47 : vector<8x128xf32>
    %58 = arith.addf %56, %57 : vector<8x128xf32>
    %59 = arith.mulf %13, %47 : vector<8x128xf32>
    %60 = arith.mulf %15, %45 : vector<8x128xf32>
    %61 = arith.subf %59, %60 : vector<8x128xf32>
    %62 = arith.mulf %7, %9 : vector<8x128xf32>
    %63 = arith.mulf %39, %41 : vector<8x128xf32>
    %64 = arith.mulf %58, %7 : vector<8x128xf32>
    %65 = arith.mulf %61, %7 : vector<8x128xf32>
    %66 = arith.mulf %58, %9 : vector<8x128xf32>
    %67 = arith.mulf %61, %9 : vector<8x128xf32>
    %cst = arith.constant 5.000000e-01 : f32
    %68 = vector.broadcast %cst : f32 to vector<8x128xf32>
    %69 = arith.mulf %68, %64 : vector<8x128xf32>
    %cst_56 = arith.constant 5.000000e-01 : f32
    %70 = vector.broadcast %cst_56 : f32 to vector<8x128xf32>
    %71 = arith.mulf %70, %65 : vector<8x128xf32>
    %cst_57 = arith.constant 5.000000e-01 : f32
    %72 = vector.broadcast %cst_57 : f32 to vector<8x128xf32>
    %73 = arith.mulf %72, %66 : vector<8x128xf32>
    %cst_58 = arith.constant 5.000000e-01 : f32
    %74 = vector.broadcast %cst_58 : f32 to vector<8x128xf32>
    %75 = arith.mulf %74, %67 : vector<8x128xf32>
    %cst_59 = arith.constant 5.000000e-01 : f32
    %76 = vector.broadcast %cst_59 : f32 to vector<8x128xf32>
    %77 = arith.mulf %76, %39 : vector<8x128xf32>
    %cst_60 = arith.constant 9.99999974E-6 : f32
    %78 = vector.broadcast %cst_60 : f32 to vector<8x128xf32>
    %79 = arith.addf %77, %78 : vector<8x128xf32>
    %cst_61 = arith.constant 5.000000e-01 : f32
    %80 = vector.broadcast %cst_61 : f32 to vector<8x128xf32>
    %81 = arith.mulf %80, %41 : vector<8x128xf32>
    %cst_62 = arith.constant 9.99999974E-6 : f32
    %82 = vector.broadcast %cst_62 : f32 to vector<8x128xf32>
    %83 = arith.addf %81, %82 : vector<8x128xf32>
    %84 = arith.mulf %58, %52 : vector<8x128xf32>
    %85 = arith.mulf %61, %55 : vector<8x128xf32>
    %86 = arith.addf %84, %85 : vector<8x128xf32>
    %87 = arith.mulf %61, %52 : vector<8x128xf32>
    %88 = arith.mulf %58, %55 : vector<8x128xf32>
    %89 = arith.subf %87, %88 : vector<8x128xf32>
    %90 = arith.subf %69, %86 : vector<8x128xf32>
    %cst_63 = arith.constant 0.000000e+00 : f32
    %91 = vector.broadcast %cst_63 : f32 to vector<8x128xf32>
    %92 = arith.subf %91, %69 : vector<8x128xf32>
    %93 = arith.subf %92, %86 : vector<8x128xf32>
    %94 = arith.addf %73, %89 : vector<8x128xf32>
    %cst_64 = arith.constant 0.000000e+00 : f32
    %95 = vector.broadcast %cst_64 : f32 to vector<8x128xf32>
    %96 = arith.subf %95, %73 : vector<8x128xf32>
    %97 = arith.addf %96, %89 : vector<8x128xf32>
    %98 = arith.addf %90, %75 : vector<8x128xf32>
    %99 = arith.addf %93, %75 : vector<8x128xf32>
    %100 = arith.subf %93, %75 : vector<8x128xf32>
    %101 = arith.subf %90, %75 : vector<8x128xf32>
    %102 = arith.subf %94, %71 : vector<8x128xf32>
    %103 = arith.addf %94, %71 : vector<8x128xf32>
    %104 = arith.addf %97, %71 : vector<8x128xf32>
    %105 = arith.subf %97, %71 : vector<8x128xf32>
    %cst_65 = arith.constant 0.000000e+00 : f32
    %106 = vector.broadcast %cst_65 : f32 to vector<8x128xf32>
    %107 = arith.subf %106, %64 : vector<8x128xf32>
    %cst_66 = arith.constant 0.000000e+00 : f32
    %108 = vector.broadcast %cst_66 : f32 to vector<8x128xf32>
    %109 = arith.subf %108, %67 : vector<8x128xf32>
    %cst_67 = arith.constant 0.000000e+00 : f32
    %110 = vector.broadcast %cst_67 : f32 to vector<8x128xf32>
    %111 = arith.subf %110, %66 : vector<8x128xf32>
    %cst_68 = arith.constant 0.000000e+00 : f32
    %112 = vector.broadcast %cst_68 : f32 to vector<8x128xf32>
    %113 = arith.subf %112, %65 : vector<8x128xf32>
    %cst_69 = arith.constant 0.000000e+00 : f32
    %114 = vector.broadcast %cst_69 : f32 to vector<8x128xf32>
    %115 = arith.cmpf oeq, %107, %114 : vector<8x128xf32>
    %cst_70 = arith.constant 0.000000e+00 : f32
    %116 = vector.broadcast %cst_70 : f32 to vector<8x128xf32>
    %117 = arith.cmpf oeq, %65, %116 : vector<8x128xf32>
    %cst_71 = arith.constant 0.000000e+00 : f32
    %118 = vector.broadcast %cst_71 : f32 to vector<8x128xf32>
    %119 = arith.cmpf ogt, %107, %118 : vector<8x128xf32>
    %cst_72 = arith.constant 0.000000e+00 : f32
    %120 = vector.broadcast %cst_72 : f32 to vector<8x128xf32>
    %121 = arith.cmpf olt, %107, %120 : vector<8x128xf32>
    %cst_73 = arith.constant 0.000000e+00 : f32
    %122 = vector.broadcast %cst_73 : f32 to vector<8x128xf32>
    %123 = arith.cmpf ogt, %65, %122 : vector<8x128xf32>
    %cst_74 = arith.constant 0.000000e+00 : f32
    %124 = vector.broadcast %cst_74 : f32 to vector<8x128xf32>
    %125 = arith.cmpf olt, %65, %124 : vector<8x128xf32>
    %cst_75 = arith.constant 1.000000e+00 : f32
    %126 = vector.broadcast %cst_75 : f32 to vector<8x128xf32>
    %127 = arith.select %115, %126, %107 : vector<8x128xi1>, vector<8x128xf32>
    %cst_76 = arith.constant 1.000000e+00 : f32
    %128 = vector.broadcast %cst_76 : f32 to vector<8x128xf32>
    %129 = arith.divf %128, %127 : vector<8x128xf32>
    %cst_77 = arith.constant 1.000000e+00 : f32
    %130 = vector.broadcast %cst_77 : f32 to vector<8x128xf32>
    %131 = arith.select %117, %130, %65 : vector<8x128xi1>, vector<8x128xf32>
    %cst_78 = arith.constant 1.000000e+00 : f32
    %132 = vector.broadcast %cst_78 : f32 to vector<8x128xf32>
    %133 = arith.divf %132, %131 : vector<8x128xf32>
    %134 = arith.addf %98, %79 : vector<8x128xf32>
    %cst_79 = arith.constant 0.000000e+00 : f32
    %135 = vector.broadcast %cst_79 : f32 to vector<8x128xf32>
    %136 = arith.subf %135, %129 : vector<8x128xf32>
    %137 = arith.subf %79, %98 : vector<8x128xf32>
    %138 = arith.addf %102, %83 : vector<8x128xf32>
    %cst_80 = arith.constant 0.000000e+00 : f32
    %139 = vector.broadcast %cst_80 : f32 to vector<8x128xf32>
    %140 = arith.subf %139, %133 : vector<8x128xf32>
    %141 = arith.subf %83, %102 : vector<8x128xf32>
    %cst_81 = arith.constant 0.000000e+00 : f32
    %142 = vector.broadcast %cst_81 : f32 to vector<8x128xf32>
    %cst_82 = arith.constant 1.000000e+00 : f32
    %143 = vector.broadcast %cst_82 : f32 to vector<8x128xf32>
    %144 = arith.mulf %134, %136 : vector<8x128xf32>
    %cst_83 = arith.constant -1.000000e+30 : f32
    %145 = vector.broadcast %cst_83 : f32 to vector<8x128xf32>
    %146 = arith.select %119, %144, %145 : vector<8x128xi1>, vector<8x128xf32>
    %147 = arith.maximumf %142, %146 : vector<8x128xf32>
    %cst_84 = arith.constant 1.000000e+30 : f32
    %148 = vector.broadcast %cst_84 : f32 to vector<8x128xf32>
    %149 = arith.select %121, %144, %148 : vector<8x128xi1>, vector<8x128xf32>
    %150 = arith.minimumf %143, %149 : vector<8x128xf32>
    %cst_85 = arith.constant dense<true> : vector<8x128xi1>
    %151 = arith.xori %115, %cst_85 : vector<8x128xi1>
    %cst_86 = arith.constant 0.000000e+00 : f32
    %152 = vector.broadcast %cst_86 : f32 to vector<8x128xf32>
    %153 = arith.cmpf oge, %134, %152 : vector<8x128xf32>
    %154 = arith.ori %151, %153 : vector<8x128xi1>
    %155 = arith.mulf %137, %129 : vector<8x128xf32>
    %cst_87 = arith.constant -1.000000e+30 : f32
    %156 = vector.broadcast %cst_87 : f32 to vector<8x128xf32>
    %157 = arith.select %121, %155, %156 : vector<8x128xi1>, vector<8x128xf32>
    %158 = arith.maximumf %147, %157 : vector<8x128xf32>
    %cst_88 = arith.constant 1.000000e+30 : f32
    %159 = vector.broadcast %cst_88 : f32 to vector<8x128xf32>
    %160 = arith.select %119, %155, %159 : vector<8x128xi1>, vector<8x128xf32>
    %161 = arith.minimumf %150, %160 : vector<8x128xf32>
    %cst_89 = arith.constant dense<true> : vector<8x128xi1>
    %162 = arith.xori %115, %cst_89 : vector<8x128xi1>
    %cst_90 = arith.constant 0.000000e+00 : f32
    %163 = vector.broadcast %cst_90 : f32 to vector<8x128xf32>
    %164 = arith.cmpf oge, %137, %163 : vector<8x128xf32>
    %165 = arith.ori %162, %164 : vector<8x128xi1>
    %166 = arith.andi %154, %165 : vector<8x128xi1>
    %167 = arith.mulf %138, %140 : vector<8x128xf32>
    %cst_91 = arith.constant -1.000000e+30 : f32
    %168 = vector.broadcast %cst_91 : f32 to vector<8x128xf32>
    %169 = arith.select %123, %167, %168 : vector<8x128xi1>, vector<8x128xf32>
    %170 = arith.maximumf %158, %169 : vector<8x128xf32>
    %cst_92 = arith.constant 1.000000e+30 : f32
    %171 = vector.broadcast %cst_92 : f32 to vector<8x128xf32>
    %172 = arith.select %125, %167, %171 : vector<8x128xi1>, vector<8x128xf32>
    %173 = arith.minimumf %161, %172 : vector<8x128xf32>
    %cst_93 = arith.constant dense<true> : vector<8x128xi1>
    %174 = arith.xori %117, %cst_93 : vector<8x128xi1>
    %cst_94 = arith.constant 0.000000e+00 : f32
    %175 = vector.broadcast %cst_94 : f32 to vector<8x128xf32>
    %176 = arith.cmpf oge, %138, %175 : vector<8x128xf32>
    %177 = arith.ori %174, %176 : vector<8x128xi1>
    %178 = arith.andi %166, %177 : vector<8x128xi1>
    %179 = arith.mulf %141, %133 : vector<8x128xf32>
    %cst_95 = arith.constant -1.000000e+30 : f32
    %180 = vector.broadcast %cst_95 : f32 to vector<8x128xf32>
    %181 = arith.select %125, %179, %180 : vector<8x128xi1>, vector<8x128xf32>
    %182 = arith.maximumf %170, %181 : vector<8x128xf32>
    %cst_96 = arith.constant 1.000000e+30 : f32
    %183 = vector.broadcast %cst_96 : f32 to vector<8x128xf32>
    %184 = arith.select %123, %179, %183 : vector<8x128xi1>, vector<8x128xf32>
    %185 = arith.minimumf %173, %184 : vector<8x128xf32>
    %cst_97 = arith.constant dense<true> : vector<8x128xi1>
    %186 = arith.xori %117, %cst_97 : vector<8x128xi1>
    %cst_98 = arith.constant 0.000000e+00 : f32
    %187 = vector.broadcast %cst_98 : f32 to vector<8x128xf32>
    %188 = arith.cmpf oge, %141, %187 : vector<8x128xf32>
    %189 = arith.ori %186, %188 : vector<8x128xi1>
    %190 = arith.andi %178, %189 : vector<8x128xi1>
    %191 = arith.cmpf ole, %182, %185 : vector<8x128xf32>
    %192 = arith.andi %190, %191 : vector<8x128xi1>
    %193 = arith.subf %185, %182 : vector<8x128xf32>
    %cst_99 = arith.constant 0.000000e+00 : f32
    %194 = vector.broadcast %cst_99 : f32 to vector<8x128xf32>
    %195 = arith.select %192, %193, %194 : vector<8x128xi1>, vector<8x128xf32>
    %cst_100 = arith.constant 0.000000e+00 : f32
    %196 = vector.broadcast %cst_100 : f32 to vector<8x128xf32>
    %197 = arith.cmpf oeq, %109, %196 : vector<8x128xf32>
    %cst_101 = arith.constant 0.000000e+00 : f32
    %198 = vector.broadcast %cst_101 : f32 to vector<8x128xf32>
    %199 = arith.cmpf oeq, %111, %198 : vector<8x128xf32>
    %cst_102 = arith.constant 0.000000e+00 : f32
    %200 = vector.broadcast %cst_102 : f32 to vector<8x128xf32>
    %201 = arith.cmpf ogt, %109, %200 : vector<8x128xf32>
    %cst_103 = arith.constant 0.000000e+00 : f32
    %202 = vector.broadcast %cst_103 : f32 to vector<8x128xf32>
    %203 = arith.cmpf olt, %109, %202 : vector<8x128xf32>
    %cst_104 = arith.constant 0.000000e+00 : f32
    %204 = vector.broadcast %cst_104 : f32 to vector<8x128xf32>
    %205 = arith.cmpf ogt, %111, %204 : vector<8x128xf32>
    %cst_105 = arith.constant 0.000000e+00 : f32
    %206 = vector.broadcast %cst_105 : f32 to vector<8x128xf32>
    %207 = arith.cmpf olt, %111, %206 : vector<8x128xf32>
    %cst_106 = arith.constant 1.000000e+00 : f32
    %208 = vector.broadcast %cst_106 : f32 to vector<8x128xf32>
    %209 = arith.select %197, %208, %109 : vector<8x128xi1>, vector<8x128xf32>
    %cst_107 = arith.constant 1.000000e+00 : f32
    %210 = vector.broadcast %cst_107 : f32 to vector<8x128xf32>
    %211 = arith.divf %210, %209 : vector<8x128xf32>
    %cst_108 = arith.constant 1.000000e+00 : f32
    %212 = vector.broadcast %cst_108 : f32 to vector<8x128xf32>
    %213 = arith.select %199, %212, %111 : vector<8x128xi1>, vector<8x128xf32>
    %cst_109 = arith.constant 1.000000e+00 : f32
    %214 = vector.broadcast %cst_109 : f32 to vector<8x128xf32>
    %215 = arith.divf %214, %213 : vector<8x128xf32>
    %216 = arith.addf %99, %79 : vector<8x128xf32>
    %cst_110 = arith.constant 0.000000e+00 : f32
    %217 = vector.broadcast %cst_110 : f32 to vector<8x128xf32>
    %218 = arith.subf %217, %211 : vector<8x128xf32>
    %219 = arith.subf %79, %99 : vector<8x128xf32>
    %220 = arith.addf %103, %83 : vector<8x128xf32>
    %cst_111 = arith.constant 0.000000e+00 : f32
    %221 = vector.broadcast %cst_111 : f32 to vector<8x128xf32>
    %222 = arith.subf %221, %215 : vector<8x128xf32>
    %223 = arith.subf %83, %103 : vector<8x128xf32>
    %cst_112 = arith.constant 0.000000e+00 : f32
    %224 = vector.broadcast %cst_112 : f32 to vector<8x128xf32>
    %cst_113 = arith.constant 1.000000e+00 : f32
    %225 = vector.broadcast %cst_113 : f32 to vector<8x128xf32>
    %226 = arith.mulf %216, %218 : vector<8x128xf32>
    %cst_114 = arith.constant -1.000000e+30 : f32
    %227 = vector.broadcast %cst_114 : f32 to vector<8x128xf32>
    %228 = arith.select %201, %226, %227 : vector<8x128xi1>, vector<8x128xf32>
    %229 = arith.maximumf %224, %228 : vector<8x128xf32>
    %cst_115 = arith.constant 1.000000e+30 : f32
    %230 = vector.broadcast %cst_115 : f32 to vector<8x128xf32>
    %231 = arith.select %203, %226, %230 : vector<8x128xi1>, vector<8x128xf32>
    %232 = arith.minimumf %225, %231 : vector<8x128xf32>
    %cst_116 = arith.constant dense<true> : vector<8x128xi1>
    %233 = arith.xori %197, %cst_116 : vector<8x128xi1>
    %cst_117 = arith.constant 0.000000e+00 : f32
    %234 = vector.broadcast %cst_117 : f32 to vector<8x128xf32>
    %235 = arith.cmpf oge, %216, %234 : vector<8x128xf32>
    %236 = arith.ori %233, %235 : vector<8x128xi1>
    %237 = arith.mulf %219, %211 : vector<8x128xf32>
    %cst_118 = arith.constant -1.000000e+30 : f32
    %238 = vector.broadcast %cst_118 : f32 to vector<8x128xf32>
    %239 = arith.select %203, %237, %238 : vector<8x128xi1>, vector<8x128xf32>
    %240 = arith.maximumf %229, %239 : vector<8x128xf32>
    %cst_119 = arith.constant 1.000000e+30 : f32
    %241 = vector.broadcast %cst_119 : f32 to vector<8x128xf32>
    %242 = arith.select %201, %237, %241 : vector<8x128xi1>, vector<8x128xf32>
    %243 = arith.minimumf %232, %242 : vector<8x128xf32>
    %cst_120 = arith.constant dense<true> : vector<8x128xi1>
    %244 = arith.xori %197, %cst_120 : vector<8x128xi1>
    %cst_121 = arith.constant 0.000000e+00 : f32
    %245 = vector.broadcast %cst_121 : f32 to vector<8x128xf32>
    %246 = arith.cmpf oge, %219, %245 : vector<8x128xf32>
    %247 = arith.ori %244, %246 : vector<8x128xi1>
    %248 = arith.andi %236, %247 : vector<8x128xi1>
    %249 = arith.mulf %220, %222 : vector<8x128xf32>
    %cst_122 = arith.constant -1.000000e+30 : f32
    %250 = vector.broadcast %cst_122 : f32 to vector<8x128xf32>
    %251 = arith.select %205, %249, %250 : vector<8x128xi1>, vector<8x128xf32>
    %252 = arith.maximumf %240, %251 : vector<8x128xf32>
    %cst_123 = arith.constant 1.000000e+30 : f32
    %253 = vector.broadcast %cst_123 : f32 to vector<8x128xf32>
    %254 = arith.select %207, %249, %253 : vector<8x128xi1>, vector<8x128xf32>
    %255 = arith.minimumf %243, %254 : vector<8x128xf32>
    %cst_124 = arith.constant dense<true> : vector<8x128xi1>
    %256 = arith.xori %199, %cst_124 : vector<8x128xi1>
    %cst_125 = arith.constant 0.000000e+00 : f32
    %257 = vector.broadcast %cst_125 : f32 to vector<8x128xf32>
    %258 = arith.cmpf oge, %220, %257 : vector<8x128xf32>
    %259 = arith.ori %256, %258 : vector<8x128xi1>
    %260 = arith.andi %248, %259 : vector<8x128xi1>
    %261 = arith.mulf %223, %215 : vector<8x128xf32>
    %cst_126 = arith.constant -1.000000e+30 : f32
    %262 = vector.broadcast %cst_126 : f32 to vector<8x128xf32>
    %263 = arith.select %207, %261, %262 : vector<8x128xi1>, vector<8x128xf32>
    %264 = arith.maximumf %252, %263 : vector<8x128xf32>
    %cst_127 = arith.constant 1.000000e+30 : f32
    %265 = vector.broadcast %cst_127 : f32 to vector<8x128xf32>
    %266 = arith.select %205, %261, %265 : vector<8x128xi1>, vector<8x128xf32>
    %267 = arith.minimumf %255, %266 : vector<8x128xf32>
    %cst_128 = arith.constant dense<true> : vector<8x128xi1>
    %268 = arith.xori %199, %cst_128 : vector<8x128xi1>
    %cst_129 = arith.constant 0.000000e+00 : f32
    %269 = vector.broadcast %cst_129 : f32 to vector<8x128xf32>
    %270 = arith.cmpf oge, %223, %269 : vector<8x128xf32>
    %271 = arith.ori %268, %270 : vector<8x128xi1>
    %272 = arith.andi %260, %271 : vector<8x128xi1>
    %273 = arith.cmpf ole, %264, %267 : vector<8x128xf32>
    %274 = arith.andi %272, %273 : vector<8x128xi1>
    %275 = arith.subf %267, %264 : vector<8x128xf32>
    %cst_130 = arith.constant 0.000000e+00 : f32
    %276 = vector.broadcast %cst_130 : f32 to vector<8x128xf32>
    %277 = arith.select %274, %275, %276 : vector<8x128xi1>, vector<8x128xf32>
    %278 = arith.addf %195, %277 : vector<8x128xf32>
    %cst_131 = arith.constant 0.000000e+00 : f32
    %279 = vector.broadcast %cst_131 : f32 to vector<8x128xf32>
    %280 = arith.cmpf oeq, %64, %279 : vector<8x128xf32>
    %cst_132 = arith.constant 0.000000e+00 : f32
    %281 = vector.broadcast %cst_132 : f32 to vector<8x128xf32>
    %282 = arith.cmpf oeq, %113, %281 : vector<8x128xf32>
    %cst_133 = arith.constant 0.000000e+00 : f32
    %283 = vector.broadcast %cst_133 : f32 to vector<8x128xf32>
    %284 = arith.cmpf ogt, %64, %283 : vector<8x128xf32>
    %cst_134 = arith.constant 0.000000e+00 : f32
    %285 = vector.broadcast %cst_134 : f32 to vector<8x128xf32>
    %286 = arith.cmpf olt, %64, %285 : vector<8x128xf32>
    %cst_135 = arith.constant 0.000000e+00 : f32
    %287 = vector.broadcast %cst_135 : f32 to vector<8x128xf32>
    %288 = arith.cmpf ogt, %113, %287 : vector<8x128xf32>
    %cst_136 = arith.constant 0.000000e+00 : f32
    %289 = vector.broadcast %cst_136 : f32 to vector<8x128xf32>
    %290 = arith.cmpf olt, %113, %289 : vector<8x128xf32>
    %cst_137 = arith.constant 1.000000e+00 : f32
    %291 = vector.broadcast %cst_137 : f32 to vector<8x128xf32>
    %292 = arith.select %280, %291, %64 : vector<8x128xi1>, vector<8x128xf32>
    %cst_138 = arith.constant 1.000000e+00 : f32
    %293 = vector.broadcast %cst_138 : f32 to vector<8x128xf32>
    %294 = arith.divf %293, %292 : vector<8x128xf32>
    %cst_139 = arith.constant 1.000000e+00 : f32
    %295 = vector.broadcast %cst_139 : f32 to vector<8x128xf32>
    %296 = arith.select %282, %295, %113 : vector<8x128xi1>, vector<8x128xf32>
    %cst_140 = arith.constant 1.000000e+00 : f32
    %297 = vector.broadcast %cst_140 : f32 to vector<8x128xf32>
    %298 = arith.divf %297, %296 : vector<8x128xf32>
    %299 = arith.addf %100, %79 : vector<8x128xf32>
    %cst_141 = arith.constant 0.000000e+00 : f32
    %300 = vector.broadcast %cst_141 : f32 to vector<8x128xf32>
    %301 = arith.subf %300, %294 : vector<8x128xf32>
    %302 = arith.subf %79, %100 : vector<8x128xf32>
    %303 = arith.addf %104, %83 : vector<8x128xf32>
    %cst_142 = arith.constant 0.000000e+00 : f32
    %304 = vector.broadcast %cst_142 : f32 to vector<8x128xf32>
    %305 = arith.subf %304, %298 : vector<8x128xf32>
    %306 = arith.subf %83, %104 : vector<8x128xf32>
    %cst_143 = arith.constant 0.000000e+00 : f32
    %307 = vector.broadcast %cst_143 : f32 to vector<8x128xf32>
    %cst_144 = arith.constant 1.000000e+00 : f32
    %308 = vector.broadcast %cst_144 : f32 to vector<8x128xf32>
    %309 = arith.mulf %299, %301 : vector<8x128xf32>
    %cst_145 = arith.constant -1.000000e+30 : f32
    %310 = vector.broadcast %cst_145 : f32 to vector<8x128xf32>
    %311 = arith.select %284, %309, %310 : vector<8x128xi1>, vector<8x128xf32>
    %312 = arith.maximumf %307, %311 : vector<8x128xf32>
    %cst_146 = arith.constant 1.000000e+30 : f32
    %313 = vector.broadcast %cst_146 : f32 to vector<8x128xf32>
    %314 = arith.select %286, %309, %313 : vector<8x128xi1>, vector<8x128xf32>
    %315 = arith.minimumf %308, %314 : vector<8x128xf32>
    %cst_147 = arith.constant dense<true> : vector<8x128xi1>
    %316 = arith.xori %280, %cst_147 : vector<8x128xi1>
    %cst_148 = arith.constant 0.000000e+00 : f32
    %317 = vector.broadcast %cst_148 : f32 to vector<8x128xf32>
    %318 = arith.cmpf oge, %299, %317 : vector<8x128xf32>
    %319 = arith.ori %316, %318 : vector<8x128xi1>
    %320 = arith.mulf %302, %294 : vector<8x128xf32>
    %cst_149 = arith.constant -1.000000e+30 : f32
    %321 = vector.broadcast %cst_149 : f32 to vector<8x128xf32>
    %322 = arith.select %286, %320, %321 : vector<8x128xi1>, vector<8x128xf32>
    %323 = arith.maximumf %312, %322 : vector<8x128xf32>
    %cst_150 = arith.constant 1.000000e+30 : f32
    %324 = vector.broadcast %cst_150 : f32 to vector<8x128xf32>
    %325 = arith.select %284, %320, %324 : vector<8x128xi1>, vector<8x128xf32>
    %326 = arith.minimumf %315, %325 : vector<8x128xf32>
    %cst_151 = arith.constant dense<true> : vector<8x128xi1>
    %327 = arith.xori %280, %cst_151 : vector<8x128xi1>
    %cst_152 = arith.constant 0.000000e+00 : f32
    %328 = vector.broadcast %cst_152 : f32 to vector<8x128xf32>
    %329 = arith.cmpf oge, %302, %328 : vector<8x128xf32>
    %330 = arith.ori %327, %329 : vector<8x128xi1>
    %331 = arith.andi %319, %330 : vector<8x128xi1>
    %332 = arith.mulf %303, %305 : vector<8x128xf32>
    %cst_153 = arith.constant -1.000000e+30 : f32
    %333 = vector.broadcast %cst_153 : f32 to vector<8x128xf32>
    %334 = arith.select %288, %332, %333 : vector<8x128xi1>, vector<8x128xf32>
    %335 = arith.maximumf %323, %334 : vector<8x128xf32>
    %cst_154 = arith.constant 1.000000e+30 : f32
    %336 = vector.broadcast %cst_154 : f32 to vector<8x128xf32>
    %337 = arith.select %290, %332, %336 : vector<8x128xi1>, vector<8x128xf32>
    %338 = arith.minimumf %326, %337 : vector<8x128xf32>
    %cst_155 = arith.constant dense<true> : vector<8x128xi1>
    %339 = arith.xori %282, %cst_155 : vector<8x128xi1>
    %cst_156 = arith.constant 0.000000e+00 : f32
    %340 = vector.broadcast %cst_156 : f32 to vector<8x128xf32>
    %341 = arith.cmpf oge, %303, %340 : vector<8x128xf32>
    %342 = arith.ori %339, %341 : vector<8x128xi1>
    %343 = arith.andi %331, %342 : vector<8x128xi1>
    %344 = arith.mulf %306, %298 : vector<8x128xf32>
    %cst_157 = arith.constant -1.000000e+30 : f32
    %345 = vector.broadcast %cst_157 : f32 to vector<8x128xf32>
    %346 = arith.select %290, %344, %345 : vector<8x128xi1>, vector<8x128xf32>
    %347 = arith.maximumf %335, %346 : vector<8x128xf32>
    %cst_158 = arith.constant 1.000000e+30 : f32
    %348 = vector.broadcast %cst_158 : f32 to vector<8x128xf32>
    %349 = arith.select %288, %344, %348 : vector<8x128xi1>, vector<8x128xf32>
    %350 = arith.minimumf %338, %349 : vector<8x128xf32>
    %cst_159 = arith.constant dense<true> : vector<8x128xi1>
    %351 = arith.xori %282, %cst_159 : vector<8x128xi1>
    %cst_160 = arith.constant 0.000000e+00 : f32
    %352 = vector.broadcast %cst_160 : f32 to vector<8x128xf32>
    %353 = arith.cmpf oge, %306, %352 : vector<8x128xf32>
    %354 = arith.ori %351, %353 : vector<8x128xi1>
    %355 = arith.andi %343, %354 : vector<8x128xi1>
    %356 = arith.cmpf ole, %347, %350 : vector<8x128xf32>
    %357 = arith.andi %355, %356 : vector<8x128xi1>
    %358 = arith.subf %350, %347 : vector<8x128xf32>
    %cst_161 = arith.constant 0.000000e+00 : f32
    %359 = vector.broadcast %cst_161 : f32 to vector<8x128xf32>
    %360 = arith.select %357, %358, %359 : vector<8x128xi1>, vector<8x128xf32>
    %361 = arith.addf %278, %360 : vector<8x128xf32>
    %cst_162 = arith.constant 0.000000e+00 : f32
    %362 = vector.broadcast %cst_162 : f32 to vector<8x128xf32>
    %363 = arith.cmpf oeq, %67, %362 : vector<8x128xf32>
    %cst_163 = arith.constant 0.000000e+00 : f32
    %364 = vector.broadcast %cst_163 : f32 to vector<8x128xf32>
    %365 = arith.cmpf oeq, %66, %364 : vector<8x128xf32>
    %cst_164 = arith.constant 0.000000e+00 : f32
    %366 = vector.broadcast %cst_164 : f32 to vector<8x128xf32>
    %367 = arith.cmpf ogt, %67, %366 : vector<8x128xf32>
    %cst_165 = arith.constant 0.000000e+00 : f32
    %368 = vector.broadcast %cst_165 : f32 to vector<8x128xf32>
    %369 = arith.cmpf olt, %67, %368 : vector<8x128xf32>
    %cst_166 = arith.constant 0.000000e+00 : f32
    %370 = vector.broadcast %cst_166 : f32 to vector<8x128xf32>
    %371 = arith.cmpf ogt, %66, %370 : vector<8x128xf32>
    %cst_167 = arith.constant 0.000000e+00 : f32
    %372 = vector.broadcast %cst_167 : f32 to vector<8x128xf32>
    %373 = arith.cmpf olt, %66, %372 : vector<8x128xf32>
    %cst_168 = arith.constant 1.000000e+00 : f32
    %374 = vector.broadcast %cst_168 : f32 to vector<8x128xf32>
    %375 = arith.select %363, %374, %67 : vector<8x128xi1>, vector<8x128xf32>
    %cst_169 = arith.constant 1.000000e+00 : f32
    %376 = vector.broadcast %cst_169 : f32 to vector<8x128xf32>
    %377 = arith.divf %376, %375 : vector<8x128xf32>
    %cst_170 = arith.constant 1.000000e+00 : f32
    %378 = vector.broadcast %cst_170 : f32 to vector<8x128xf32>
    %379 = arith.select %365, %378, %66 : vector<8x128xi1>, vector<8x128xf32>
    %cst_171 = arith.constant 1.000000e+00 : f32
    %380 = vector.broadcast %cst_171 : f32 to vector<8x128xf32>
    %381 = arith.divf %380, %379 : vector<8x128xf32>
    %382 = arith.addf %101, %79 : vector<8x128xf32>
    %cst_172 = arith.constant 0.000000e+00 : f32
    %383 = vector.broadcast %cst_172 : f32 to vector<8x128xf32>
    %384 = arith.subf %383, %377 : vector<8x128xf32>
    %385 = arith.subf %79, %101 : vector<8x128xf32>
    %386 = arith.addf %105, %83 : vector<8x128xf32>
    %cst_173 = arith.constant 0.000000e+00 : f32
    %387 = vector.broadcast %cst_173 : f32 to vector<8x128xf32>
    %388 = arith.subf %387, %381 : vector<8x128xf32>
    %389 = arith.subf %83, %105 : vector<8x128xf32>
    %cst_174 = arith.constant 0.000000e+00 : f32
    %390 = vector.broadcast %cst_174 : f32 to vector<8x128xf32>
    %cst_175 = arith.constant 1.000000e+00 : f32
    %391 = vector.broadcast %cst_175 : f32 to vector<8x128xf32>
    %392 = arith.mulf %382, %384 : vector<8x128xf32>
    %cst_176 = arith.constant -1.000000e+30 : f32
    %393 = vector.broadcast %cst_176 : f32 to vector<8x128xf32>
    %394 = arith.select %367, %392, %393 : vector<8x128xi1>, vector<8x128xf32>
    %395 = arith.maximumf %390, %394 : vector<8x128xf32>
    %cst_177 = arith.constant 1.000000e+30 : f32
    %396 = vector.broadcast %cst_177 : f32 to vector<8x128xf32>
    %397 = arith.select %369, %392, %396 : vector<8x128xi1>, vector<8x128xf32>
    %398 = arith.minimumf %391, %397 : vector<8x128xf32>
    %cst_178 = arith.constant dense<true> : vector<8x128xi1>
    %399 = arith.xori %363, %cst_178 : vector<8x128xi1>
    %cst_179 = arith.constant 0.000000e+00 : f32
    %400 = vector.broadcast %cst_179 : f32 to vector<8x128xf32>
    %401 = arith.cmpf oge, %382, %400 : vector<8x128xf32>
    %402 = arith.ori %399, %401 : vector<8x128xi1>
    %403 = arith.mulf %385, %377 : vector<8x128xf32>
    %cst_180 = arith.constant -1.000000e+30 : f32
    %404 = vector.broadcast %cst_180 : f32 to vector<8x128xf32>
    %405 = arith.select %369, %403, %404 : vector<8x128xi1>, vector<8x128xf32>
    %406 = arith.maximumf %395, %405 : vector<8x128xf32>
    %cst_181 = arith.constant 1.000000e+30 : f32
    %407 = vector.broadcast %cst_181 : f32 to vector<8x128xf32>
    %408 = arith.select %367, %403, %407 : vector<8x128xi1>, vector<8x128xf32>
    %409 = arith.minimumf %398, %408 : vector<8x128xf32>
    %cst_182 = arith.constant dense<true> : vector<8x128xi1>
    %410 = arith.xori %363, %cst_182 : vector<8x128xi1>
    %cst_183 = arith.constant 0.000000e+00 : f32
    %411 = vector.broadcast %cst_183 : f32 to vector<8x128xf32>
    %412 = arith.cmpf oge, %385, %411 : vector<8x128xf32>
    %413 = arith.ori %410, %412 : vector<8x128xi1>
    %414 = arith.andi %402, %413 : vector<8x128xi1>
    %415 = arith.mulf %386, %388 : vector<8x128xf32>
    %cst_184 = arith.constant -1.000000e+30 : f32
    %416 = vector.broadcast %cst_184 : f32 to vector<8x128xf32>
    %417 = arith.select %371, %415, %416 : vector<8x128xi1>, vector<8x128xf32>
    %418 = arith.maximumf %406, %417 : vector<8x128xf32>
    %cst_185 = arith.constant 1.000000e+30 : f32
    %419 = vector.broadcast %cst_185 : f32 to vector<8x128xf32>
    %420 = arith.select %373, %415, %419 : vector<8x128xi1>, vector<8x128xf32>
    %421 = arith.minimumf %409, %420 : vector<8x128xf32>
    %cst_186 = arith.constant dense<true> : vector<8x128xi1>
    %422 = arith.xori %365, %cst_186 : vector<8x128xi1>
    %cst_187 = arith.constant 0.000000e+00 : f32
    %423 = vector.broadcast %cst_187 : f32 to vector<8x128xf32>
    %424 = arith.cmpf oge, %386, %423 : vector<8x128xf32>
    %425 = arith.ori %422, %424 : vector<8x128xi1>
    %426 = arith.andi %414, %425 : vector<8x128xi1>
    %427 = arith.mulf %389, %381 : vector<8x128xf32>
    %cst_188 = arith.constant -1.000000e+30 : f32
    %428 = vector.broadcast %cst_188 : f32 to vector<8x128xf32>
    %429 = arith.select %373, %427, %428 : vector<8x128xi1>, vector<8x128xf32>
    %430 = arith.maximumf %418, %429 : vector<8x128xf32>
    %cst_189 = arith.constant 1.000000e+30 : f32
    %431 = vector.broadcast %cst_189 : f32 to vector<8x128xf32>
    %432 = arith.select %371, %427, %431 : vector<8x128xi1>, vector<8x128xf32>
    %433 = arith.minimumf %421, %432 : vector<8x128xf32>
    %cst_190 = arith.constant dense<true> : vector<8x128xi1>
    %434 = arith.xori %365, %cst_190 : vector<8x128xi1>
    %cst_191 = arith.constant 0.000000e+00 : f32
    %435 = vector.broadcast %cst_191 : f32 to vector<8x128xf32>
    %436 = arith.cmpf oge, %389, %435 : vector<8x128xf32>
    %437 = arith.ori %434, %436 : vector<8x128xi1>
    %438 = arith.andi %426, %437 : vector<8x128xi1>
    %439 = arith.cmpf ole, %430, %433 : vector<8x128xf32>
    %440 = arith.andi %438, %439 : vector<8x128xi1>
    %441 = arith.subf %433, %430 : vector<8x128xf32>
    %cst_192 = arith.constant 0.000000e+00 : f32
    %442 = vector.broadcast %cst_192 : f32 to vector<8x128xf32>
    %443 = arith.select %440, %441, %442 : vector<8x128xi1>, vector<8x128xf32>
    %444 = arith.addf %361, %443 : vector<8x128xf32>
    %cst_193 = arith.constant 5.000000e-01 : f32
    %445 = vector.broadcast %cst_193 : f32 to vector<8x128xf32>
    %446 = arith.mulf %445, %62 : vector<8x128xf32>
    %447 = arith.mulf %446, %444 : vector<8x128xf32>
    %448 = arith.mulf %58, %39 : vector<8x128xf32>
    %449 = arith.mulf %61, %39 : vector<8x128xf32>
    %450 = arith.mulf %58, %41 : vector<8x128xf32>
    %451 = arith.mulf %61, %41 : vector<8x128xf32>
    %cst_194 = arith.constant 5.000000e-01 : f32
    %452 = vector.broadcast %cst_194 : f32 to vector<8x128xf32>
    %453 = arith.mulf %452, %448 : vector<8x128xf32>
    %cst_195 = arith.constant 5.000000e-01 : f32
    %454 = vector.broadcast %cst_195 : f32 to vector<8x128xf32>
    %455 = arith.mulf %454, %449 : vector<8x128xf32>
    %cst_196 = arith.constant 5.000000e-01 : f32
    %456 = vector.broadcast %cst_196 : f32 to vector<8x128xf32>
    %457 = arith.mulf %456, %450 : vector<8x128xf32>
    %cst_197 = arith.constant 5.000000e-01 : f32
    %458 = vector.broadcast %cst_197 : f32 to vector<8x128xf32>
    %459 = arith.mulf %458, %451 : vector<8x128xf32>
    %cst_198 = arith.constant 5.000000e-01 : f32
    %460 = vector.broadcast %cst_198 : f32 to vector<8x128xf32>
    %461 = arith.mulf %460, %7 : vector<8x128xf32>
    %cst_199 = arith.constant 9.99999974E-6 : f32
    %462 = vector.broadcast %cst_199 : f32 to vector<8x128xf32>
    %463 = arith.addf %461, %462 : vector<8x128xf32>
    %cst_200 = arith.constant 5.000000e-01 : f32
    %464 = vector.broadcast %cst_200 : f32 to vector<8x128xf32>
    %465 = arith.mulf %464, %9 : vector<8x128xf32>
    %cst_201 = arith.constant 9.99999974E-6 : f32
    %466 = vector.broadcast %cst_201 : f32 to vector<8x128xf32>
    %467 = arith.addf %465, %466 : vector<8x128xf32>
    %468 = arith.addf %52, %453 : vector<8x128xf32>
    %469 = arith.subf %52, %453 : vector<8x128xf32>
    %470 = arith.addf %55, %455 : vector<8x128xf32>
    %471 = arith.subf %55, %455 : vector<8x128xf32>
    %472 = arith.subf %468, %459 : vector<8x128xf32>
    %473 = arith.subf %469, %459 : vector<8x128xf32>
    %474 = arith.addf %469, %459 : vector<8x128xf32>
    %475 = arith.addf %468, %459 : vector<8x128xf32>
    %476 = arith.addf %470, %457 : vector<8x128xf32>
    %477 = arith.addf %471, %457 : vector<8x128xf32>
    %478 = arith.subf %471, %457 : vector<8x128xf32>
    %479 = arith.subf %470, %457 : vector<8x128xf32>
    %cst_202 = arith.constant 0.000000e+00 : f32
    %480 = vector.broadcast %cst_202 : f32 to vector<8x128xf32>
    %481 = arith.subf %480, %448 : vector<8x128xf32>
    %cst_203 = arith.constant 0.000000e+00 : f32
    %482 = vector.broadcast %cst_203 : f32 to vector<8x128xf32>
    %483 = arith.subf %482, %451 : vector<8x128xf32>
    %cst_204 = arith.constant 0.000000e+00 : f32
    %484 = vector.broadcast %cst_204 : f32 to vector<8x128xf32>
    %485 = arith.subf %484, %449 : vector<8x128xf32>
    %cst_205 = arith.constant 0.000000e+00 : f32
    %486 = vector.broadcast %cst_205 : f32 to vector<8x128xf32>
    %487 = arith.subf %486, %450 : vector<8x128xf32>
    %cst_206 = arith.constant 0.000000e+00 : f32
    %488 = vector.broadcast %cst_206 : f32 to vector<8x128xf32>
    %489 = arith.cmpf oeq, %481, %488 : vector<8x128xf32>
    %cst_207 = arith.constant 0.000000e+00 : f32
    %490 = vector.broadcast %cst_207 : f32 to vector<8x128xf32>
    %491 = arith.cmpf oeq, %485, %490 : vector<8x128xf32>
    %cst_208 = arith.constant 0.000000e+00 : f32
    %492 = vector.broadcast %cst_208 : f32 to vector<8x128xf32>
    %493 = arith.cmpf ogt, %481, %492 : vector<8x128xf32>
    %cst_209 = arith.constant 0.000000e+00 : f32
    %494 = vector.broadcast %cst_209 : f32 to vector<8x128xf32>
    %495 = arith.cmpf olt, %481, %494 : vector<8x128xf32>
    %cst_210 = arith.constant 0.000000e+00 : f32
    %496 = vector.broadcast %cst_210 : f32 to vector<8x128xf32>
    %497 = arith.cmpf ogt, %485, %496 : vector<8x128xf32>
    %cst_211 = arith.constant 0.000000e+00 : f32
    %498 = vector.broadcast %cst_211 : f32 to vector<8x128xf32>
    %499 = arith.cmpf olt, %485, %498 : vector<8x128xf32>
    %cst_212 = arith.constant 1.000000e+00 : f32
    %500 = vector.broadcast %cst_212 : f32 to vector<8x128xf32>
    %501 = arith.select %489, %500, %481 : vector<8x128xi1>, vector<8x128xf32>
    %cst_213 = arith.constant 1.000000e+00 : f32
    %502 = vector.broadcast %cst_213 : f32 to vector<8x128xf32>
    %503 = arith.divf %502, %501 : vector<8x128xf32>
    %cst_214 = arith.constant 1.000000e+00 : f32
    %504 = vector.broadcast %cst_214 : f32 to vector<8x128xf32>
    %505 = arith.select %491, %504, %485 : vector<8x128xi1>, vector<8x128xf32>
    %cst_215 = arith.constant 1.000000e+00 : f32
    %506 = vector.broadcast %cst_215 : f32 to vector<8x128xf32>
    %507 = arith.divf %506, %505 : vector<8x128xf32>
    %508 = math.absf %481 : vector<8x128xf32>
    %509 = math.absf %485 : vector<8x128xf32>
    %510 = arith.addf %508, %509 : vector<8x128xf32>
    %cst_216 = arith.constant 1.000000e-03 : f32
    %511 = vector.broadcast %cst_216 : f32 to vector<8x128xf32>
    %512 = arith.mulf %511, %510 : vector<8x128xf32>
    %513 = arith.addf %472, %463 : vector<8x128xf32>
    %cst_217 = arith.constant 0.000000e+00 : f32
    %514 = vector.broadcast %cst_217 : f32 to vector<8x128xf32>
    %515 = arith.subf %514, %503 : vector<8x128xf32>
    %516 = arith.subf %463, %472 : vector<8x128xf32>
    %517 = arith.addf %476, %467 : vector<8x128xf32>
    %cst_218 = arith.constant 0.000000e+00 : f32
    %518 = vector.broadcast %cst_218 : f32 to vector<8x128xf32>
    %519 = arith.subf %518, %507 : vector<8x128xf32>
    %520 = arith.subf %467, %476 : vector<8x128xf32>
    %cst_219 = arith.constant 0.000000e+00 : f32
    %521 = vector.broadcast %cst_219 : f32 to vector<8x128xf32>
    %cst_220 = arith.constant 1.000000e+00 : f32
    %522 = vector.broadcast %cst_220 : f32 to vector<8x128xf32>
    %523 = arith.mulf %513, %515 : vector<8x128xf32>
    %cst_221 = arith.constant -1.000000e+30 : f32
    %524 = vector.broadcast %cst_221 : f32 to vector<8x128xf32>
    %525 = arith.select %493, %523, %524 : vector<8x128xi1>, vector<8x128xf32>
    %526 = arith.maximumf %521, %525 : vector<8x128xf32>
    %cst_222 = arith.constant 1.000000e+30 : f32
    %527 = vector.broadcast %cst_222 : f32 to vector<8x128xf32>
    %528 = arith.select %495, %523, %527 : vector<8x128xi1>, vector<8x128xf32>
    %529 = arith.minimumf %522, %528 : vector<8x128xf32>
    %cst_223 = arith.constant dense<true> : vector<8x128xi1>
    %530 = arith.xori %489, %cst_223 : vector<8x128xi1>
    %cst_224 = arith.constant 0.000000e+00 : f32
    %531 = vector.broadcast %cst_224 : f32 to vector<8x128xf32>
    %532 = arith.cmpf oge, %513, %531 : vector<8x128xf32>
    %533 = arith.ori %530, %532 : vector<8x128xi1>
    %534 = arith.cmpf ole, %508, %512 : vector<8x128xf32>
    %cst_225 = arith.constant 2.000000e-05 : f32
    %535 = vector.broadcast %cst_225 : f32 to vector<8x128xf32>
    %536 = arith.cmpf ole, %513, %535 : vector<8x128xf32>
    %537 = arith.andi %534, %536 : vector<8x128xi1>
    %538 = arith.andi %537, %499 : vector<8x128xi1>
    %cst_226 = arith.constant dense<true> : vector<8x128xi1>
    %539 = arith.xori %538, %cst_226 : vector<8x128xi1>
    %540 = arith.andi %533, %539 : vector<8x128xi1>
    %541 = arith.mulf %516, %503 : vector<8x128xf32>
    %cst_227 = arith.constant -1.000000e+30 : f32
    %542 = vector.broadcast %cst_227 : f32 to vector<8x128xf32>
    %543 = arith.select %495, %541, %542 : vector<8x128xi1>, vector<8x128xf32>
    %544 = arith.maximumf %526, %543 : vector<8x128xf32>
    %cst_228 = arith.constant 1.000000e+30 : f32
    %545 = vector.broadcast %cst_228 : f32 to vector<8x128xf32>
    %546 = arith.select %493, %541, %545 : vector<8x128xi1>, vector<8x128xf32>
    %547 = arith.minimumf %529, %546 : vector<8x128xf32>
    %cst_229 = arith.constant dense<true> : vector<8x128xi1>
    %548 = arith.xori %489, %cst_229 : vector<8x128xi1>
    %cst_230 = arith.constant 0.000000e+00 : f32
    %549 = vector.broadcast %cst_230 : f32 to vector<8x128xf32>
    %550 = arith.cmpf oge, %516, %549 : vector<8x128xf32>
    %551 = arith.ori %548, %550 : vector<8x128xi1>
    %552 = arith.cmpf ole, %508, %512 : vector<8x128xf32>
    %cst_231 = arith.constant 2.000000e-05 : f32
    %553 = vector.broadcast %cst_231 : f32 to vector<8x128xf32>
    %554 = arith.cmpf ole, %516, %553 : vector<8x128xf32>
    %555 = arith.andi %552, %554 : vector<8x128xi1>
    %556 = arith.andi %555, %497 : vector<8x128xi1>
    %cst_232 = arith.constant dense<true> : vector<8x128xi1>
    %557 = arith.xori %556, %cst_232 : vector<8x128xi1>
    %558 = arith.andi %551, %557 : vector<8x128xi1>
    %559 = arith.andi %540, %558 : vector<8x128xi1>
    %560 = arith.mulf %517, %519 : vector<8x128xf32>
    %cst_233 = arith.constant -1.000000e+30 : f32
    %561 = vector.broadcast %cst_233 : f32 to vector<8x128xf32>
    %562 = arith.select %497, %560, %561 : vector<8x128xi1>, vector<8x128xf32>
    %563 = arith.maximumf %544, %562 : vector<8x128xf32>
    %cst_234 = arith.constant 1.000000e+30 : f32
    %564 = vector.broadcast %cst_234 : f32 to vector<8x128xf32>
    %565 = arith.select %499, %560, %564 : vector<8x128xi1>, vector<8x128xf32>
    %566 = arith.minimumf %547, %565 : vector<8x128xf32>
    %cst_235 = arith.constant dense<true> : vector<8x128xi1>
    %567 = arith.xori %491, %cst_235 : vector<8x128xi1>
    %cst_236 = arith.constant 0.000000e+00 : f32
    %568 = vector.broadcast %cst_236 : f32 to vector<8x128xf32>
    %569 = arith.cmpf oge, %517, %568 : vector<8x128xf32>
    %570 = arith.ori %567, %569 : vector<8x128xi1>
    %571 = arith.cmpf ole, %509, %512 : vector<8x128xf32>
    %cst_237 = arith.constant 2.000000e-05 : f32
    %572 = vector.broadcast %cst_237 : f32 to vector<8x128xf32>
    %573 = arith.cmpf ole, %517, %572 : vector<8x128xf32>
    %574 = arith.andi %571, %573 : vector<8x128xi1>
    %575 = arith.andi %574, %493 : vector<8x128xi1>
    %cst_238 = arith.constant dense<true> : vector<8x128xi1>
    %576 = arith.xori %575, %cst_238 : vector<8x128xi1>
    %577 = arith.andi %570, %576 : vector<8x128xi1>
    %578 = arith.andi %559, %577 : vector<8x128xi1>
    %579 = arith.mulf %520, %507 : vector<8x128xf32>
    %cst_239 = arith.constant -1.000000e+30 : f32
    %580 = vector.broadcast %cst_239 : f32 to vector<8x128xf32>
    %581 = arith.select %499, %579, %580 : vector<8x128xi1>, vector<8x128xf32>
    %582 = arith.maximumf %563, %581 : vector<8x128xf32>
    %cst_240 = arith.constant 1.000000e+30 : f32
    %583 = vector.broadcast %cst_240 : f32 to vector<8x128xf32>
    %584 = arith.select %497, %579, %583 : vector<8x128xi1>, vector<8x128xf32>
    %585 = arith.minimumf %566, %584 : vector<8x128xf32>
    %cst_241 = arith.constant dense<true> : vector<8x128xi1>
    %586 = arith.xori %491, %cst_241 : vector<8x128xi1>
    %cst_242 = arith.constant 0.000000e+00 : f32
    %587 = vector.broadcast %cst_242 : f32 to vector<8x128xf32>
    %588 = arith.cmpf oge, %520, %587 : vector<8x128xf32>
    %589 = arith.ori %586, %588 : vector<8x128xi1>
    %590 = arith.cmpf ole, %509, %512 : vector<8x128xf32>
    %cst_243 = arith.constant 2.000000e-05 : f32
    %591 = vector.broadcast %cst_243 : f32 to vector<8x128xf32>
    %592 = arith.cmpf ole, %520, %591 : vector<8x128xf32>
    %593 = arith.andi %590, %592 : vector<8x128xi1>
    %594 = arith.andi %593, %495 : vector<8x128xi1>
    %cst_244 = arith.constant dense<true> : vector<8x128xi1>
    %595 = arith.xori %594, %cst_244 : vector<8x128xi1>
    %596 = arith.andi %589, %595 : vector<8x128xi1>
    %597 = arith.andi %578, %596 : vector<8x128xi1>
    %598 = arith.cmpf ole, %582, %585 : vector<8x128xf32>
    %599 = arith.andi %597, %598 : vector<8x128xi1>
    %600 = arith.mulf %472, %485 : vector<8x128xf32>
    %601 = arith.mulf %476, %481 : vector<8x128xf32>
    %602 = arith.subf %600, %601 : vector<8x128xf32>
    %603 = arith.subf %585, %582 : vector<8x128xf32>
    %604 = arith.mulf %603, %602 : vector<8x128xf32>
    %cst_245 = arith.constant 0.000000e+00 : f32
    %605 = vector.broadcast %cst_245 : f32 to vector<8x128xf32>
    %606 = arith.select %599, %604, %605 : vector<8x128xi1>, vector<8x128xf32>
    %607 = arith.addf %447, %606 : vector<8x128xf32>
    %cst_246 = arith.constant 0.000000e+00 : f32
    %608 = vector.broadcast %cst_246 : f32 to vector<8x128xf32>
    %609 = arith.cmpf oeq, %451, %608 : vector<8x128xf32>
    %cst_247 = arith.constant 0.000000e+00 : f32
    %610 = vector.broadcast %cst_247 : f32 to vector<8x128xf32>
    %611 = arith.cmpf oeq, %487, %610 : vector<8x128xf32>
    %cst_248 = arith.constant 0.000000e+00 : f32
    %612 = vector.broadcast %cst_248 : f32 to vector<8x128xf32>
    %613 = arith.cmpf ogt, %451, %612 : vector<8x128xf32>
    %cst_249 = arith.constant 0.000000e+00 : f32
    %614 = vector.broadcast %cst_249 : f32 to vector<8x128xf32>
    %615 = arith.cmpf olt, %451, %614 : vector<8x128xf32>
    %cst_250 = arith.constant 0.000000e+00 : f32
    %616 = vector.broadcast %cst_250 : f32 to vector<8x128xf32>
    %617 = arith.cmpf ogt, %487, %616 : vector<8x128xf32>
    %cst_251 = arith.constant 0.000000e+00 : f32
    %618 = vector.broadcast %cst_251 : f32 to vector<8x128xf32>
    %619 = arith.cmpf olt, %487, %618 : vector<8x128xf32>
    %cst_252 = arith.constant 1.000000e+00 : f32
    %620 = vector.broadcast %cst_252 : f32 to vector<8x128xf32>
    %621 = arith.select %609, %620, %451 : vector<8x128xi1>, vector<8x128xf32>
    %cst_253 = arith.constant 1.000000e+00 : f32
    %622 = vector.broadcast %cst_253 : f32 to vector<8x128xf32>
    %623 = arith.divf %622, %621 : vector<8x128xf32>
    %cst_254 = arith.constant 1.000000e+00 : f32
    %624 = vector.broadcast %cst_254 : f32 to vector<8x128xf32>
    %625 = arith.select %611, %624, %487 : vector<8x128xi1>, vector<8x128xf32>
    %cst_255 = arith.constant 1.000000e+00 : f32
    %626 = vector.broadcast %cst_255 : f32 to vector<8x128xf32>
    %627 = arith.divf %626, %625 : vector<8x128xf32>
    %628 = math.absf %451 : vector<8x128xf32>
    %629 = math.absf %487 : vector<8x128xf32>
    %630 = arith.addf %628, %629 : vector<8x128xf32>
    %cst_256 = arith.constant 1.000000e-03 : f32
    %631 = vector.broadcast %cst_256 : f32 to vector<8x128xf32>
    %632 = arith.mulf %631, %630 : vector<8x128xf32>
    %633 = arith.addf %473, %463 : vector<8x128xf32>
    %cst_257 = arith.constant 0.000000e+00 : f32
    %634 = vector.broadcast %cst_257 : f32 to vector<8x128xf32>
    %635 = arith.subf %634, %623 : vector<8x128xf32>
    %636 = arith.subf %463, %473 : vector<8x128xf32>
    %637 = arith.addf %477, %467 : vector<8x128xf32>
    %cst_258 = arith.constant 0.000000e+00 : f32
    %638 = vector.broadcast %cst_258 : f32 to vector<8x128xf32>
    %639 = arith.subf %638, %627 : vector<8x128xf32>
    %640 = arith.subf %467, %477 : vector<8x128xf32>
    %cst_259 = arith.constant 0.000000e+00 : f32
    %641 = vector.broadcast %cst_259 : f32 to vector<8x128xf32>
    %cst_260 = arith.constant 1.000000e+00 : f32
    %642 = vector.broadcast %cst_260 : f32 to vector<8x128xf32>
    %643 = arith.mulf %633, %635 : vector<8x128xf32>
    %cst_261 = arith.constant -1.000000e+30 : f32
    %644 = vector.broadcast %cst_261 : f32 to vector<8x128xf32>
    %645 = arith.select %613, %643, %644 : vector<8x128xi1>, vector<8x128xf32>
    %646 = arith.maximumf %641, %645 : vector<8x128xf32>
    %cst_262 = arith.constant 1.000000e+30 : f32
    %647 = vector.broadcast %cst_262 : f32 to vector<8x128xf32>
    %648 = arith.select %615, %643, %647 : vector<8x128xi1>, vector<8x128xf32>
    %649 = arith.minimumf %642, %648 : vector<8x128xf32>
    %cst_263 = arith.constant dense<true> : vector<8x128xi1>
    %650 = arith.xori %609, %cst_263 : vector<8x128xi1>
    %cst_264 = arith.constant 0.000000e+00 : f32
    %651 = vector.broadcast %cst_264 : f32 to vector<8x128xf32>
    %652 = arith.cmpf oge, %633, %651 : vector<8x128xf32>
    %653 = arith.ori %650, %652 : vector<8x128xi1>
    %654 = arith.cmpf ole, %628, %632 : vector<8x128xf32>
    %cst_265 = arith.constant 2.000000e-05 : f32
    %655 = vector.broadcast %cst_265 : f32 to vector<8x128xf32>
    %656 = arith.cmpf ole, %633, %655 : vector<8x128xf32>
    %657 = arith.andi %654, %656 : vector<8x128xi1>
    %658 = arith.andi %657, %619 : vector<8x128xi1>
    %cst_266 = arith.constant dense<true> : vector<8x128xi1>
    %659 = arith.xori %658, %cst_266 : vector<8x128xi1>
    %660 = arith.andi %653, %659 : vector<8x128xi1>
    %661 = arith.mulf %636, %623 : vector<8x128xf32>
    %cst_267 = arith.constant -1.000000e+30 : f32
    %662 = vector.broadcast %cst_267 : f32 to vector<8x128xf32>
    %663 = arith.select %615, %661, %662 : vector<8x128xi1>, vector<8x128xf32>
    %664 = arith.maximumf %646, %663 : vector<8x128xf32>
    %cst_268 = arith.constant 1.000000e+30 : f32
    %665 = vector.broadcast %cst_268 : f32 to vector<8x128xf32>
    %666 = arith.select %613, %661, %665 : vector<8x128xi1>, vector<8x128xf32>
    %667 = arith.minimumf %649, %666 : vector<8x128xf32>
    %cst_269 = arith.constant dense<true> : vector<8x128xi1>
    %668 = arith.xori %609, %cst_269 : vector<8x128xi1>
    %cst_270 = arith.constant 0.000000e+00 : f32
    %669 = vector.broadcast %cst_270 : f32 to vector<8x128xf32>
    %670 = arith.cmpf oge, %636, %669 : vector<8x128xf32>
    %671 = arith.ori %668, %670 : vector<8x128xi1>
    %672 = arith.cmpf ole, %628, %632 : vector<8x128xf32>
    %cst_271 = arith.constant 2.000000e-05 : f32
    %673 = vector.broadcast %cst_271 : f32 to vector<8x128xf32>
    %674 = arith.cmpf ole, %636, %673 : vector<8x128xf32>
    %675 = arith.andi %672, %674 : vector<8x128xi1>
    %676 = arith.andi %675, %617 : vector<8x128xi1>
    %cst_272 = arith.constant dense<true> : vector<8x128xi1>
    %677 = arith.xori %676, %cst_272 : vector<8x128xi1>
    %678 = arith.andi %671, %677 : vector<8x128xi1>
    %679 = arith.andi %660, %678 : vector<8x128xi1>
    %680 = arith.mulf %637, %639 : vector<8x128xf32>
    %cst_273 = arith.constant -1.000000e+30 : f32
    %681 = vector.broadcast %cst_273 : f32 to vector<8x128xf32>
    %682 = arith.select %617, %680, %681 : vector<8x128xi1>, vector<8x128xf32>
    %683 = arith.maximumf %664, %682 : vector<8x128xf32>
    %cst_274 = arith.constant 1.000000e+30 : f32
    %684 = vector.broadcast %cst_274 : f32 to vector<8x128xf32>
    %685 = arith.select %619, %680, %684 : vector<8x128xi1>, vector<8x128xf32>
    %686 = arith.minimumf %667, %685 : vector<8x128xf32>
    %cst_275 = arith.constant dense<true> : vector<8x128xi1>
    %687 = arith.xori %611, %cst_275 : vector<8x128xi1>
    %cst_276 = arith.constant 0.000000e+00 : f32
    %688 = vector.broadcast %cst_276 : f32 to vector<8x128xf32>
    %689 = arith.cmpf oge, %637, %688 : vector<8x128xf32>
    %690 = arith.ori %687, %689 : vector<8x128xi1>
    %691 = arith.cmpf ole, %629, %632 : vector<8x128xf32>
    %cst_277 = arith.constant 2.000000e-05 : f32
    %692 = vector.broadcast %cst_277 : f32 to vector<8x128xf32>
    %693 = arith.cmpf ole, %637, %692 : vector<8x128xf32>
    %694 = arith.andi %691, %693 : vector<8x128xi1>
    %695 = arith.andi %694, %613 : vector<8x128xi1>
    %cst_278 = arith.constant dense<true> : vector<8x128xi1>
    %696 = arith.xori %695, %cst_278 : vector<8x128xi1>
    %697 = arith.andi %690, %696 : vector<8x128xi1>
    %698 = arith.andi %679, %697 : vector<8x128xi1>
    %699 = arith.mulf %640, %627 : vector<8x128xf32>
    %cst_279 = arith.constant -1.000000e+30 : f32
    %700 = vector.broadcast %cst_279 : f32 to vector<8x128xf32>
    %701 = arith.select %619, %699, %700 : vector<8x128xi1>, vector<8x128xf32>
    %702 = arith.maximumf %683, %701 : vector<8x128xf32>
    %cst_280 = arith.constant 1.000000e+30 : f32
    %703 = vector.broadcast %cst_280 : f32 to vector<8x128xf32>
    %704 = arith.select %617, %699, %703 : vector<8x128xi1>, vector<8x128xf32>
    %705 = arith.minimumf %686, %704 : vector<8x128xf32>
    %cst_281 = arith.constant dense<true> : vector<8x128xi1>
    %706 = arith.xori %611, %cst_281 : vector<8x128xi1>
    %cst_282 = arith.constant 0.000000e+00 : f32
    %707 = vector.broadcast %cst_282 : f32 to vector<8x128xf32>
    %708 = arith.cmpf oge, %640, %707 : vector<8x128xf32>
    %709 = arith.ori %706, %708 : vector<8x128xi1>
    %710 = arith.cmpf ole, %629, %632 : vector<8x128xf32>
    %cst_283 = arith.constant 2.000000e-05 : f32
    %711 = vector.broadcast %cst_283 : f32 to vector<8x128xf32>
    %712 = arith.cmpf ole, %640, %711 : vector<8x128xf32>
    %713 = arith.andi %710, %712 : vector<8x128xi1>
    %714 = arith.andi %713, %615 : vector<8x128xi1>
    %cst_284 = arith.constant dense<true> : vector<8x128xi1>
    %715 = arith.xori %714, %cst_284 : vector<8x128xi1>
    %716 = arith.andi %709, %715 : vector<8x128xi1>
    %717 = arith.andi %698, %716 : vector<8x128xi1>
    %718 = arith.cmpf ole, %702, %705 : vector<8x128xf32>
    %719 = arith.andi %717, %718 : vector<8x128xi1>
    %720 = arith.mulf %473, %487 : vector<8x128xf32>
    %721 = arith.mulf %477, %451 : vector<8x128xf32>
    %722 = arith.subf %720, %721 : vector<8x128xf32>
    %723 = arith.subf %705, %702 : vector<8x128xf32>
    %724 = arith.mulf %723, %722 : vector<8x128xf32>
    %cst_285 = arith.constant 0.000000e+00 : f32
    %725 = vector.broadcast %cst_285 : f32 to vector<8x128xf32>
    %726 = arith.select %719, %724, %725 : vector<8x128xi1>, vector<8x128xf32>
    %727 = arith.addf %607, %726 : vector<8x128xf32>
    %cst_286 = arith.constant 0.000000e+00 : f32
    %728 = vector.broadcast %cst_286 : f32 to vector<8x128xf32>
    %729 = arith.cmpf oeq, %448, %728 : vector<8x128xf32>
    %cst_287 = arith.constant 0.000000e+00 : f32
    %730 = vector.broadcast %cst_287 : f32 to vector<8x128xf32>
    %731 = arith.cmpf oeq, %449, %730 : vector<8x128xf32>
    %cst_288 = arith.constant 0.000000e+00 : f32
    %732 = vector.broadcast %cst_288 : f32 to vector<8x128xf32>
    %733 = arith.cmpf ogt, %448, %732 : vector<8x128xf32>
    %cst_289 = arith.constant 0.000000e+00 : f32
    %734 = vector.broadcast %cst_289 : f32 to vector<8x128xf32>
    %735 = arith.cmpf olt, %448, %734 : vector<8x128xf32>
    %cst_290 = arith.constant 0.000000e+00 : f32
    %736 = vector.broadcast %cst_290 : f32 to vector<8x128xf32>
    %737 = arith.cmpf ogt, %449, %736 : vector<8x128xf32>
    %cst_291 = arith.constant 0.000000e+00 : f32
    %738 = vector.broadcast %cst_291 : f32 to vector<8x128xf32>
    %739 = arith.cmpf olt, %449, %738 : vector<8x128xf32>
    %cst_292 = arith.constant 1.000000e+00 : f32
    %740 = vector.broadcast %cst_292 : f32 to vector<8x128xf32>
    %741 = arith.select %729, %740, %448 : vector<8x128xi1>, vector<8x128xf32>
    %cst_293 = arith.constant 1.000000e+00 : f32
    %742 = vector.broadcast %cst_293 : f32 to vector<8x128xf32>
    %743 = arith.divf %742, %741 : vector<8x128xf32>
    %cst_294 = arith.constant 1.000000e+00 : f32
    %744 = vector.broadcast %cst_294 : f32 to vector<8x128xf32>
    %745 = arith.select %731, %744, %449 : vector<8x128xi1>, vector<8x128xf32>
    %cst_295 = arith.constant 1.000000e+00 : f32
    %746 = vector.broadcast %cst_295 : f32 to vector<8x128xf32>
    %747 = arith.divf %746, %745 : vector<8x128xf32>
    %748 = math.absf %448 : vector<8x128xf32>
    %749 = math.absf %449 : vector<8x128xf32>
    %750 = arith.addf %748, %749 : vector<8x128xf32>
    %cst_296 = arith.constant 1.000000e-03 : f32
    %751 = vector.broadcast %cst_296 : f32 to vector<8x128xf32>
    %752 = arith.mulf %751, %750 : vector<8x128xf32>
    %753 = arith.addf %474, %463 : vector<8x128xf32>
    %cst_297 = arith.constant 0.000000e+00 : f32
    %754 = vector.broadcast %cst_297 : f32 to vector<8x128xf32>
    %755 = arith.subf %754, %743 : vector<8x128xf32>
    %756 = arith.subf %463, %474 : vector<8x128xf32>
    %757 = arith.addf %478, %467 : vector<8x128xf32>
    %cst_298 = arith.constant 0.000000e+00 : f32
    %758 = vector.broadcast %cst_298 : f32 to vector<8x128xf32>
    %759 = arith.subf %758, %747 : vector<8x128xf32>
    %760 = arith.subf %467, %478 : vector<8x128xf32>
    %cst_299 = arith.constant 0.000000e+00 : f32
    %761 = vector.broadcast %cst_299 : f32 to vector<8x128xf32>
    %cst_300 = arith.constant 1.000000e+00 : f32
    %762 = vector.broadcast %cst_300 : f32 to vector<8x128xf32>
    %763 = arith.mulf %753, %755 : vector<8x128xf32>
    %cst_301 = arith.constant -1.000000e+30 : f32
    %764 = vector.broadcast %cst_301 : f32 to vector<8x128xf32>
    %765 = arith.select %733, %763, %764 : vector<8x128xi1>, vector<8x128xf32>
    %766 = arith.maximumf %761, %765 : vector<8x128xf32>
    %cst_302 = arith.constant 1.000000e+30 : f32
    %767 = vector.broadcast %cst_302 : f32 to vector<8x128xf32>
    %768 = arith.select %735, %763, %767 : vector<8x128xi1>, vector<8x128xf32>
    %769 = arith.minimumf %762, %768 : vector<8x128xf32>
    %cst_303 = arith.constant dense<true> : vector<8x128xi1>
    %770 = arith.xori %729, %cst_303 : vector<8x128xi1>
    %cst_304 = arith.constant 0.000000e+00 : f32
    %771 = vector.broadcast %cst_304 : f32 to vector<8x128xf32>
    %772 = arith.cmpf oge, %753, %771 : vector<8x128xf32>
    %773 = arith.ori %770, %772 : vector<8x128xi1>
    %774 = arith.cmpf ole, %748, %752 : vector<8x128xf32>
    %cst_305 = arith.constant 2.000000e-05 : f32
    %775 = vector.broadcast %cst_305 : f32 to vector<8x128xf32>
    %776 = arith.cmpf ole, %753, %775 : vector<8x128xf32>
    %777 = arith.andi %774, %776 : vector<8x128xi1>
    %778 = arith.andi %777, %739 : vector<8x128xi1>
    %cst_306 = arith.constant dense<true> : vector<8x128xi1>
    %779 = arith.xori %778, %cst_306 : vector<8x128xi1>
    %780 = arith.andi %773, %779 : vector<8x128xi1>
    %781 = arith.mulf %756, %743 : vector<8x128xf32>
    %cst_307 = arith.constant -1.000000e+30 : f32
    %782 = vector.broadcast %cst_307 : f32 to vector<8x128xf32>
    %783 = arith.select %735, %781, %782 : vector<8x128xi1>, vector<8x128xf32>
    %784 = arith.maximumf %766, %783 : vector<8x128xf32>
    %cst_308 = arith.constant 1.000000e+30 : f32
    %785 = vector.broadcast %cst_308 : f32 to vector<8x128xf32>
    %786 = arith.select %733, %781, %785 : vector<8x128xi1>, vector<8x128xf32>
    %787 = arith.minimumf %769, %786 : vector<8x128xf32>
    %cst_309 = arith.constant dense<true> : vector<8x128xi1>
    %788 = arith.xori %729, %cst_309 : vector<8x128xi1>
    %cst_310 = arith.constant 0.000000e+00 : f32
    %789 = vector.broadcast %cst_310 : f32 to vector<8x128xf32>
    %790 = arith.cmpf oge, %756, %789 : vector<8x128xf32>
    %791 = arith.ori %788, %790 : vector<8x128xi1>
    %792 = arith.cmpf ole, %748, %752 : vector<8x128xf32>
    %cst_311 = arith.constant 2.000000e-05 : f32
    %793 = vector.broadcast %cst_311 : f32 to vector<8x128xf32>
    %794 = arith.cmpf ole, %756, %793 : vector<8x128xf32>
    %795 = arith.andi %792, %794 : vector<8x128xi1>
    %796 = arith.andi %795, %737 : vector<8x128xi1>
    %cst_312 = arith.constant dense<true> : vector<8x128xi1>
    %797 = arith.xori %796, %cst_312 : vector<8x128xi1>
    %798 = arith.andi %791, %797 : vector<8x128xi1>
    %799 = arith.andi %780, %798 : vector<8x128xi1>
    %800 = arith.mulf %757, %759 : vector<8x128xf32>
    %cst_313 = arith.constant -1.000000e+30 : f32
    %801 = vector.broadcast %cst_313 : f32 to vector<8x128xf32>
    %802 = arith.select %737, %800, %801 : vector<8x128xi1>, vector<8x128xf32>
    %803 = arith.maximumf %784, %802 : vector<8x128xf32>
    %cst_314 = arith.constant 1.000000e+30 : f32
    %804 = vector.broadcast %cst_314 : f32 to vector<8x128xf32>
    %805 = arith.select %739, %800, %804 : vector<8x128xi1>, vector<8x128xf32>
    %806 = arith.minimumf %787, %805 : vector<8x128xf32>
    %cst_315 = arith.constant dense<true> : vector<8x128xi1>
    %807 = arith.xori %731, %cst_315 : vector<8x128xi1>
    %cst_316 = arith.constant 0.000000e+00 : f32
    %808 = vector.broadcast %cst_316 : f32 to vector<8x128xf32>
    %809 = arith.cmpf oge, %757, %808 : vector<8x128xf32>
    %810 = arith.ori %807, %809 : vector<8x128xi1>
    %811 = arith.cmpf ole, %749, %752 : vector<8x128xf32>
    %cst_317 = arith.constant 2.000000e-05 : f32
    %812 = vector.broadcast %cst_317 : f32 to vector<8x128xf32>
    %813 = arith.cmpf ole, %757, %812 : vector<8x128xf32>
    %814 = arith.andi %811, %813 : vector<8x128xi1>
    %815 = arith.andi %814, %733 : vector<8x128xi1>
    %cst_318 = arith.constant dense<true> : vector<8x128xi1>
    %816 = arith.xori %815, %cst_318 : vector<8x128xi1>
    %817 = arith.andi %810, %816 : vector<8x128xi1>
    %818 = arith.andi %799, %817 : vector<8x128xi1>
    %819 = arith.mulf %760, %747 : vector<8x128xf32>
    %cst_319 = arith.constant -1.000000e+30 : f32
    %820 = vector.broadcast %cst_319 : f32 to vector<8x128xf32>
    %821 = arith.select %739, %819, %820 : vector<8x128xi1>, vector<8x128xf32>
    %822 = arith.maximumf %803, %821 : vector<8x128xf32>
    %cst_320 = arith.constant 1.000000e+30 : f32
    %823 = vector.broadcast %cst_320 : f32 to vector<8x128xf32>
    %824 = arith.select %737, %819, %823 : vector<8x128xi1>, vector<8x128xf32>
    %825 = arith.minimumf %806, %824 : vector<8x128xf32>
    %cst_321 = arith.constant dense<true> : vector<8x128xi1>
    %826 = arith.xori %731, %cst_321 : vector<8x128xi1>
    %cst_322 = arith.constant 0.000000e+00 : f32
    %827 = vector.broadcast %cst_322 : f32 to vector<8x128xf32>
    %828 = arith.cmpf oge, %760, %827 : vector<8x128xf32>
    %829 = arith.ori %826, %828 : vector<8x128xi1>
    %830 = arith.cmpf ole, %749, %752 : vector<8x128xf32>
    %cst_323 = arith.constant 2.000000e-05 : f32
    %831 = vector.broadcast %cst_323 : f32 to vector<8x128xf32>
    %832 = arith.cmpf ole, %760, %831 : vector<8x128xf32>
    %833 = arith.andi %830, %832 : vector<8x128xi1>
    %834 = arith.andi %833, %735 : vector<8x128xi1>
    %cst_324 = arith.constant dense<true> : vector<8x128xi1>
    %835 = arith.xori %834, %cst_324 : vector<8x128xi1>
    %836 = arith.andi %829, %835 : vector<8x128xi1>
    %837 = arith.andi %818, %836 : vector<8x128xi1>
    %838 = arith.cmpf ole, %822, %825 : vector<8x128xf32>
    %839 = arith.andi %837, %838 : vector<8x128xi1>
    %840 = arith.mulf %474, %449 : vector<8x128xf32>
    %841 = arith.mulf %478, %448 : vector<8x128xf32>
    %842 = arith.subf %840, %841 : vector<8x128xf32>
    %843 = arith.subf %825, %822 : vector<8x128xf32>
    %844 = arith.mulf %843, %842 : vector<8x128xf32>
    %cst_325 = arith.constant 0.000000e+00 : f32
    %845 = vector.broadcast %cst_325 : f32 to vector<8x128xf32>
    %846 = arith.select %839, %844, %845 : vector<8x128xi1>, vector<8x128xf32>
    %847 = arith.addf %727, %846 : vector<8x128xf32>
    %cst_326 = arith.constant 0.000000e+00 : f32
    %848 = vector.broadcast %cst_326 : f32 to vector<8x128xf32>
    %849 = arith.cmpf oeq, %483, %848 : vector<8x128xf32>
    %cst_327 = arith.constant 0.000000e+00 : f32
    %850 = vector.broadcast %cst_327 : f32 to vector<8x128xf32>
    %851 = arith.cmpf oeq, %450, %850 : vector<8x128xf32>
    %cst_328 = arith.constant 0.000000e+00 : f32
    %852 = vector.broadcast %cst_328 : f32 to vector<8x128xf32>
    %853 = arith.cmpf ogt, %483, %852 : vector<8x128xf32>
    %cst_329 = arith.constant 0.000000e+00 : f32
    %854 = vector.broadcast %cst_329 : f32 to vector<8x128xf32>
    %855 = arith.cmpf olt, %483, %854 : vector<8x128xf32>
    %cst_330 = arith.constant 0.000000e+00 : f32
    %856 = vector.broadcast %cst_330 : f32 to vector<8x128xf32>
    %857 = arith.cmpf ogt, %450, %856 : vector<8x128xf32>
    %cst_331 = arith.constant 0.000000e+00 : f32
    %858 = vector.broadcast %cst_331 : f32 to vector<8x128xf32>
    %859 = arith.cmpf olt, %450, %858 : vector<8x128xf32>
    %cst_332 = arith.constant 1.000000e+00 : f32
    %860 = vector.broadcast %cst_332 : f32 to vector<8x128xf32>
    %861 = arith.select %849, %860, %483 : vector<8x128xi1>, vector<8x128xf32>
    %cst_333 = arith.constant 1.000000e+00 : f32
    %862 = vector.broadcast %cst_333 : f32 to vector<8x128xf32>
    %863 = arith.divf %862, %861 : vector<8x128xf32>
    %cst_334 = arith.constant 1.000000e+00 : f32
    %864 = vector.broadcast %cst_334 : f32 to vector<8x128xf32>
    %865 = arith.select %851, %864, %450 : vector<8x128xi1>, vector<8x128xf32>
    %cst_335 = arith.constant 1.000000e+00 : f32
    %866 = vector.broadcast %cst_335 : f32 to vector<8x128xf32>
    %867 = arith.divf %866, %865 : vector<8x128xf32>
    %868 = math.absf %483 : vector<8x128xf32>
    %869 = math.absf %450 : vector<8x128xf32>
    %870 = arith.addf %868, %869 : vector<8x128xf32>
    %cst_336 = arith.constant 1.000000e-03 : f32
    %871 = vector.broadcast %cst_336 : f32 to vector<8x128xf32>
    %872 = arith.mulf %871, %870 : vector<8x128xf32>
    %873 = arith.addf %475, %463 : vector<8x128xf32>
    %cst_337 = arith.constant 0.000000e+00 : f32
    %874 = vector.broadcast %cst_337 : f32 to vector<8x128xf32>
    %875 = arith.subf %874, %863 : vector<8x128xf32>
    %876 = arith.subf %463, %475 : vector<8x128xf32>
    %877 = arith.addf %479, %467 : vector<8x128xf32>
    %cst_338 = arith.constant 0.000000e+00 : f32
    %878 = vector.broadcast %cst_338 : f32 to vector<8x128xf32>
    %879 = arith.subf %878, %867 : vector<8x128xf32>
    %880 = arith.subf %467, %479 : vector<8x128xf32>
    %cst_339 = arith.constant 0.000000e+00 : f32
    %881 = vector.broadcast %cst_339 : f32 to vector<8x128xf32>
    %cst_340 = arith.constant 1.000000e+00 : f32
    %882 = vector.broadcast %cst_340 : f32 to vector<8x128xf32>
    %883 = arith.mulf %873, %875 : vector<8x128xf32>
    %cst_341 = arith.constant -1.000000e+30 : f32
    %884 = vector.broadcast %cst_341 : f32 to vector<8x128xf32>
    %885 = arith.select %853, %883, %884 : vector<8x128xi1>, vector<8x128xf32>
    %886 = arith.maximumf %881, %885 : vector<8x128xf32>
    %cst_342 = arith.constant 1.000000e+30 : f32
    %887 = vector.broadcast %cst_342 : f32 to vector<8x128xf32>
    %888 = arith.select %855, %883, %887 : vector<8x128xi1>, vector<8x128xf32>
    %889 = arith.minimumf %882, %888 : vector<8x128xf32>
    %cst_343 = arith.constant dense<true> : vector<8x128xi1>
    %890 = arith.xori %849, %cst_343 : vector<8x128xi1>
    %cst_344 = arith.constant 0.000000e+00 : f32
    %891 = vector.broadcast %cst_344 : f32 to vector<8x128xf32>
    %892 = arith.cmpf oge, %873, %891 : vector<8x128xf32>
    %893 = arith.ori %890, %892 : vector<8x128xi1>
    %894 = arith.cmpf ole, %868, %872 : vector<8x128xf32>
    %cst_345 = arith.constant 2.000000e-05 : f32
    %895 = vector.broadcast %cst_345 : f32 to vector<8x128xf32>
    %896 = arith.cmpf ole, %873, %895 : vector<8x128xf32>
    %897 = arith.andi %894, %896 : vector<8x128xi1>
    %898 = arith.andi %897, %859 : vector<8x128xi1>
    %cst_346 = arith.constant dense<true> : vector<8x128xi1>
    %899 = arith.xori %898, %cst_346 : vector<8x128xi1>
    %900 = arith.andi %893, %899 : vector<8x128xi1>
    %901 = arith.mulf %876, %863 : vector<8x128xf32>
    %cst_347 = arith.constant -1.000000e+30 : f32
    %902 = vector.broadcast %cst_347 : f32 to vector<8x128xf32>
    %903 = arith.select %855, %901, %902 : vector<8x128xi1>, vector<8x128xf32>
    %904 = arith.maximumf %886, %903 : vector<8x128xf32>
    %cst_348 = arith.constant 1.000000e+30 : f32
    %905 = vector.broadcast %cst_348 : f32 to vector<8x128xf32>
    %906 = arith.select %853, %901, %905 : vector<8x128xi1>, vector<8x128xf32>
    %907 = arith.minimumf %889, %906 : vector<8x128xf32>
    %cst_349 = arith.constant dense<true> : vector<8x128xi1>
    %908 = arith.xori %849, %cst_349 : vector<8x128xi1>
    %cst_350 = arith.constant 0.000000e+00 : f32
    %909 = vector.broadcast %cst_350 : f32 to vector<8x128xf32>
    %910 = arith.cmpf oge, %876, %909 : vector<8x128xf32>
    %911 = arith.ori %908, %910 : vector<8x128xi1>
    %912 = arith.cmpf ole, %868, %872 : vector<8x128xf32>
    %cst_351 = arith.constant 2.000000e-05 : f32
    %913 = vector.broadcast %cst_351 : f32 to vector<8x128xf32>
    %914 = arith.cmpf ole, %876, %913 : vector<8x128xf32>
    %915 = arith.andi %912, %914 : vector<8x128xi1>
    %916 = arith.andi %915, %857 : vector<8x128xi1>
    %cst_352 = arith.constant dense<true> : vector<8x128xi1>
    %917 = arith.xori %916, %cst_352 : vector<8x128xi1>
    %918 = arith.andi %911, %917 : vector<8x128xi1>
    %919 = arith.andi %900, %918 : vector<8x128xi1>
    %920 = arith.mulf %877, %879 : vector<8x128xf32>
    %cst_353 = arith.constant -1.000000e+30 : f32
    %921 = vector.broadcast %cst_353 : f32 to vector<8x128xf32>
    %922 = arith.select %857, %920, %921 : vector<8x128xi1>, vector<8x128xf32>
    %923 = arith.maximumf %904, %922 : vector<8x128xf32>
    %cst_354 = arith.constant 1.000000e+30 : f32
    %924 = vector.broadcast %cst_354 : f32 to vector<8x128xf32>
    %925 = arith.select %859, %920, %924 : vector<8x128xi1>, vector<8x128xf32>
    %926 = arith.minimumf %907, %925 : vector<8x128xf32>
    %cst_355 = arith.constant dense<true> : vector<8x128xi1>
    %927 = arith.xori %851, %cst_355 : vector<8x128xi1>
    %cst_356 = arith.constant 0.000000e+00 : f32
    %928 = vector.broadcast %cst_356 : f32 to vector<8x128xf32>
    %929 = arith.cmpf oge, %877, %928 : vector<8x128xf32>
    %930 = arith.ori %927, %929 : vector<8x128xi1>
    %931 = arith.cmpf ole, %869, %872 : vector<8x128xf32>
    %cst_357 = arith.constant 2.000000e-05 : f32
    %932 = vector.broadcast %cst_357 : f32 to vector<8x128xf32>
    %933 = arith.cmpf ole, %877, %932 : vector<8x128xf32>
    %934 = arith.andi %931, %933 : vector<8x128xi1>
    %935 = arith.andi %934, %853 : vector<8x128xi1>
    %cst_358 = arith.constant dense<true> : vector<8x128xi1>
    %936 = arith.xori %935, %cst_358 : vector<8x128xi1>
    %937 = arith.andi %930, %936 : vector<8x128xi1>
    %938 = arith.andi %919, %937 : vector<8x128xi1>
    %939 = arith.mulf %880, %867 : vector<8x128xf32>
    %cst_359 = arith.constant -1.000000e+30 : f32
    %940 = vector.broadcast %cst_359 : f32 to vector<8x128xf32>
    %941 = arith.select %859, %939, %940 : vector<8x128xi1>, vector<8x128xf32>
    %942 = arith.maximumf %923, %941 : vector<8x128xf32>
    %cst_360 = arith.constant 1.000000e+30 : f32
    %943 = vector.broadcast %cst_360 : f32 to vector<8x128xf32>
    %944 = arith.select %857, %939, %943 : vector<8x128xi1>, vector<8x128xf32>
    %945 = arith.minimumf %926, %944 : vector<8x128xf32>
    %cst_361 = arith.constant dense<true> : vector<8x128xi1>
    %946 = arith.xori %851, %cst_361 : vector<8x128xi1>
    %cst_362 = arith.constant 0.000000e+00 : f32
    %947 = vector.broadcast %cst_362 : f32 to vector<8x128xf32>
    %948 = arith.cmpf oge, %880, %947 : vector<8x128xf32>
    %949 = arith.ori %946, %948 : vector<8x128xi1>
    %950 = arith.cmpf ole, %869, %872 : vector<8x128xf32>
    %cst_363 = arith.constant 2.000000e-05 : f32
    %951 = vector.broadcast %cst_363 : f32 to vector<8x128xf32>
    %952 = arith.cmpf ole, %880, %951 : vector<8x128xf32>
    %953 = arith.andi %950, %952 : vector<8x128xi1>
    %954 = arith.andi %953, %855 : vector<8x128xi1>
    %cst_364 = arith.constant dense<true> : vector<8x128xi1>
    %955 = arith.xori %954, %cst_364 : vector<8x128xi1>
    %956 = arith.andi %949, %955 : vector<8x128xi1>
    %957 = arith.andi %938, %956 : vector<8x128xi1>
    %958 = arith.cmpf ole, %942, %945 : vector<8x128xf32>
    %959 = arith.andi %957, %958 : vector<8x128xi1>
    %960 = arith.mulf %475, %450 : vector<8x128xf32>
    %961 = arith.mulf %479, %483 : vector<8x128xf32>
    %962 = arith.subf %960, %961 : vector<8x128xf32>
    %963 = arith.subf %945, %942 : vector<8x128xf32>
    %964 = arith.mulf %963, %962 : vector<8x128xf32>
    %cst_365 = arith.constant 0.000000e+00 : f32
    %965 = vector.broadcast %cst_365 : f32 to vector<8x128xf32>
    %966 = arith.select %959, %964, %965 : vector<8x128xi1>, vector<8x128xf32>
    %967 = arith.addf %847, %966 : vector<8x128xf32>
    %cst_366 = arith.constant 5.000000e-01 : f32
    %968 = vector.broadcast %cst_366 : f32 to vector<8x128xf32>
    %969 = arith.mulf %968, %967 : vector<8x128xf32>
    %cst_367 = arith.constant 0.000000e+00 : f32
    %970 = vector.broadcast %cst_367 : f32 to vector<8x128xf32>
    %971 = arith.maximumf %969, %970 : vector<8x128xf32>
    %972 = arith.minimumf %62, %63 : vector<8x128xf32>
    %973 = arith.minimumf %971, %972 : vector<8x128xf32>
    %cst_368 = arith.constant 5.000000e-01 : f32
    %974 = vector.broadcast %cst_368 : f32 to vector<8x128xf32>
    %975 = arith.mulf %974, %11 : vector<8x128xf32>
    %976 = arith.addf %5, %975 : vector<8x128xf32>
    %cst_369 = arith.constant 5.000000e-01 : f32
    %977 = vector.broadcast %cst_369 : f32 to vector<8x128xf32>
    %978 = arith.mulf %977, %43 : vector<8x128xf32>
    %979 = arith.addf %37, %978 : vector<8x128xf32>
    %980 = arith.minimumf %976, %979 : vector<8x128xf32>
    %cst_370 = arith.constant 5.000000e-01 : f32
    %981 = vector.broadcast %cst_370 : f32 to vector<8x128xf32>
    %982 = arith.mulf %981, %11 : vector<8x128xf32>
    %983 = arith.subf %5, %982 : vector<8x128xf32>
    %cst_371 = arith.constant 5.000000e-01 : f32
    %984 = vector.broadcast %cst_371 : f32 to vector<8x128xf32>
    %985 = arith.mulf %984, %43 : vector<8x128xf32>
    %986 = arith.subf %37, %985 : vector<8x128xf32>
    %987 = arith.maximumf %983, %986 : vector<8x128xf32>
    %988 = arith.subf %980, %987 : vector<8x128xf32>
    %cst_372 = arith.constant 0.000000e+00 : f32
    %989 = vector.broadcast %cst_372 : f32 to vector<8x128xf32>
    %990 = arith.maximumf %988, %989 : vector<8x128xf32>
    %991 = arith.mulf %62, %11 : vector<8x128xf32>
    %992 = arith.mulf %63, %43 : vector<8x128xf32>
    %993 = arith.mulf %973, %990 : vector<8x128xf32>
    %994 = arith.addf %991, %992 : vector<8x128xf32>
    %995 = arith.subf %994, %993 : vector<8x128xf32>
    %cst_373 = arith.constant 9.99999997E-7 : f32
    %996 = vector.broadcast %cst_373 : f32 to vector<8x128xf32>
    %997 = arith.maximumf %995, %996 : vector<8x128xf32>
    %998 = arith.divf %993, %997 : vector<8x128xf32>
    %cst_374 = arith.constant 1.000000e+00 : f32
    %999 = vector.broadcast %cst_374 : f32 to vector<8x128xf32>
    %1000 = arith.subf %999, %998 : vector<8x128xf32>
    %c0_375 = arith.constant 0 : index
    %c0_376 = arith.constant 0 : index
    %c0_377 = arith.constant 0 : index
    %1001 = vector.load %arg3[%c0_375, %c0_376, %c0_377] : memref<1x8x128xf32, #tpu.memory_space<vmem>>, vector<1x8x128xf32>
    %1002 = vector.shape_cast %1001 : vector<1x8x128xf32> to vector<8x128xf32>
    %1003 = arith.mulf %1000, %1002 : vector<8x128xf32>
    %c0_378 = arith.constant 0 : index
    %c0_379 = arith.constant 0 : index
    %c0_380 = arith.constant 0 : index
    %1004 = vector.load %arg4[%c0_378, %c0_379, %c0_380] : memref<1x8x128xf32, #tpu.memory_space<vmem>>, vector<1x8x128xf32>
    %1005 = vector.shape_cast %1004 : vector<1x8x128xf32> to vector<8x128xf32>
    %1006 = vector.shape_cast %1003 : vector<8x128xf32> to vector<1x8x128xf32>
    tpu.vector_store %arg4[%c0_378, %c0_379, %c0_380], %1006 {strides = array<i32>} : memref<1x8x128xf32, #tpu.memory_space<vmem>>, vector<1x8x128xf32>,
    return
  }
  func.func @transform_0(%arg0: i32) -> (i32, i32, i32, i32) {
    %c0_i32 = arith.constant 0 : i32
    %c0_i32_0 = arith.constant 0 : i32
    %c0_i32_1 = arith.constant 0 : i32
    %c0_i32_2 = arith.constant 0 : i32
    return %c0_i32, %arg0, %c0_i32_0, %c0_i32_1 : i32, i32, i32, i32
  }
  func.func @transform_1(%arg0: i32) -> (i32, i32, i32, i32) {
    %c0_i32 = arith.constant 0 : i32
    %c0_i32_0 = arith.constant 0 : i32
    %c0_i32_1 = arith.constant 0 : i32
    %c0_i32_2 = arith.constant 0 : i32
    return %c0_i32, %arg0, %c0_i32_0, %c0_i32_1 : i32, i32, i32, i32
  }
  func.func @transform_2(%arg0: i32) -> (i32, i32, i32) {
    %c0_i32 = arith.constant 0 : i32
    %c0_i32_0 = arith.constant 0 : i32
    %c0_i32_1 = arith.constant 0 : i32
    return %arg0, %c0_i32, %c0_i32_0 : i32, i32, i32
  }
  func.func @transform_3(%arg0: i32) -> (i32, i32, i32) {
    %c0_i32 = arith.constant 0 : i32
    %c0_i32_0 = arith.constant 0 : i32
    %c0_i32_1 = arith.constant 0 : i32
    return %arg0, %c0_i32, %c0_i32_0 : i32, i32, i32
  }
}

</mosaic_0001>

<bundles_post_ra>
// kernel: _iou3d_loss_impl.1
= control target key start
LH: loop header
LB: loop body
LE: loop exit
PB: predicated region body
PF: predicated region fallthrough
CT: control target
= control target key end

     0   :  { %8 = vsyncpa [#allocation3], 0  ;;  %vm2542_vm15 = vmmov 1   ;;  %s825_s17 = smov [#allocation2]   ;;  %s2535_s0 = inlined_call_operand.vmem [shape: f32[8,1,8,128], index: 0, kind: input, shape index: {}]   ;;  %s2536_s1 = inlined_call_operand.vmem [shape: f32[8,1,8,128], index: 1, kind: input, shape index: {}]   ;;  %s2537_s2 = inlined_call_operand.vmem [shape: f32[1,8,128], index: 2, kind: input, shape index: {}]   ;;  %s2538_s3 = inlined_call_operand.hbm [shape: f32[1,8,128], index: 3, kind: output, shape index: {}]  }
   0x1   :  { %v762_v0 = vld [vmem:[%s2536_s1 + $0x30] sm:$0xff]  ;;  %v763_v1 = vld [vmem:[%s2536_s1 + $0x38] sm:$0xff]  ;;  %v30_v6 = vld [vmem:[%s2536_s1] sm:$0xff]  ;;  %s742_s18 = sshll.u32 %s825_s17, 4  ;;  %s743_s18 = int_to_ptr.vmem [resolvable:$true] %s742_s18 }
   0x2   :  { %v755_v2 = vld [vmem:[%s2535_s0 + $0x30] sm:$0xff]  ;;  %v756_v3 = vld [vmem:[%s2535_s0 + $0x38] sm:$0xff]  ;;  %vm57_vm0 = vcmp.ne.f32.partialorder %v762_v0, %v762_v0  ;;  %vm59_vm1 = vcmp.ne.f32.partialorder %v763_v1, %v763_v1  ;;  %v757_v7 = vld [vmem:[%s2536_s1 + $0x8] sm:$0xff]  ;;  %vm45_vm2 = vcmp.ne.f32.partialorder %v30_v6, %v30_v6  ;;  %s800_s19 = scalar_lea.vmem %s743_s18, 128  ;;  %p805_p1 = scmp.lt.s32.totalorder %s743_s18, %s743_s18 }
   0x3   :  { %v58_v4 = vsel %vm57_vm0, %v755_v2, %v762_v0  ;;  %v60_v5 = vsel %vm59_vm1, %v756_v3, %v763_v1  ;;  %v15_v10 = vld [vmem:[%s2535_s0] sm:$0xff]  ;;  %v750_v11 = vld [vmem:[%s2535_s0 + $0x8] sm:$0xff]  ;;  %vm47_vm3 = vcmp.ne.f32.partialorder %v757_v7, %v757_v7  ;;  %v875_v15 = vld [vmem:[%s2535_s0 + $0x18] sm:$0xff]  ;;  %p801_p0 = scmp.ne.s32.totalorder %s743_s18, %s800_s19  ;;  %p806_p2 = scmp.lt.s32.totalorder %s800_s19, %s800_s19 }
   0x4   :  { %v69_v8 = vmul.f32 %v755_v2, %v58_v4  ;;  %v70_v9 = vmul.f32 %v756_v3, %v60_v5  ;;  %v46_v12 = vsel %vm45_vm2, %v15_v10, %v30_v6  ;;  %v48_v13 = vsel %vm47_vm3, %v750_v11, %v757_v7  ;;  %v886_v22 = vld [vmem:[%s2535_s0 + $0x20] sm:$0xff]  ;;  %v759_v36 = vld [vmem:[%s2536_s1 + $0x18] sm:$0xff] }
   0x5   :  { %v72_v16 = vmul.f32 %v755_v2, %v60_v5  ;;  %v73_v17 = vmul.f32 %v756_v3, %v58_v4  ;;  %v61_v18 = vsub.f32 %v46_v12, %v15_v10  ;;  %v62_v19 = vsub.f32 %v48_v13, %v750_v11  ;;  %v760_v39 = vld [vmem:[%s2536_s1 + $0x20] sm:$0xff]  ;;  %p807_p3 = por %p806_p2, %p805_p1 }
   0x6   :  { %v870_v14 = vadd.f32 %v70_v9, %v69_v8  ;;  %vm51_vm6 = vcmp.ne.f32.partialorder %v759_v36, %v759_v36  ;;  %vm53_vm8 = vcmp.ne.f32.partialorder %v760_v39, %v760_v39  ;;  %v346_v53 = vmul.f32 0.5, %v875_v15 }
   0x7   :  { %v881_v21 = vsub.f32 %v72_v16, %v73_v17  ;;  %v63_v23 = vmul.f32 %v755_v2, %v61_v18  ;;  %v64_v24 = vmul.f32 %v756_v3, %v62_v19  ;;  %v66_v25 = vmul.f32 %v755_v2, %v62_v19  ;;  %p808_p4 = pnand %p807_p3, %p801_p0 }
   0x8   :  { %v879_v20 = vmul.f32 %v875_v15, %v870_v14  ;;  %v67_v26 = vmul.f32 %v756_v3, %v61_v18  ;;  %v919_v37 = vmul.f32 %v886_v22, %v870_v14  ;;  %v938_v45 = vsel %vm51_vm6, %v875_v15, %v759_v36 }
   0x9   :  { %v893_v28 = vmul.f32 %v886_v22, %v881_v21  ;;  %v895_v29 = vadd.f32 %v64_v24, %v63_v23  ;;  %v905_v32 = vmul.f32 %v875_v15, %v881_v21  ;;  %2586 = vst [vmem:[#allocation5_spill] sm:$0xff] %v938_v45  ;;  %v85_v48 = vmul.f32 0.5, %v938_v45 }
   0xa   :  { %v889_v27 = vsub.f32 0.0, %v879_v20  ;;  %v897_v30 = vsub.f32 %v66_v25, %v67_v26  ;;  %v931_v42 = vsub.f32 0.0, %v919_v37  ;;  %v81_v43 = vmul.f32 0.5, %v879_v20 }
   0xb   :  { %v901_v31 = vsub.f32 0.0, %v893_v28  ;;  %v89_v33 = vmul.f32 %v870_v14, %v895_v29  ;;  %vm114_vm7 = vcmp.eq.f32.partialorder %v905_v32, 0.0  ;;  %v92_v40 = vmul.f32 %v881_v21, %v895_v29 }
   0xc   :  { %vm113_vm4 = vcmp.eq.f32.partialorder %v889_v27, 0.0  ;;  %v90_v34 = vmul.f32 %v881_v21, %v897_v30  ;;  %v93_v41 = vmul.f32 %v870_v14, %v897_v30  ;;  %v122_v46 = vsel %vm114_vm7, 1.0, %v905_v32 }
   0xd   :  { %v119_v35 = vsel %vm113_vm4, 1.0, %v889_v27  ;;  %vm168_vm5 = vcmp.eq.f32.partialorder %v901_v31, 0.0  ;;  %v84_v47 = vmul.f32 0.5, %v893_v28  ;;  %v83_v50 = vmul.f32 0.5, %v919_v37  ;;  %vm983_vm0 = vmxor %vm113_vm4, %vm2542_vm15 }
   0xe   :  { %766 = vrcp.f32 %v119_v35  ;;  %v91_v38 = vadd.f32 %v90_v34, %v89_v33  ;;  %v174_v44 = vsel %vm168_vm5, 1.0, %v901_v31  ;;  %v94_v51 = vsub.f32 %v92_v40, %v93_v41 }
   0xf   :  { %vm2541_vm9 = vcmp.eq.f32.partialorder %v931_v42, 0.0  ;;  %768 = vrcp.f32 %v174_v44  ;;  %v96_v52 = vsub.f32 0.0, %v81_v43  ;;  %v949_v54 = vsel %vm53_vm8, %v886_v22, %v760_v39 }
  0x10   :  { %v95_v49 = vsub.f32 %v81_v43, %v91_v38  ;;  %770 = vrcp.f32 %v122_v46  ;;  %2587 = vst [vmem:[#allocation6_spill] sm:$0xff] %v949_v54  ;;  %v951_v55 = vadd.f32 1e-05, %v85_v48  ;;  %v177_v57 = vsel %vm2541_vm9, 1.0, %v931_v42 }
  0x11   :  { %v82_v59 = vmul.f32 0.5, %v905_v32  ;;  %v87_v60 = vmul.f32 0.5, %v949_v54  ;;  %v98_v61 = vadd.f32 %v94_v51, %v83_v50  ;;  %v99_v62 = vsub.f32 0.0, %v83_v50 }
  0x12   :  { %v101_v56 = vadd.f32 %v95_v49, %v84_v47  ;;  %v97_v63 = vsub.f32 %v96_v52, %v91_v38  ;;  %vm2540_vm10 = vcmp.eq.f32.partialorder %v879_v20, 0.0  ;;  %v348_v0 = vmul.f32 0.5, %v886_v22 }
  0x13   :  { %v961_v1 = vsub.f32 0.0, %v905_v32  ;;  %772 = vrcp.f32 %v177_v57  ;;  %v964_v4 = vadd.f32 1e-05, %v346_v53  ;;  %v966_v5 = vadd.f32 1e-05, %v87_v60 }
  0x14   :  { %v125_v2 = vadd.f32 %v101_v56, %v951_v55  ;;  %v100_v6 = vadd.f32 %v99_v62, %v94_v51  ;;  %v105_v7 = vsub.f32 %v98_v61, %v82_v59  ;;  %v230_v8 = vsel %vm2540_vm10, 1.0, %v879_v20 }
  0x15   :  { %v102_v9 = vadd.f32 %v97_v63, %v84_v47  ;;  %vm115_vm11 = vcmp.gt.f32.partialorder %v889_v27, 0.0  ;;  %vm116_vm12 = vcmp.lt.f32.partialorder %v889_v27, 0.0  ;;  %v973_v10 = vadd.f32 1e-05, %v348_v0 }
  0x16   :  { %v103_v12 = vsub.f32 %v97_v63, %v84_v47  ;;  %v975_v13 = vsub.f32 %v95_v49, %v84_v47  ;;  %v127_v16 = vsub.f32 %v951_v55, %v101_v56  ;;  %vm2539_vm13 = vcmp.eq.f32.partialorder %v961_v1, 0.0 }
  0x17   :  { %vm117_vm14 = vcmp.gt.f32.partialorder %v905_v32, 0.0  ;;  %vm137_vm1 = vcmp.ge.f32.partialorder %v125_v2, 0.0  ;;  %774 = vrcp.f32 %v230_v8  ;;  %v106_v23 = vadd.f32 %v98_v61, %v82_v59 }
  0x18   :  { %v767_v58 = vpop.eup %766  ;;  %v987_v24 = vadd.f32 %v100_v6, %v82_v59  ;;  %v128_v25 = vadd.f32 %v105_v7, %v966_v5  ;;  %vm144_vm3 = vcmp.ge.f32.partialorder %v127_v16, 0.0  ;;  %v991_v26 = vsub.f32 %v100_v6, %v82_v59  ;;  %vm1002_vm4 = vmor %vm983_vm0, %vm137_vm1 }
  0x19   :  { %v126_v3 = vsub.f32 0.0, %v767_v58  ;;  %v769_v11 = vpop.eup %768  ;;  %v180_v33 = vadd.f32 %v102_v9, %v951_v55  ;;  %v233_v35 = vsel %vm2539_vm13, 1.0, %v961_v1  ;;  %v998_v38 = vsub.f32 %v966_v5, %v105_v7  ;;  %vm1013_vm13 = vmor %vm983_vm0, %vm144_vm3 }
  0x1a   :  { %v771_v17 = vpop.eup %770  ;;  %v181_v34 = vsub.f32 0.0, %v769_v11  ;;  %vm153_vm6 = vcmp.ge.f32.partialorder %v128_v25, 0.0  ;;  %vm2544_vm8 = vcmp.gt.f32.partialorder %v901_v31, 0.0  ;;  %v139_v43 = vmul.f32 %v767_v58, %v127_v16  ;;  %vm1021_vm1 = vmxor %vm114_vm7, %vm2542_vm15 }
  0x1b   :  { %v131_v18 = vmul.f32 %v126_v3, %v125_v2  ;;  %v129_v36 = vsub.f32 0.0, %v771_v17  ;;  %v182_v46 = vsub.f32 %v951_v55, %v102_v9  ;;  %vm2545_vm2 = vcmp.lt.f32.partialorder %v901_v31, 0.0  ;;  %vm1035_vm7 = vmxor %vm168_vm5, %vm2542_vm15 }
  0x1c   :  { %v183_v49 = vadd.f32 %v106_v23, %v966_v5  ;;  %776 = vrcp.f32 %v233_v35  ;;  %v1030_v50 = vsub.f32 %v966_v5, %v106_v23  ;;  %v186_v51 = vmul.f32 %v181_v34, %v180_v33  ;;  %vm1050_vm5 = vmor %vm1021_vm1, %vm153_vm6 }
  0x1d   :  { %v132_v40 = vsel %vm115_vm11, %v131_v18, -1e+30  ;;  %v134_v41 = vsel %vm116_vm12, %v131_v18, 1e+30  ;;  %v773_v47 = vpop.eup %772  ;;  %vm192_vm0 = vcmp.ge.f32.partialorder %v180_v33, 0.0  ;;  %vm199_vm3 = vcmp.ge.f32.partialorder %v182_v46, 0.0 }
  0x1e   :  { %v133_v53 = vmax.f32 %v132_v40, 0.0  ;;  %v135_v56 = vmin.f32 %v134_v41, 1.0  ;;  %v147_v57 = vmul.f32 %v129_v36, %v128_v25  ;;  %v140_v58 = vsel %vm116_vm12, %v139_v43, -1e+30  ;;  %vm1059_vm12 = vmor %vm1035_vm7, %vm192_vm0 }
  0x1f   :  { %v142_v59 = vsel %vm115_vm11, %v139_v43, 1e+30  ;;  %v184_v61 = vsub.f32 0.0, %v773_v47  ;;  %v236_v62 = vadd.f32 %v103_v12, %v951_v55  ;;  %v156_v63 = vmul.f32 %v771_v17, %v998_v38  ;;  %vm1076_vm6 = vmor %vm1035_vm7, %vm199_vm3 }
  0x20   :  { %v238_v27 = vsub.f32 %v951_v55, %v103_v12  ;;  %v1066_v2 = vadd.f32 %v987_v24, %v966_v5  ;;  %v187_v6 = vsel %vm2544_vm8, %v186_v51, -1e+30  ;;  %v189_v7 = vsel %vm2545_vm2, %v186_v51, 1e+30  ;;  %vm201_vm11 = vmand %vm1059_vm12, %vm1076_vm6 }
  0x21   :  { %v775_v3 = vpop.eup %774  ;;  %v194_v8 = vmul.f32 %v769_v11, %v182_v46  ;;  %vm248_vm10 = vcmp.ge.f32.partialorder %v236_v62, 0.0  ;;  %v141_v12 = vmax.f32 %v133_v53, %v140_v58  ;;  %v143_v16 = vmin.f32 %v135_v56, %v142_v59 }
  0x22   :  { %v148_v17 = vsel %vm117_vm14, %v147_v57, -1e+30  ;;  %vm2604_vm8 = vmmov 1   ;;  %vm2605_vm2 = vcmp.eq.f32.partialorder %v931_v42, 0.0  ;;  %vm255_vm7 = vcmp.ge.f32.partialorder %v238_v27, 0.0 }
  0x23   :  { %vm1088_vm9 = vmxor %vm2605_vm2, %vm2604_vm8  ;;  %vm2608_vm3 = vcmp.lt.f32.partialorder %v905_v32, 0.0  ;;  %v202_v19 = vmul.f32 %v184_v61, %v183_v49  ;;  %v1097_v23 = vmul.f32 %v870_v14, %v938_v45  ;;  %v1101_v25 = vmul.f32 %v881_v21, %v938_v45 }
  0x24   :  { %v150_v18 = vsel %vm2608_vm3, %v147_v57, 1e+30  ;;  %vm2609_vm2 = vmand %vm1002_vm4, %vm1013_vm13  ;;  %v157_v34 = vsel %vm2608_vm3, %v156_v63, -1e+30  ;;  %v188_v35 = vmax.f32 %v187_v6, 0.0  ;;  %v190_v36 = vmin.f32 %v189_v7, 1.0 }
  0x25   :  { %vm1110_vm15 = vmand %vm2609_vm2, %vm1050_vm5  ;;  %v237_v40 = vsub.f32 0.0, %v775_v3  ;;  %v159_v39 = vsel %vm117_vm14, %v156_v63, 1e+30  ;;  %vm2612_vm13 = vcmp.lt.f32.partialorder %v901_v31, 0.0  ;;  %vm2613_vm4 = vcmp.gt.f32.partialorder %v901_v31, 0.0 }
  0x26   :  { %v195_v41 = vsel %vm2612_vm13, %v194_v8, -1e+30  ;;  %v197_v43 = vsel %vm2613_vm4, %v194_v8, 1e+30  ;;  %vm2614_vm5 = vcmp.ge.f32.partialorder %v183_v49, 0.0  ;;  %v1136_v46 = vsub.f32 %v966_v5, %v987_v24  ;;  %v777_v51 = vpop.eup %776 }
  0x27   :  { %vm1130_vm2 = vmor %vm1088_vm9, %vm2614_vm5  ;;  %v149_v32 = vmax.f32 %v141_v12, %v148_v17  ;;  %v151_v52 = vmin.f32 %v143_v16, %v150_v18  ;;  %v211_v53 = vmul.f32 %v773_v47, %v1030_v50  ;;  %vm2617_vm3 = vcmp.eq.f32.partialorder %v879_v20, 0.0 }
  0x28   :  { %vm1143_vm13 = vmxor %vm2617_vm3, %vm2604_vm8  ;;  %vm2620_vm4 = vcmp.eq.f32.partialorder %v893_v28, 0.0  ;;  %vm2621_vm5 = vcmp.ge.f32.partialorder %v998_v38, 0.0  ;;  %vm2624_vm14 = vcmp.gt.f32.partialorder %v931_v42, 0.0  ;;  %vm229_vm3 = vcmp.lt.f32.partialorder %v961_v1, 0.0 }
  0x29   :  { %v286_v49 = vsel %vm2620_vm4, 1.0, %v893_v28  ;;  %vm1154_vm0 = vmor %vm1021_vm1, %vm2621_vm5  ;;  %v203_v47 = vsel %vm2624_vm14, %v202_v19, -1e+30  ;;  %v1162_v56 = vmul.f32 0.5, %v1097_v23  ;;  %v1165_v57 = vsub.f32 0.0, %v1097_v23 }
  0x2a   :  { %v1168_v58 = vsub.f32 0.0, %v1101_v25  ;;  %v196_v38 = vmax.f32 %v188_v35, %v195_v41  ;;  %v198_v48 = vmin.f32 %v190_v36, %v197_v43  ;;  %vm1177_vm1 = vmand %vm201_vm11, %vm1130_vm2  ;;  %v242_v60 = vmul.f32 %v237_v40, %v236_v62 }
  0x2b   :  { %v250_v61 = vmul.f32 %v775_v3, %v238_v27  ;;  %vm272_vm14 = vcmp.ge.f32.partialorder %v1136_v46, 0.0  ;;  %v240_v63 = vsub.f32 0.0, %v777_v51  ;;  %vm1185_vm4 = vmor %vm1143_vm13, %vm248_vm10  ;;  %v1191_v0 = vmul.f32 %v881_v21, %v949_v54 }
  0x2c   :  { %v378_v7 = vand.u32 2147483647, %v1165_v57  ;;  %v379_v8 = vand.u32 2147483647, %v1168_v58  ;;  %v1195_v9 = vmax.f32 %v149_v32, %v157_v34  ;;  %v1197_v3 = vmin.f32 %v151_v52, %v159_v39  ;;  %vm1204_vm10 = vmor %vm1143_vm13, %vm255_vm7 }
  0x2d   :  { %vm2629_vm12 = vcmp.lt.f32.partialorder %v931_v42, 0.0  ;;  %778 = vrcp.f32 %v286_v49  ;;  %vm2633_vm6 = vcmp.gt.f32.partialorder %v931_v42, 0.0  ;;  %vm2634_vm2 = vcmp.eq.f32.partialorder %v961_v1, 0.0 }
  0x2e   :  { %v205_v62 = vsel %vm2629_vm12, %v202_v19, 1e+30  ;;  %vm2632_vm11 = vmmov %vm2629_vm12  ;;  %v214_v16 = vsel %vm2633_vm6, %v211_v53, 1e+30  ;;  %v1220_v27 = vmul.f32 0.5, %v1191_v0  ;;  %v1224_v18 = vadd.f32 %v1162_v56, %v895_v29 }
  0x2f   :  { %v212_v21 = vsel %vm2632_vm11, %v211_v53, -1e+30  ;;  %vm1215_vm5 = vmxor %vm2634_vm2, %vm2604_vm8  ;;  %v204_v19 = vmax.f32 %v196_v38, %v203_v47  ;;  %vm2637_vm7 = vcmp.ge.f32.partialorder %v1030_v50, 0.0  ;;  %vm2640_vm12 = vcmp.gt.f32.partialorder %v879_v20, 0.0 }
  0x30   :  { %vm1230_vm13 = vmor %vm1088_vm9, %vm2637_vm7  ;;  %v243_v34 = vsel %vm2640_vm12, %v242_v60, -1e+30  ;;  %vm2641_vm11 = vcmp.lt.f32.partialorder %v879_v20, 0.0  ;;  %v1239_v36 = vmul.f32 0.5, %v1101_v25  ;;  %v206_v40 = vmin.f32 %v198_v48, %v205_v62 }
  0x31   :  { %v245_v35 = vsel %vm2641_vm11, %v242_v60, 1e+30  ;;  %vm2642_vm6 = vmmov %vm2641_vm11  ;;  %v258_v50 = vmul.f32 %v240_v63, %v1066_v2  ;;  %v380_v11 = vadd.f32 %v379_v8, %v378_v7  ;;  %v267_v44 = vmul.f32 %v777_v51, %v1136_v46 }
  0x32   :  { %v251_v39 = vsel %vm2642_vm6, %v250_v61, -1e+30  ;;  %vm257_vm9 = vmand %vm1185_vm4, %vm1204_vm10  ;;  %v1265_v32 = vmul.f32 %v870_v14, %v949_v54  ;;  %v244_v20 = vmax.f32 %v243_v34, 0.0  ;;  %v246_v52 = vmin.f32 %v245_v35, 1.0 }
  0x33   :  { %vm2643_vm7 = vmmov %vm2640_vm12  ;;  %vm2644_vm12 = vcmp.ge.f32.partialorder %v1066_v2, 0.0  ;;  %v1276_v53 = vsub.f32 %v1224_v18, %v1220_v27  ;;  %v1278_v51 = vmax.f32 %v204_v19, %v212_v21  ;;  %v1286_v14 = vadd.f32 %v975_v13, %v951_v55 }
  0x34   :  { %v253_v41 = vsel %vm2643_vm7, %v250_v61, 1e+30  ;;  %vm1258_vm11 = vmor %vm1215_vm5, %vm2644_vm12  ;;  %vm2647_vm7 = vcmp.eq.f32.partialorder %v919_v37, 0.0  ;;  %v1289_v31 = vmul.f32 0.5, %v1265_v32  ;;  %v1293_v49 = vadd.f32 %v1239_v36, %v897_v30 }
  0x35   :  { %v289_v2 = vsel %vm2647_vm7, 1.0, %v919_v37  ;;  %v1295_v47 = vmin.f32 %v206_v40, %v214_v16  ;;  %vm2648_vm7 = vcmp.gt.f32.partialorder %v961_v1, 0.0  ;;  %vm1306_vm12 = vmand %vm257_vm9, %vm1258_vm11  ;;  %v1312_v60 = vsub.f32 %v951_v55, %v975_v13 }
  0x36   :  { %v259_v38 = vsel %vm2648_vm7, %v258_v50, -1e+30  ;;  %v381_v61 = vmul.f32 0.001, %v380_v11  ;;  %v261_v63 = vsel %vm229_vm3, %v258_v50, 1e+30  ;;  %780 = vrcp.f32 %v289_v2  ;;  %vm1331_vm10 = vmor %vm1215_vm5, %vm272_vm14 }
  0x37   :  { %vm2651_vm7 = vcmp.eq.f32.partialorder %v893_v28, 0.0  ;;  %vm304_vm4 = vcmp.ge.f32.partialorder %v1286_v14, 0.0  ;;  %v1325_v62 = vsub.f32 0.0, %v1265_v32  ;;  %v252_v12 = vmax.f32 %v244_v20, %v251_v39  ;;  %v1340_v16 = vpop.eup %778 }
  0x38   :  { %vm1319_vm6 = vmxor %vm2651_vm7, %vm2604_vm8  ;;  %v254_v55 = vmin.f32 %v246_v52, %v253_v41  ;;  %v2654_v13 = vmov 0  ;;  %v1338_v21 = vadd.f32 %v1276_v53, %v964_v4  ;;  %vm2656_vm11 = vcmp.eq.f32.partialorder %v919_v37, 0.0 }
  0x39   :  { %v2655_v13 = vsel %vm1331_vm10, 4294967295, %v2654_v13  ;;  %vm1345_vm7 = vmxor %vm2656_vm11, %vm2604_vm8  ;;  %v2657_v19 = vmov 0  ;;  %v1351_v46 = vadd.f32 %v1293_v49, %v1289_v31  ;;  %v1355_v17 = vsub.f32 %v964_v4, %v1276_v53 }
  0x3a   :  { %v2658_v19 = vsel %vm1345_vm7, 4294967295, %v2657_v19  ;;  %v464_v34 = vand.u32 2147483647, %v1191_v0  ;;  %v2560_v35 = vand.u32 2147483647, %v1325_v62  ;;  %vm1363_vm5 = vmor %vm1319_vm6, %vm304_vm4  ;;  %v2659_v40 = vmov 0 }
  0x3b   :  { %v2660_v40 = vsel %vm1363_vm5, 4294967295, %v2659_v40  ;;  %vm2547_vm11 = vcmp.eq.f32.partialorder %v1165_v57, 0.0  ;;  %vm1368_vm2 = vcmp.le.f32.partialorder %v378_v7, %v381_v61  ;;  %v268_v50 = vsel %vm229_vm3, %v267_v44, -1e+30  ;;  %vm2677_vm7 = vmand %vm1177_vm1, %vm1230_vm13 }
  0x3c   :  { %v1377_v11 = vsub.f32 %v895_v29, %v1162_v56  ;;  %vm1382_vm4 = vmxor %vm2547_vm11, %vm2604_vm8  ;;  %v260_v7 = vmax.f32 %v252_v12, %v259_v38  ;;  %v262_v43 = vmin.f32 %v254_v55, %v261_v63  ;;  %v1394_v29 = vadd.f32 %v991_v26, %v966_v5 }
  0x3d   :  { %vm2665_vm11 = vcmp.ge.f32.partialorder %v1312_v60, 0.0  ;;  %v2666_v56 = vmov 0  ;;  %vm2668_vm14 = vcmp.gt.f32.partialorder %v961_v1, 0.0  ;;  %v1410_v52 = vadd.f32 %v1351_v46, %v973_v10 }
  0x3e   :  { %vm1400_vm9 = vmor %vm1319_vm6, %vm2665_vm11  ;;  %v270_v20 = vsel %vm2668_vm14, %v267_v44, 1e+30  ;;  %vm2669_vm3 = vcmp.le.f32.partialorder %v1338_v21, 2e-05  ;;  %v466_v1 = vadd.f32 %v2560_v35, %v464_v34  ;;  %vm2672_vm6 = vcmp.le.f32.partialorder %v1195_v9, %v1197_v3 }
  0x3f   :  { %v2667_v56 = vsel %vm1400_vm9, 4294967295, %v2666_v56  ;;  %vm1416_vm10 = vmand %vm1368_vm2, %vm2669_vm3  ;;  %vm2676_vm3 = vcmp.le.f32.partialorder %v1278_v51, %v1295_v47  ;;  %v2678_v38 = vmov 0  ;;  %v293_v33 = vsub.f32 0.0, %v1340_v16 }
  0x40   :  { %vm2673_vm14 = vmand %vm1110_vm15, %vm1154_vm0  ;;  %vm2680_vm0 = vcmp.ge.f32.partialorder %v1338_v21, 0.0  ;;  %v2681_v24 = vmov 0  ;;  %vm2684_vm13 = vcmp.eq.f32.partialorder %v1168_v58, 0.0  ;;  %v2685_v59 = vmov 0  ;;  %v1498_v39 = vpop.eup %780 }
  0x41   :  { %vm1432_vm11 = vmand %vm2673_vm14, %vm2672_vm6  ;;  %vm2683_vm14 = vcmp.le.f32.partialorder %v1355_v17, 2e-05  ;;  %v1471_v42 = vsub.f32 %v1377_v11, %v1220_v27  ;;  %v2688_v63 = vmov 0  ;;  %v1489_v12 = vmax.f32 %v260_v7, %v268_v50 }
  0x42   :  { %vm1444_vm5 = vmand %vm2677_vm7, %vm2676_vm3  ;;  %vm2551_vm3 = vcmp.lt.f32.partialorder %v1168_v58, 0.0  ;;  %v1491_v55 = vmin.f32 %v262_v43, %v270_v20  ;;  %v1510_v50 = vmul.f32 0.001, %v466_v1  ;;  %v166_v41 = vsub.f32 %v1197_v3, %v1195_v9 }
  0x43   :  { %v2679_v38 = vsel %vm1444_vm5, 4294967295, %v2678_v38  ;;  %vm1454_vm6 = vmor %vm1382_vm4, %vm2680_vm0  ;;  %vm2687_vm0 = vcmp.ge.f32.partialorder %v1355_v17, 0.0  ;;  %v298_v9 = vmul.f32 %v293_v33, %v1286_v14  ;;  %v2700_v43 = vmov 0 }
  0x44   :  { %v2682_v24 = vsel %vm1454_vm6, 4294967295, %v2681_v24  ;;  %vm410_vm1 = vmand %vm1368_vm2, %vm2683_vm14  ;;  %vm1484_vm2 = vcmp.le.f32.partialorder %v379_v8, %v381_v61  ;;  %vm424_vm14 = vcmp.le.f32.partialorder %v1410_v52, 2e-05  ;;  %v1502_v8 = vsub.f32 %v973_v10, %v1351_v46 }
  0x45   :  { %vm1465_vm7 = vmxor %vm2684_vm13, %vm2604_vm8  ;;  %vm2554_vm13 = vcmp.gt.f32.partialorder %v1168_v58, 0.0  ;;  %vm2695_vm6 = vcmp.ge.f32.partialorder %v1394_v29, 0.0  ;;  %v1542_v20 = vadd.f32 %v1471_v42, %v964_v4  ;;  %v221_v2 = vsub.f32 %v1295_v47, %v1278_v51 }
  0x46   :  { %v2686_v59 = vsel %vm1465_vm7, 4294967295, %v2685_v59  ;;  %vm1478_vm15 = vmor %vm1382_vm4, %vm2687_vm0  ;;  %v1551_v14 = vsub.f32 %v897_v30, %v1239_v36  ;;  %v2702_v1 = vmov 0  ;;  %v1570_v30 = vsub.f32 %v964_v4, %v1471_v42 }
  0x47   :  { %v2689_v63 = vsel %vm1478_vm15, 4294967295, %v2688_v63  ;;  %vm399_vm4 = vmand %vm1416_vm10, %vm2551_vm3  ;;  %vm2699_vm10 = vcmp.eq.f32.partialorder %v1165_v57, 0.0  ;;  %v306_v47 = vmul.f32 %v1340_v16, %v1312_v60  ;;  %vm2711_vm9 = vcmp.le.f32.partialorder %v1489_v12, %v1491_v55 }
  0x48   :  { %vm1506_vm0 = vmand %vm410_vm1, %vm2554_vm13  ;;  %vm2696_vm1 = vnez %v2658_v19  ;;  %v372_v3 = vsel %vm2699_vm10, 1.0, %v1165_v57  ;;  %v2714_v60 = vmov 0  ;;  %v296_v16 = vsub.f32 0.0, %v1498_v39 }
  0x49   :  { %vm1524_vm13 = vmor %vm2696_vm1, %vm2695_vm6  ;;  %vm1575_vm6 = vcmp.le.f32.partialorder %v464_v34, %v1510_v50  ;;  %782 = vrcp.f32 %v372_v3  ;;  %v297_v48 = vsub.f32 %v966_v5, %v991_v26  ;;  %v167_v5 = vsel %vm1432_vm11, %v166_v41, 0.0 }
  0x4a   :  { %vm425_vm5 = vmand %vm1484_vm2, %vm424_vm14  ;;  %vm2708_vm14 = vcmp.le.f32.partialorder %v1502_v8, 2e-05  ;;  %vm2727_vm11 = vnez %v2686_v59  ;;  %v2728_v44 = vmov 0  ;;  %v2733_v41 = vmov 0 }
  0x4b   :  { %vm1535_vm7 = vmxor %vm399_vm4, %vm2604_vm8  ;;  %vm2555_vm4 = vcmp.gt.f32.partialorder %v1165_v57, 0.0  ;;  %v314_v45 = vmul.f32 %v296_v16, %v1394_v29  ;;  %v277_v36 = vsub.f32 %v1491_v55, %v1489_v12  ;;  %v2745_v29 = vmov 0 }
  0x4c   :  { %v2701_v43 = vsel %vm1535_vm7, 4294967295, %v2700_v43  ;;  %vm1557_vm10 = vmxor %vm1506_vm0, %vm2604_vm8  ;;  %vm2738_vm7 = vcmp.le.f32.partialorder %v1570_v30, 2e-05  ;;  %v2754_v12 = vmov 0  ;;  %v2759_v16 = vmov 0 }
  0x4d   :  { %v2703_v1 = vsel %vm1557_vm10, 4294967295, %v2702_v1  ;;  %vm1563_vm15 = vmand %vm425_vm5, %vm2555_vm4  ;;  %vm2712_vm5 = vnez %v2655_v13  ;;  %vm2716_vm4 = vcmp.gt.f32.partialorder %v893_v28, 0.0  ;;  %vm2566_vm10 = vcmp.eq.f32.partialorder %v1325_v62, 0.0 }
  0x4e   :  { %vm1588_vm1 = vmand %vm1484_vm2, %vm2708_vm14  ;;  %v299_v34 = vsel %vm2716_vm4, %v298_v9, -1e+30  ;;  %vm2717_vm2 = vcmp.eq.f32.partialorder %v1168_v58, 0.0  ;;  %vm2720_vm4 = vcmp.le.f32.partialorder %v1542_v20, 2e-05  ;;  %v2762_v3 = vmov 0 }
  0x4f   :  { %vm2713_vm0 = vmand %vm1306_vm12, %vm2712_vm5  ;;  %v375_v6 = vsel %vm2717_vm2, 1.0, %v1168_v58  ;;  %vm2718_vm12 = vcmp.lt.f32.partialorder %v893_v28, 0.0  ;;  %vm2723_vm2 = vnez %v2679_v38  ;;  %v2730_v38 = vmov 0 }
  0x50   :  { %vm1600_vm3 = vmand %vm2713_vm0, %vm2711_vm9  ;;  %v301_v13 = vsel %vm2718_vm12, %v298_v9, 1e+30  ;;  %vm2719_vm0 = vcmp.eq.f32.partialorder %v1191_v0, 0.0  ;;  %v222_v26 = vsel %vm2723_vm2, %v221_v2, 0.0  ;;  %v1633_v9 = vadd.f32 %v1551_v14, %v1289_v31 }
  0x51   :  { %v2715_v60 = vsel %vm1600_vm3, 4294967295, %v2714_v60  ;;  %v458_v61 = vsel %vm2719_vm0, 1.0, %v1191_v0  ;;  %vm1623_vm5 = vmand %vm1575_vm6, %vm2720_vm4  ;;  %vm2726_vm9 = vcmp.ge.f32.partialorder %v1410_v52, 0.0  ;;  %vm2732_vm0 = vcmp.lt.f32.partialorder %v1165_v57, 0.0 }
  0x52   :  { %vm1647_vm3 = vmor %vm2727_vm11, %vm2726_vm9  ;;  %vm2735_vm9 = vcmp.eq.f32.partialorder %v1191_v0, 0.0  ;;  %v300_v51 = vmax.f32 %v299_v34, 0.0  ;;  %784 = vrcp.f32 %v375_v6  ;;  %v302_v35 = vmin.f32 %v301_v13, 1.0 }
  0x53   :  { %v2729_v44 = vsel %vm1647_vm3, 4294967295, %v2728_v44  ;;  %vm1654_vm2 = vmxor %vm1563_vm15, %vm2604_vm8  ;;  %vm480_vm15 = vcmp.ge.f32.partialorder %v1542_v20, 0.0  ;;  %786 = vrcp.f32 %v458_v61  ;;  %vm493_vm3 = vcmp.ge.f32.partialorder %v1570_v30, 0.0 }
  0x54   :  { %v2731_v38 = vsel %vm1654_vm2, 4294967295, %v2730_v38  ;;  %vm1662_vm14 = vmand %vm1588_vm1, %vm2732_vm0  ;;  %vm2563_vm2 = vcmp.lt.f32.partialorder %v1325_v62, 0.0  ;;  %vm2741_vm0 = vcmp.lt.f32.partialorder %v893_v28, 0.0  ;;  %v1727_v55 = vadd.f32 %v1633_v9, %v973_v10 }
  0x55   :  { %v2734_v41 = vsel %vm1662_vm14, 4294967295, %v2733_v41  ;;  %vm1669_vm11 = vmxor %vm2735_vm9, %vm2604_vm8  ;;  %v307_v54 = vsel %vm2741_vm0, %v306_v47, -1e+30  ;;  %vm2756_vm4 = vcmp.gt.f32.partialorder %v1325_v62, 0.0  ;;  %v461_v33 = vsel %vm2566_vm10, 1.0, %v1325_v62 }
  0x56   :  { %vm1679_vm1 = vmand %vm1575_vm6, %vm2738_vm7  ;;  %vm2744_vm7 = vcmp.gt.f32.partialorder %v893_v28, 0.0  ;;  %v2750_v28 = vmov 0  ;;  %vm2753_vm6 = vnez %v2658_v19  ;;  %v550_v19 = vand.u32 2147483647, %v1097_v23 }
  0x57   :  { %vm1690_vm9 = vmand %vm1623_vm5, %vm2563_vm2  ;;  %v309_v6 = vsel %vm2744_vm7, %v306_v47, 1e+30  ;;  %vm2747_vm5 = vnez %v2660_v40  ;;  %vm2748_vm2 = vnez %v2667_v56  ;;  %vm2752_vm7 = vcmp.ge.f32.partialorder %v297_v48, 0.0 }
  0x58   :  { %vm1701_vm0 = vmor %vm1669_vm11, %vm480_vm15  ;;  %v551_v56 = vand.u32 2147483647, %v1101_v25  ;;  %v308_v7 = vmax.f32 %v300_v51, %v307_v54  ;;  %v323_v47 = vmul.f32 %v1498_v39, %v297_v48  ;;  %v310_v13 = vmin.f32 %v302_v35, %v309_v6  ;;  %v783_v48 = vpop.eup %782 }
  0x59   :  { %v2746_v29 = vsel %vm1701_vm0, 4294967295, %v2745_v29  ;;  %vm2749_vm14 = vmand %vm2747_vm5, %vm2748_vm2  ;;  %vm2565_vm2 = vcmp.eq.f32.partialorder %v1097_v23, 0.0  ;;  %v2764_v54 = vand.u32 2147483647, %v1325_v62  ;;  %v223_v35 = vadd.f32 %v222_v26, %v167_v5 }
  0x5a   :  { %vm1713_vm12 = vmand %vm2749_vm14, %vm1524_vm13  ;;  %vm2767_vm5 = vnez %v2715_v60  ;;  %v1781_v60 = vsub.f32 %v973_v10, %v1633_v9  ;;  %v552_v5 = vadd.f32 %v551_v56, %v550_v19  ;;  %v1800_v6 = vadd.f32 %v1377_v11, %v1220_v27 }
  0x5b   :  { %v2751_v28 = vsel %vm1713_vm12, 4294967295, %v2750_v28  ;;  %vm1720_vm15 = vmor %vm2753_vm6, %vm2752_vm7  ;;  %vm1759_vm6 = vcmp.le.f32.partialorder %v2764_v54, %v1510_v50  ;;  %v278_v51 = vsel %vm2767_vm5, %v277_v36, 0.0  ;;  %vm2768_vm7 = vcmp.lt.f32.partialorder %v919_v37, 0.0 }
  0x5c   :  { %v2755_v12 = vsel %vm1720_vm15, 4294967295, %v2754_v12  ;;  %vm1733_vm13 = vmand %vm1679_vm1, %vm2756_vm4  ;;  %vm2761_vm4 = vcmp.gt.f32.partialorder %v919_v37, 0.0  ;;  %v317_v2 = vsel %vm2768_vm7, %v314_v45, 1e+30  ;;  %v2769_v50 = vmov 0  ;;  %v1815_v37 = vpop.eup %784 }
  0x5d   :  { %vm1743_vm14 = vmxor %vm1690_vm9, %vm2604_vm8  ;;  %v315_v61 = vsel %vm2761_vm4, %v314_v45, -1e+30  ;;  %vm510_vm9 = vcmp.le.f32.partialorder %v1727_v55, 2e-05  ;;  %v544_v45 = vsel %vm2565_vm2, 1.0, %v1097_v23  ;;  %v318_v54 = vmin.f32 %v310_v13, %v317_v2 }
  0x5e   :  { %v2760_v16 = vsel %vm1743_vm14, 4294967295, %v2759_v16  ;;  %vm1752_vm1 = vmor %vm1669_vm11, %vm493_vm3  ;;  %v316_v26 = vmax.f32 %v308_v7, %v315_v61  ;;  %v383_v7 = vsub.f32 0.0, %v783_v48  ;;  %788 = vrcp.f32 %v461_v33 }
  0x5f   :  { %v2763_v3 = vsel %vm1752_vm1, 4294967295, %v2762_v3  ;;  %vm1774_vm3 = vmxor %vm1733_vm13, %vm2604_vm8  ;;  %v1818_v11 = vsub.f32 0.0, %v1191_v0  ;;  %vm2778_vm10 = vnez %v2682_v24  ;;  %vm2779_vm11 = vnez %v2701_v43 }
  0x60   :  { %v2770_v50 = vsel %vm1774_vm3, 4294967295, %v2769_v50  ;;  %vm2771_vm13 = vmmov %vm2768_vm7  ;;  %vm2785_vm1 = vcmp.ge.f32.partialorder %v1502_v8, 0.0  ;;  %vm2786_vm12 = vnez %v2686_v59  ;;  %v2790_v24 = vmov 0  ;;  %v1862_v59 = vpop.eup %786 }
  0x61   :  { %v324_v34 = vsel %vm2771_vm13, %v323_v47, -1e+30  ;;  %vm2772_vm5 = vmmov %vm2761_vm4  ;;  %vm2776_vm4 = vnez %v2703_v1  ;;  %790 = vrcp.f32 %v544_v45  ;;  %v1876_v13 = vmul.f32 %v886_v22, %v875_v15 }
  0x62   :  { %v326_v36 = vsel %vm2772_vm5, %v323_v47, 1e+30  ;;  %vm1806_vm7 = vmand %vm1759_vm6, %vm510_vm9  ;;  %vm2775_vm9 = vnez %v2689_v63  ;;  %v2781_v47 = vmov 0  ;;  %v2787_v63 = vmov 0 }
  0x63   :  { %vm2777_vm2 = vmand %vm2775_vm9, %vm2776_vm4  ;;  %v1878_v61 = vadd.f32 %v278_v51, %v223_v35  ;;  %vm2797_vm9 = vcmp.le.f32.partialorder %v1781_v60, 2e-05  ;;  %v1891_v33 = vadd.f32 %v1800_v6, %v964_v4  ;;  %v1893_v45 = vmax.f32 %v316_v26, %v324_v34 }
  0x64   :  { %vm2780_vm14 = vmand %vm2778_vm10, %vm2779_vm11  ;;  %vm2789_vm10 = vnez %v2734_v41  ;;  %vm2792_vm11 = vcmp.eq.f32.partialorder %v1325_v62, 0.0  ;;  %v1872_v41 = vmul.f32 0.001, %v552_v5  ;;  %v1895_v15 = vmin.f32 %v318_v54, %v326_v36 }
  0x65   :  { %vm1830_vm0 = vmand %vm2780_vm14, %vm2777_vm2  ;;  %vm2573_vm2 = vcmp.gt.f32.partialorder %v1191_v0, 0.0  ;;  %v388_v22 = vmul.f32 %v383_v7, %v1338_v21  ;;  %v386_v35 = vsub.f32 0.0, %v1815_v37  ;;  %v469_v51 = vsub.f32 0.0, %v1862_v59 }
  0x66   :  { %v2782_v47 = vsel %vm1830_vm0, 4294967295, %v2781_v47  ;;  %vm1842_vm15 = vmor %vm2786_vm12, %vm2785_vm1  ;;  %vm507_vm12 = vcmp.ge.f32.partialorder %v1727_v55, 0.0  ;;  %v2804_v21 = vmov 0  ;;  %v1942_v36 = vadd.f32 %v1224_v18, %v1220_v27 }
  0x67   :  { %v2788_v63 = vsel %vm1842_vm15, 4294967295, %v2787_v63  ;;  %vm1849_vm14 = vmxor %vm2789_vm10, %vm2604_vm8  ;;  %v1946_v40 = vsub.f32 %v1551_v14, %v1289_v31  ;;  %v1950_v54 = vsub.f32 %v1293_v49, %v1289_v31  ;;  %v402_v7 = vmul.f32 %v783_v48, %v1355_v17 }
  0x68   :  { %v2791_v24 = vsel %vm1849_vm14, 4294967295, %v2790_v24  ;;  %vm1857_vm4 = vmxor %vm2792_vm11, %vm2604_vm8  ;;  %vm2806_vm14 = vcmp.lt.f32.partialorder %v1191_v0, 0.0  ;;  %vm2816_vm15 = vcmp.lt.f32.partialorder %v1165_v57, 0.0  ;;  %v1966_v14 = vsub.f32 %v964_v4, %v1800_v6 }
  0x69   :  { %vm1868_vm1 = vmand %vm1806_vm7, %vm2573_vm2  ;;  %v391_v18 = vsel %vm2816_vm15, %v388_v22, 1e+30  ;;  %vm2817_vm11 = vcmp.ge.f32.partialorder %v1891_v33, 0.0  ;;  %v2818_v31 = vmov 0  ;;  %v474_v17 = vmul.f32 %v469_v51, %v1542_v20 }
  0x6a   :  { %vm1884_vm10 = vmand %vm1759_vm6, %vm2797_vm9  ;;  %vm2821_vm15 = vnez %v2763_v3  ;;  %vm2822_vm2 = vnez %v2770_v50  ;;  %vm2824_vm13 = vnez %v2746_v29  ;;  %v2827_v48 = vmov 0 }
  0x6b   :  { %vm1901_vm6 = vmor %vm1857_vm4, %vm507_vm12  ;;  %vm1935_vm12 = vcmp.le.f32.partialorder %v550_v19, %v1872_v41  ;;  %v2813_v19 = vmov 0  ;;  %v2830_v20 = vmov 0  ;;  %v2832_v29 = vmov 0 }
  0x6c   :  { %vm1914_vm7 = vmxor %vm1868_vm1, %vm2604_vm8  ;;  %vm2809_vm1 = vcmp.eq.f32.partialorder %v1101_v25, 0.0  ;;  %v333_v3 = vsub.f32 %v1895_v15, %v1893_v45  ;;  %v415_v50 = vmul.f32 %v386_v35, %v1410_v52  ;;  %v2027_v43 = vmul.f32 %v1168_v58, %v1276_v53 }
  0x6d   :  { %v2805_v21 = vsel %vm1914_vm7, 4294967295, %v2804_v21  ;;  %vm1925_vm3 = vmand %vm1884_vm10, %vm2806_vm14  ;;  %v547_v26 = vsel %vm2809_vm1, 1.0, %v1101_v25  ;;  %vm2812_vm14 = vcmp.eq.f32.partialorder %v1097_v23, 0.0  ;;  %vm2815_vm1 = vcmp.gt.f32.partialorder %v1165_v57, 0.0 }
  0x6e   :  { %vm1956_vm10 = vmxor %vm2812_vm14, %vm2604_vm8  ;;  %v389_v27 = vsel %vm2815_vm1, %v388_v22, -1e+30  ;;  %vm2820_vm14 = vcmp.eq.f32.partialorder %v1818_v11, 0.0  ;;  %vm2829_vm1 = vcmp.ge.f32.partialorder %v1781_v60, 0.0  ;;  %792 = vrcp.f32 %v547_v26 }
  0x6f   :  { %v2814_v19 = vsel %vm1956_vm10, 4294967295, %v2813_v19  ;;  %vm1972_vm9 = vmor %vm1956_vm10, %vm2817_vm11  ;;  %v630_v49 = vsel %vm2820_vm14, 1.0, %v1818_v11  ;;  %vm2825_vm11 = vnez %v2760_v16  ;;  %v2020_v16 = vpop.eup %788  ;;  %v390_v2 = vmax.f32 %v389_v27, 0.0 }
  0x70   :  { %v2819_v31 = vsel %vm1972_vm9, 4294967295, %v2818_v31  ;;  %vm2823_vm0 = vmand %vm2821_vm15, %vm2822_vm2  ;;  %vm2834_vm2 = vcmp.le.f32.partialorder %v1891_v33, 2e-05  ;;  %v2032_v1 = vpop.eup %790  ;;  %v392_v22 = vmin.f32 %v391_v18, 1.0  ;;  %794 = vrcp.f32 %v630_v49 }
  0x71   :  { %vm2826_vm10 = vmand %vm2824_vm13, %vm2825_vm11  ;;  %vm2578_vm13 = vcmp.lt.f32.partialorder %v1101_v25, 0.0  ;;  %vm2837_vm11 = vcmp.lt.f32.partialorder %v1165_v57, 0.0  ;;  %v2843_v35 = vmov 0  ;;  %v430_v5 = vmul.f32 %v1815_v37, %v1502_v8 }
  0x72   :  { %vm1992_vm9 = vmand %vm2826_vm10, %vm2823_vm0  ;;  %v403_v53 = vsel %vm2837_vm11, %v402_v7, -1e+30  ;;  %v488_v8 = vmul.f32 %v1862_v59, %v1570_v30  ;;  %vm2854_vm15 = vcmp.lt.f32.partialorder %v1191_v0, 0.0  ;;  %v555_v30 = vsub.f32 0.0, %v2032_v1 }
  0x73   :  { %v2828_v48 = vsel %vm1992_vm9, 4294967295, %v2827_v48  ;;  %vm2004_vm5 = vmor %vm1857_vm4, %vm2829_vm1  ;;  %vm2842_vm4 = vnez %v2782_v47  ;;  %v477_v37 = vsel %vm2854_vm15, %v474_v17, 1e+30  ;;  %vm2855_vm11 = vcmp.le.f32.partialorder %v1966_v14, 2e-05 }
  0x74   :  { %v2831_v20 = vsel %vm2004_vm5, 4294967295, %v2830_v20  ;;  %vm2011_vm0 = vmxor %vm1925_vm3, %vm2604_vm8  ;;  %v404_v59 = vmax.f32 %v390_v2, %v403_v53  ;;  %v478_v49 = vmin.f32 %v477_v37, 1.0  ;;  %v636_v51 = vand.u32 2147483647, %v1818_v11 }
  0x75   :  { %v2833_v29 = vsel %vm2011_vm0, 4294967295, %v2832_v29  ;;  %vm570_vm10 = vmand %vm1935_vm12, %vm2834_vm2  ;;  %vm2838_vm2 = vcmp.gt.f32.partialorder %v1165_v57, 0.0  ;;  %vm2859_vm0 = vnez %v2755_v12  ;;  %v637_v53 = vand.u32 2147483647, %v1265_v32 }
  0x76   :  { %vm571_vm3 = vmand %vm570_vm10, %vm2578_vm13  ;;  %v405_v52 = vsel %vm2838_vm2, %v402_v7, 1e+30  ;;  %vm2839_vm10 = vnez %v2729_v44  ;;  %vm2840_vm13 = vnez %v2731_v38  ;;  %v2063_v44 = vmul.f32 %v1165_v57, %v1351_v46 }
  0x77   :  { %vm2035_vm1 = vmxor %vm571_vm3, %vm2604_vm8  ;;  %v472_v38 = vsub.f32 0.0, %v2020_v16  ;;  %vm2849_vm2 = vcmp.ge.f32.partialorder %v1966_v14, 0.0  ;;  %v406_v26 = vmin.f32 %v392_v22, %v405_v52 }
  0x78   :  { %vm2841_vm14 = vmand %vm2839_vm10, %vm2840_vm13  ;;  %vm2847_vm13 = vnez %v2819_v31  ;;  %vm2850_vm10 = vnez %v2814_v19  ;;  %v557_v19 = vadd.f32 %v1946_v40, %v973_v10  ;;  %v2141_v22 = vpop.eup %792 }
  0x79   :  { %vm2051_vm3 = vmand %vm2842_vm4, %vm2841_vm14  ;;  %vm2848_vm4 = vcmp.gt.f32.partialorder %v1191_v0, 0.0  ;;  %vm2853_vm14 = vcmp.gt.f32.partialorder %v1168_v58, 0.0  ;;  %v501_v12 = vmul.f32 %v472_v38, %v1727_v55  ;;  %v2869_v55 = vmov 0 }
  0x7a   :  { %v2844_v35 = vsel %vm2051_vm3, 4294967295, %v2843_v35  ;;  %v475_v47 = vsel %vm2848_vm4, %v474_v17, -1e+30  ;;  %vm2078_vm5 = vmor %vm2850_vm10, %vm2849_vm2  ;;  %v416_v46 = vsel %vm2853_vm14, %v415_v50, -1e+30  ;;  %vm2582_vm4 = vcmp.gt.f32.partialorder %v1101_v25, 0.0  ;;  %v795_v39 = vpop.eup %794 }
  0x7b   :  { %vm582_vm2 = vmand %vm1935_vm12, %vm2855_vm11  ;;  %vm2856_vm10 = vcmp.lt.f32.partialorder %v1168_v58, 0.0  ;;  %vm2857_vm14 = vcmp.le.f32.partialorder %v1893_v45, %v1895_v15  ;;  %vm2858_vm3 = vnez %v2751_v28  ;;  %v476_v27 = vmax.f32 %v475_v47, 0.0 }
  0x7c   :  { %v418_v7 = vsel %vm2856_vm10, %v415_v50, 1e+30  ;;  %vm583_vm15 = vmand %vm582_vm2, %vm2582_vm4  ;;  %vm2863_vm2 = vcmp.eq.f32.partialorder %v1265_v32, 0.0  ;;  %vm2864_vm4 = vcmp.lt.f32.partialorder %v1191_v0, 0.0  ;;  %v560_v50 = vmul.f32 %v555_v30, %v1891_v33 }
  0x7d   :  { %vm2860_vm9 = vmand %vm2858_vm3, %vm2859_vm0  ;;  %v633_v18 = vsel %vm2863_vm2, 1.0, %v1265_v32  ;;  %v489_v28 = vsel %vm2864_vm4, %v488_v8, -1e+30  ;;  %vm593_vm0 = vcmp.ge.f32.partialorder %v557_v19, 0.0  ;;  %vm2865_vm3 = vcmp.gt.f32.partialorder %v1191_v0, 0.0 }
  0x7e   :  { %vm2107_vm12 = vmand %vm2860_vm9, %vm2857_vm14  ;;  %v491_v17 = vsel %vm2865_vm3, %v488_v8, 1e+30  ;;  %vm2137_vm4 = vcmp.le.f32.partialorder %v551_v56, %v1872_v41  ;;  %v417_v33 = vmax.f32 %v404_v59, %v416_v46  ;;  %796 = vrcp.f32 %v633_v18 }
  0x7f   :  { %vm584_vm7 = vmxor %vm583_vm15, %vm2604_vm8  ;;  %v2870_v55 = vsel %vm2137_vm4, 4294967295, %v2869_v55  ;;  %v419_v56 = vmin.f32 %v406_v26, %v418_v7  ;;  %v490_v38 = vmax.f32 %v476_v27, %v489_v28  ;;  %v2879_v47 = vmov 0 }
  0x80   :  { %vm585_vm9 = vmand %vm2078_vm5, %vm584_vm7  ;;  %vm596_vm5 = vcmp.le.f32.partialorder %v557_v19, 2e-05  ;;  %vm2871_vm7 = vcmp.eq.f32.partialorder %v1101_v25, 0.0  ;;  %v559_v8 = vsub.f32 %v973_v10, %v1946_v40  ;;  %v558_v57 = vsub.f32 0.0, %v2141_v22 }
  0x81   :  { %vm2866_vm15 = vmand %vm2847_vm13, %vm2035_vm1  ;;  %vm2875_vm13 = vcmp.gt.f32.partialorder %v1168_v58, 0.0  ;;  %v574_v30 = vmul.f32 %v2032_v1, %v1966_v14  ;;  %v641_v1 = vsub.f32 0.0, %v795_v39  ;;  %v2246_v2 = vsel %vm2107_vm12, %v333_v3, 0.0 }
  0x82   :  { %vm2130_vm14 = vmand %vm2866_vm15, %vm585_vm9  ;;  %v433_v52 = vsel %vm2875_vm13, %v430_v5, 1e+30  ;;  %vm2876_vm9 = vnez %v2805_v21  ;;  %vm2878_vm15 = vnez %v2828_v48  ;;  %v492_v21 = vmin.f32 %v478_v49, %v491_v17 }
  0x83   :  { %vm2146_vm2 = vmxor %vm2871_vm7, %vm2604_vm8  ;;  %v587_v17 = vmul.f32 %v558_v57, %v557_v19  ;;  %v642_v15 = vsub.f32 %v964_v4, %v1942_v36  ;;  %v335_v18 = vadd.f32 %v2246_v2, %v1878_v61 }
  0x84   :  { %vm2874_vm1 = vmmov %vm2856_vm10  ;;  %vm2892_vm10 = vnez %v2844_v35  ;;  %v2220_v35 = vmin.f32 %v419_v56, %v433_v52 }
  0x85   :  { %v431_v41 = vsel %vm2874_vm1, %v430_v5, -1e+30  ;;  %vm2877_vm3 = vmand %vm1901_vm6, %vm2876_vm9  ;;  %vm2885_vm6 = vcmp.gt.f32.partialorder %v1325_v62, 0.0  ;;  %v516_v5 = vmul.f32 %v2020_v16, %v1781_v60  ;;  %vm2889_vm1 = vnez %v2788_v63 }
  0x86   :  { %vm2163_vm7 = vmand %vm2878_vm15, %vm2877_vm3  ;;  %v502_v48 = vsel %vm2885_vm6, %v501_v12, -1e+30  ;;  %vm2887_vm3 = vcmp.lt.f32.partialorder %v1097_v23, 0.0  ;;  %v2196_v60 = vmax.f32 %v417_v33, %v431_v41  ;;  %v638_v63 = vadd.f32 %v637_v53, %v636_v51 }
  0x87   :  { %v2880_v47 = vsel %vm2163_vm7, 4294967295, %v2879_v47  ;;  %vm2174_vm13 = vmor %vm2146_vm2, %vm593_vm0  ;;  %vm2886_vm0 = vcmp.gt.f32.partialorder %v1097_v23, 0.0  ;;  %v563_v37 = vsel %vm2887_vm3, %v560_v50, 1e+30  ;;  %v503_v14 = vmax.f32 %v490_v38, %v502_v48 }
  0x88   :  { %vm597_vm9 = vmand %vm2137_vm4, %vm596_vm5  ;;  %v561_v46 = vsel %vm2886_vm0, %v560_v50, -1e+30  ;;  %vm2890_vm5 = vnez %v2791_v24  ;;  %vm607_vm4 = vcmp.ge.f32.partialorder %v559_v8, 0.0  ;;  %v640_v24 = vadd.f32 %v1942_v36, %v964_v4  ;;  %v797_v34 = vpop.eup %796 }
  0x89   :  { %vm2888_vm15 = vmmov %vm2886_vm0  ;;  %vm2895_vm0 = vcmp.lt.f32.partialorder %v1325_v62, 0.0  ;;  %v562_v7 = vmax.f32 %v561_v46, 0.0  ;;  %v564_v27 = vmin.f32 %v563_v37, 1.0  ;;  %v447_v33 = vsub.f32 %v2027_v43, %v2063_v44 }
  0x8a   :  { %vm598_vm6 = vmand %vm597_vm9, %vm2888_vm15  ;;  %v504_v59 = vsel %vm2895_vm0, %v501_v12, 1e+30  ;;  %vm609_vm9 = vcmp.le.f32.partialorder %v559_v8, 2e-05  ;;  %v577_v12 = vsel %vm2888_vm15, %v574_v30, 1e+30  ;;  %v646_v3 = vmul.f32 %v641_v1, %v640_v24 }
  0x8b   :  { %vm2891_vm7 = vmand %vm2889_vm1, %vm2890_vm5  ;;  %v505_v49 = vmin.f32 %v492_v21, %v504_v59  ;;  %vm2903_vm5 = vnez %v2870_v55  ;;  %v2255_v31 = vmul.f32 0.001, %v638_v63  ;;  %v578_v41 = vmin.f32 %v564_v27, %v577_v12  ;;  %v2387_v27 = vld [vmem:[%s2535_s0 + $0x28] sm:$0xff] }
  0x8c   :  { %vm2205_vm11 = vmand %vm2892_vm10, %vm2891_vm7  ;;  %v602_v4 = vmul.f32 %v2141_v22, %v559_v8  ;;  %v2290_v21 = vadd.f32 %v1950_v54, %v973_v10  ;;  %v532_v8 = vmul.f32 %v1633_v9, %v1191_v0  ;;  %v448_v0 = vsub.f32 %v2220_v35, %v2196_v60 }
  0x8d   :  { %vm599_vm3 = vmxor %vm598_vm6, %vm2604_vm8 }
  0x8e   :  { %vm600_vm1 = vmand %vm2174_vm13, %vm599_vm3  ;;  %vm2899_vm13 = vcmp.lt.f32.partialorder %v1097_v23, 0.0 }
  0x8f   :  { %vm2896_vm10 = vmmov %vm2895_vm0  ;;  %v575_v28 = vsel %vm2899_vm13, %v574_v30, -1e+30  ;;  %v761_v30 = vld [vmem:[%s2536_s1 + $0x28] sm:$0xff] }
  0x90   :  { %v517_v26 = vsel %vm2896_vm10, %v516_v5, -1e+30  ;;  %vm2226_vm7 = vmand %vm2130_vm14, %vm600_vm1  ;;  %vm2902_vm14 = vcmp.gt.f32.partialorder %v1325_v62, 0.0  ;;  %v576_v56 = vmax.f32 %v562_v7, %v575_v28  ;;  %vm2585_vm1 = vcmp.gt.f32.partialorder %v1818_v11, 0.0 }
  0x91   :  { %vm2237_vm6 = vmor %vm2146_vm2, %vm607_vm4  ;;  %v519_v19 = vsel %vm2902_vm14, %v516_v5, 1e+30  ;;  %vm443_vm2 = vcmp.le.f32.partialorder %v2196_v60, %v2220_v35  ;;  %v2259_v45 = vmax.f32 %v503_v14, %v517_v26  ;;  %vm2905_vm10 = vcmp.gt.f32.partialorder %v1101_v25, 0.0 }
  0x92   :  { %vm610_vm4 = vmand %vm2903_vm5, %vm609_vm9  ;;  %vm2584_vm9 = vcmp.lt.f32.partialorder %v1818_v11, 0.0  ;;  %v2268_v55 = vmin.f32 %v505_v49, %v519_v19  ;;  %v588_v52 = vsel %vm2905_vm10, %v587_v17, -1e+30  ;;  %vm2907_vm14 = vnez %v2831_v20 }
  0x93   :  { %vm2904_vm12 = vmmov %vm2899_vm13  ;;  %vm2906_vm13 = vcmp.lt.f32.partialorder %v1101_v25, 0.0  ;;  %vm2908_vm5 = vnez %v2833_v29  ;;  %vm652_vm10 = vcmp.ge.f32.partialorder %v640_v24, 0.0  ;;  %v644_v29 = vsub.f32 0.0, %v797_v34 }
  0x94   :  { %vm611_vm0 = vmand %vm610_vm4, %vm2904_vm12  ;;  %v590_v38 = vsel %vm2906_vm13, %v587_v17, 1e+30  ;;  %vm2910_vm12 = vnez %v2880_v47  ;;  %v647_v47 = vsel %vm2585_vm1, %v646_v3, -1e+30  ;;  %v649_v48 = vsel %vm2584_vm9, %v646_v3, 1e+30 }
  0x95   :  { %vm612_vm3 = vmxor %vm611_vm0, %vm2604_vm8  ;;  %v660_v5 = vmul.f32 %v795_v39, %v642_v15  ;;  %v589_v57 = vmax.f32 %v576_v56, %v588_v52  ;;  %v591_v46 = vmin.f32 %v578_v41, %v590_v38  ;;  %v2352_v60 = vsub.f32 %v973_v10, %v1950_v54 }
  0x96   :  { %vm613_vm15 = vmand %vm2237_vm6, %vm612_vm3  ;;  %vm2295_vm6 = vcmp.le.f32.partialorder %v636_v51, %v2255_v31  ;;  %vm655_vm3 = vcmp.le.f32.partialorder %v640_v24, 2e-05  ;;  %v2311_v51 = vmul.f32 %v1325_v62, %v1471_v42  ;;  %v648_v16 = vmax.f32 %v647_v47, 0.0 }
  0x97   :  { %vm2909_vm4 = vmand %vm2907_vm14, %vm2908_vm5  ;;  %v650_v59 = vmin.f32 %v649_v48, 1.0  ;;  %v661_v63 = vsel %vm2584_vm9, %v660_v5, -1e+30  ;;  %v663_v14 = vsel %vm2585_vm1, %v660_v5, 1e+30  ;;  %v673_v1 = vmul.f32 %v644_v29, %v2290_v21 }
  0x98   :  { %vm2284_vm0 = vmand %vm2910_vm12, %vm2909_vm4  ;;  %vm2922_vm4 = vcmp.lt.f32.partialorder %v1101_v25, 0.0  ;;  %vm2923_vm12 = vcmp.gt.f32.partialorder %v1101_v25, 0.0  ;;  %v336_v26 = vmul.f32 0.5, %v1876_v13  ;;  %vm2928_vm9 = vcmp.le.f32.partialorder %v2259_v45, %v2268_v55 }
  0x99   :  { %vm2301_vm13 = vmand %vm2226_vm7, %vm613_vm15  ;;  %vm2917_vm7 = vcmp.eq.f32.partialorder %v1818_v11, 0.0  ;;  %v603_v42 = vsel %vm2922_vm4, %v602_v4, -1e+30  ;;  %v605_v9 = vsel %vm2923_vm12, %v602_v4, 1e+30  ;;  %vm665_vm4 = vcmp.ge.f32.partialorder %v642_v15, 0.0 }
  0x9a   :  { %vm2318_vm15 = vmxor %vm2917_vm7, %vm2604_vm8  ;;  %v604_v10 = vmax.f32 %v589_v57, %v603_v42  ;;  %v606_v35 = vmin.f32 %v591_v46, %v605_v9  ;;  %vm628_vm12 = vcmp.gt.f32.partialorder %v1265_v32, 0.0  ;;  %v662_v49 = vmax.f32 %v648_v16, %v661_v63  ;;  %v2951_v63 = vld [vmem:[#allocation5_spill] sm:$0xff] }
  0x9b   :  { %vm2327_vm14 = vmand %vm2205_vm11, %vm443_vm2  ;;  %vm629_vm11 = vcmp.lt.f32.partialorder %v1265_v32, 0.0  ;;  %v664_v28 = vmin.f32 %v650_v59, %v663_v14  ;;  %v533_v17 = vsub.f32 %v2311_v51, %v532_v8  ;;  %v674_v50 = vsel %vm628_vm12, %v673_v1, -1e+30  ;;  %v2952_v14 = vld [vmem:[#allocation6_spill] sm:$0xff] }
  0x9c   :  { %vm2342_vm7 = vmor %vm2318_vm15, %vm652_vm10  ;;  %v676_v61 = vsel %vm629_vm11, %v673_v1, 1e+30  ;;  %v688_v2 = vmul.f32 %v797_v34, %v2352_v60  ;;  %v449_v19 = vmul.f32 %v448_v0, %v447_v33  ;;  %v617_v3 = vmul.f32 %v1800_v6, %v1101_v25 }
  0x9d   :  { %vm656_vm2 = vmand %vm2295_vm6, %vm655_vm3  ;;  %vm667_vm3 = vcmp.le.f32.partialorder %v642_v15, 2e-05  ;;  %v534_v15 = vsub.f32 %v2268_v55, %v2259_v45  ;;  %v618_v56 = vmul.f32 %v1946_v40, %v1097_v23  ;;  %v758_v23 = vld [vmem:[%s2536_s1 + $0x10] sm:$0xff]  ;;  %v337_v25 = vmul.f32 %v336_v26, %v335_v18 }
  0x9e   :  { %vm657_vm10 = vmand %vm656_vm2, %vm629_vm11  ;;  %vm615_vm2 = vcmp.le.f32.partialorder %v604_v10, %v606_v35  ;;  %v675_v6 = vmax.f32 %v662_v49, %v674_v50  ;;  %v677_v40 = vmin.f32 %v664_v28, %v676_v61  ;;  %v689_v45 = vsel %vm629_vm11, %v688_v2, -1e+30 }
  0x9f   :  { %vm2366_vm5 = vmxor %vm657_vm10, %vm2604_vm8  ;;  %v691_v34 = vsel %vm628_vm12, %v688_v2, 1e+30  ;;  %v450_v55 = vsel %vm2327_vm14, %v449_v19, 0.0  ;;  %v535_v52 = vmul.f32 %v534_v15, %v533_v17  ;;  %v619_v38 = vsub.f32 %v617_v3, %v618_v56  ;;  %v733_v3 = vld [vmem:[%s2537_s2] sm:$0xff] }
  0xa0   :  { %vm2376_vm1 = vmand %vm2284_vm0, %vm2928_vm9  ;;  %v620_v4 = vsub.f32 %v606_v35, %v604_v10  ;;  %vm49_vm11 = vcmp.ne.f32.partialorder %v758_v23, %v758_v23  ;;  %v690_v22 = vmax.f32 %v675_v6, %v689_v45  ;;  %v692_v20 = vmin.f32 %v677_v40, %v691_v34 }
  0xa1   :  { %vm659_vm10 = vmand %vm2342_vm7, %vm2366_vm5  ;;  %vm2940_vm5 = vcmp.eq.f32.partialorder %v1265_v32, 0.0  ;;  %v704_v29 = vmul.f32 %v1818_v11, %v1950_v54  ;;  %v714_v47 = vmul.f32 0.5, %v2387_v27  ;;  %v451_v48 = vadd.f32 %v450_v55, %v337_v25 }
  0xa2   :  { %vm2394_vm9 = vmor %vm2318_vm15, %vm665_vm4  ;;  %vm2933_vm15 = vcmp.ne.f32.partialorder %v761_v30, %v761_v30  ;;  %v706_v57 = vsub.f32 %v692_v20, %v690_v22  ;;  %v76_v1 = vmul.f32 %v2952_v14, %v2951_v63  ;;  %v724_v7 = vmul.f32 %v2387_v27, %v1876_v13 }
  0xa3   :  { %vm668_vm0 = vmand %vm2295_vm6, %vm667_vm3  ;;  %v2419_v41 = vsel %vm2933_vm15, %v2387_v27, %v761_v30  ;;  %vm679_vm15 = vcmp.ge.f32.partialorder %v2290_v21, 0.0 }
  0xa4   :  { %vm669_vm6 = vmand %vm668_vm0, %vm628_vm12  ;;  %v716_v5 = vmul.f32 0.5, %v2419_v41  ;;  %v712_v26 = vmin.f32 %v1876_v13, %v76_v1  ;;  %v725_v18 = vmul.f32 %v76_v1, %v2419_v41 }
  0xa5   :  { %vm2424_vm4 = vmand %vm2301_vm13, %vm615_vm2  ;;  %vm2447_vm2 = vcmp.le.f32.partialorder %v637_v53, %v2255_v31  ;;  %v751_v31 = vld [vmem:[%s2535_s0 + $0x10] sm:$0xff] }
  0xa6   :  { %vm670_vm3 = vmxor %vm669_vm6, %vm2604_vm8  ;;  %v50_v51 = vsel %vm49_vm11, %v751_v31, %v758_v23  ;;  %v715_v46 = vadd.f32 %v751_v31, %v714_v47  ;;  %v719_v42 = vsub.f32 %v751_v31, %v714_v47  ;;  %vm2950_vm11 = vcmp.lt.f32.partialorder %v1818_v11, 0.0 }
  0xa7   :  { %vm671_vm0 = vmand %vm2394_vm9, %vm670_vm3  ;;  %vm682_vm9 = vcmp.le.f32.partialorder %v2290_v21, 2e-05  ;;  %v703_v21 = vmul.f32 %v1942_v36, %v1265_v32  ;;  %v536_v32 = vsel %vm2376_vm1, %v535_v52, 0.0  ;;  %v621_v36 = vmul.f32 %v620_v4, %v619_v38 }
  0xa8   :  { %vm2440_vm13 = vmand %vm659_vm10, %vm671_vm0  ;;  %vm2945_vm10 = vcmp.gt.f32.partialorder %v1818_v11, 0.0  ;;  %vm693_vm0 = vcmp.ge.f32.partialorder %v2352_v60, 0.0  ;;  %v537_v37 = vadd.f32 %v536_v32, %v451_v48  ;;  %v717_v0 = vadd.f32 %v716_v5, %v50_v51 }
  0xa9   :  { %vm2461_vm7 = vmxor %vm2940_vm5, %vm2604_vm8  ;;  %v705_v8 = vsub.f32 %v703_v21, %v704_v29  ;;  %v720_v9 = vsub.f32 %v50_v51, %v716_v5  ;;  %v622_v39 = vsel %vm2424_vm4, %v621_v36, 0.0  ;;  %v727_v17 = vadd.f32 %v725_v18, %v724_v7 }
  0xaa   :  { %vm2470_vm12 = vmor %vm2461_vm7, %vm679_vm15  ;;  %v718_v16 = vmin.f32 %v715_v46, %v717_v0 }
  0xab   :  { %vm683_vm14 = vmand %vm2447_vm2, %vm682_vm9  ;;  %vm695_vm9 = vcmp.le.f32.partialorder %v2352_v60, 2e-05  ;;  %v707_v30 = vmul.f32 %v706_v57, %v705_v8  ;;  %v623_v60 = vadd.f32 %v622_v39, %v537_v37  ;;  %v721_v59 = vmax.f32 %v719_v42, %v720_v9 }
  0xac   :  { %vm684_vm6 = vmand %vm683_vm14, %vm2945_vm10  ;;  %vm701_vm10 = vcmp.le.f32.partialorder %v690_v22, %v692_v20 }
  0xad   :  { %vm685_vm3 = vmxor %vm684_vm6, %vm2604_vm8  ;;  %v722_v35 = vsub.f32 %v718_v16, %v721_v59 }
  0xae   :  { %vm686_vm15 = vmand %vm2470_vm12, %vm685_vm3 }
  0xaf   :  { %vm2493_vm5 = vmand %vm2440_vm13, %vm686_vm15  ;;  %v723_v28 = vmax.f32 %v722_v35, 0.0 }
  0xb0   :  { %vm2499_vm1 = vmor %vm2461_vm7, %vm693_vm0 }
  0xb1   :  { %vm696_vm13 = vmand %vm2447_vm2, %vm695_vm9 }
  0xb2   :  { %vm697_vm12 = vmand %vm696_vm13, %vm2950_vm11 }
  0xb3   :  { %vm698_vm14 = vmxor %vm697_vm12, %vm2604_vm8 }
  0xb4   :  { %vm699_vm7 = vmand %vm2499_vm1, %vm698_vm14 }
  0xb5   :  { %vm700_vm6 = vmand %vm2493_vm5, %vm699_vm7 }
  0xb6   :  { %vm702_vm4 = vmand %vm700_vm6, %vm701_vm10 }
  0xb7   :  { %v708_v10 = vsel %vm702_vm4, %v707_v30, 0.0 }
  0xb8   :  { %v709_v11 = vadd.f32 %v708_v10, %v623_v60 }
  0xba   :  { %v710_v24 = vmul.f32 0.5, %v709_v11 }
  0xbc   :  { %v711_v49 = vmax.f32 %v710_v24, 0.0 }
  0xbe   :  { %v713_v12 = vmin.f32 %v711_v49, %v712_v26 }
  0xc0   :  { %v726_v50 = vmul.f32 %v723_v28, %v713_v12 }
  0xc2   :  { %v728_v61 = vsub.f32 %v727_v17, %v726_v50 }
  0xc4   :  { %v729_v2 = vmax.f32 %v728_v61, 1e-06 }
  0xc6   :  { %798 = vrcp.f32 %v729_v2 }
  0xd0   :  { %v799_v19 = vpop.eup %798 }
  0xd1   :  { %v731_v15 = vmul.f32 %v799_v19, %v726_v50 }
  0xd3   :  { %v732_v56 = vsub.f32 1.0, %v731_v15 }
  0xd5   :  { %v734_v13 = vmul.f32 %v733_v3, %v732_v56 }
  0xd7   :  { %735 = vst [vmem:[#allocation2] sm:$0xff] %v734_v13 }
  0xd8   :  { %811 = shalt.err (!%p808_p4)
}
  0xd9   :  { %s812_s22 = scalar_lea.hbm %s2538_s3, 128 }
  0xda   :  { %p813_p5 = scmp.ne.s32.totalorder %s2538_s3, %s812_s22  ;;  %p816_p6 = scmp.lt.u32.totalorder %s812_s22, %s2538_s3 }
  0xdc   :  { %p818_p7 = pnand %p816_p6, %p813_p5 }
  0xde   :  { %821 = shalt.err (!%p818_p7)
}
  0xdf   :  { %745 = dma.vmem_to_hbm [thread:$0]  %s743_s18, 128, %s2538_s3, [#allocation3]  }
  0xe0   :  { %822 = dma.done.wait [#allocation3], 128  }
  0xe1   :  { %823 = vsyncadd [#allocation3], 4294967168 }
  0xe2   :  { %749 = vsyncpa [#allocation3], 1 }

</bundles_post_ra>
